<compile_context>
chip_gen: v7x
topology: tpu7x:2x2x1
jax: 0.10.0
libtpu: 0.0.40
codegen_flags: <defaults>
</compile_context>

<pallas_src>
import math
import functools

import jax
import jax.numpy as jnp
from jax.experimental import pallas as pl
from jax.experimental.pallas import tpu as pltpu


_CPARAMS = pltpu.CompilerParams(vmem_limit_bytes=32 * 1024 * 1024)


def _vmem():
    # Toy problem sizes: whole-array blocks resident in VMEM, no grid.
    return pl.BlockSpec(memory_space=pltpu.MemorySpace.VMEM)


# ----------------------- in-kernel building blocks --------------------------

def _matmul_bias(x, w, b):
    """bf16 MXU matmul with f32 accumulation, f32 bias add."""
    return jnp.dot(x.astype(jnp.bfloat16), w.astype(jnp.bfloat16),
                   preferred_element_type=jnp.float32) + b


def _layernorm(x, g, b, eps=1e-5):
    mean = jnp.mean(x, axis=-1, keepdims=True)
    var = jnp.mean((x - mean) ** 2, axis=-1, keepdims=True)
    return (x - mean) * jax.lax.rsqrt(var + eps) * g + b


def _mha(q_all, k_all, v_all, wo, bo, B, Sq, Sk, n_head, keep_mask, causal):
    """Multi-head attention + output projection, fully in-kernel, batched.

    q_all: (B*Sq, D), k_all/v_all: (B*Sk, D) -- already projected.
    wo: (D, D), bo: (1, D).
    keep_mask: (B, Sk) int32 (1 = attend) or None.
    The output projection is accumulated per head, avoiding head concat /
    cross-lane shuffles.  Returns (B*Sq, D) float32.
    """
    D = q_all.shape[-1]
    dh = D // n_head
    scale = 1.0 / math.sqrt(dh)

    q3 = q_all.reshape(B, Sq, D)
    k3 = k_all.reshape(B, Sk, D)
    v3 = v_all.reshape(B, Sk, D)

    # combined keep mask (B, Sq, Sk), built once, reused across heads.
    keep = None
    if keep_mask is not None:
        keep = jnp.broadcast_to((keep_mask > 0)[:, None, :], (B, Sq, Sk))
    if causal:
        row = jax.lax.broadcasted_iota(jnp.int32, (Sq, Sk), 0)
        col = jax.lax.broadcasted_iota(jnp.int32, (Sq, Sk), 1)
        cmask = jnp.broadcast_to((row >= col)[None, :, :], (B, Sq, Sk))
        keep = cmask if keep is None else (keep & cmask)

    acc = None
    for h in range(n_head):                           # static, tiny head loop
        qh = q3[:, :, h * dh:(h + 1) * dh].astype(jnp.bfloat16)
        kh = k3[:, :, h * dh:(h + 1) * dh].astype(jnp.bfloat16)
        vh = v3[:, :, h * dh:(h + 1) * dh].astype(jnp.bfloat16)

        # batched scores: (B, Sq, Sk), f32 accumulation on the MXU.
        s = jnp.einsum('bqd,bkd->bqk', qh, kh,
                       preferred_element_type=jnp.float32) * scale
        if keep is not None:
            s = jnp.where(keep, s, -1e9)
        s = s - jnp.max(s, axis=-1, keepdims=True)
        p = jnp.exp(s)
        p = p * pl.reciprocal(jnp.sum(p, axis=-1, keepdims=True), approx=True)

        ctx = jnp.einsum('bqk,bkd->bqd', p.astype(jnp.bfloat16), vh,
                         preferred_element_type=jnp.float32)       # (B, Sq, dh)
        part = jax.lax.dot_general(
            ctx.astype(jnp.bfloat16),
            wo[h * dh:(h + 1) * dh, :].astype(jnp.bfloat16),
            (((2,), (0,)), ((), ())),
            preferred_element_type=jnp.float32)                    # (B, Sq, D)
        acc = part if acc is None else acc + part

    return acc.reshape(B * Sq, D) + bo


# ----------------------------- fused kernels --------------------------------

def _encoder_layer_kernel(x_ref, wqkv_ref, bqkv_ref, wo_ref, bo_ref,
                          ln1g_ref, ln1b_ref,
                          w1_ref, b1_ref, w2_ref, b2_ref,
                          ln2g_ref, ln2b_ref,
                          o_ref, *, B, S, n_head):
    x = x_ref[...]                                         # (B*S, D) f32
    D = x.shape[-1]

    # fused QKV projection + self-attention + output projection.
    # NOTE: reference Encoder.forward calls layer(x) without a mask.
    qkv = _matmul_bias(x, wqkv_ref[...], bqkv_ref[...])    # (B*S, 3D)
    attn = _mha(qkv[:, 0:D], qkv[:, D:2 * D], qkv[:, 2 * D:3 * D],
                wo_ref[...], bo_ref[...], B, S, S, n_head,
                keep_mask=None, causal=False)
    x1 = _layernorm(x + attn, ln1g_ref[...], ln1b_ref[...])

    # fused FFN (hidden activation never leaves VMEM/vregs)
    h = jnp.maximum(_matmul_bias(x1, w1_ref[...], b1_ref[...]), 0.0)
    f = _matmul_bias(h, w2_ref[...], b2_ref[...])
    o_ref[...] = _layernorm(x1 + f, ln2g_ref[...], ln2b_ref[...])


def _decoder_layer_kernel(y_ref, enc_ref, tmask_ref, smask_ref,
                          sa_wqkv_ref, sa_bqkv_ref, sa_wo_ref, sa_bo_ref,
                          ln1g_ref, ln1b_ref,
                          ca_wq_ref, ca_bq_ref, ca_wkv_ref, ca_bkv_ref,
                          ca_wo_ref, ca_bo_ref,
                          ln2g_ref, ln2b_ref,
                          w1_ref, b1_ref, w2_ref, b2_ref,
                          ln3g_ref, ln3b_ref,
                          o_ref, *, B, St, Ss, n_head):
    y = y_ref[...]                                         # (B*St, D)
    enc = enc_ref[...]                                     # (B*Ss, D)
    D = y.shape[-1]

    # masked self-attention (causal built in-kernel + key padding)
    qkv = _matmul_bias(y, sa_wqkv_ref[...], sa_bqkv_ref[...])
    sa = _mha(qkv[:, 0:D], qkv[:, D:2 * D], qkv[:, 2 * D:3 * D],
              sa_wo_ref[...], sa_bo_ref[...], B, St, St, n_head,
              keep_mask=tmask_ref[...], causal=True)
    y1 = _layernorm(y + sa, ln1g_ref[...], ln1b_ref[...])

    # cross-attention over encoder output (source key padding)
    q = _matmul_bias(y1, ca_wq_ref[...], ca_bq_ref[...])
    kv = _matmul_bias(enc, ca_wkv_ref[...], ca_bkv_ref[...])
    ca = _mha(q, kv[:, 0:D], kv[:, D:2 * D],
              ca_wo_ref[...], ca_bo_ref[...], B, St, Ss, n_head,
              keep_mask=smask_ref[...], causal=False)
    y2 = _layernorm(y1 + ca, ln2g_ref[...], ln2b_ref[...])

    # fused FFN
    h = jnp.maximum(_matmul_bias(y2, w1_ref[...], b1_ref[...]), 0.0)
    f = _matmul_bias(h, w2_ref[...], b2_ref[...])
    o_ref[...] = _layernorm(y2 + f, ln3g_ref[...], ln3b_ref[...])


def _out_linear_kernel(x_ref, w_ref, b_ref, o_ref):
    o_ref[...] = jnp.dot(x_ref[...].astype(jnp.bfloat16),
                         w_ref[...].astype(jnp.bfloat16),
                         preferred_element_type=jnp.float32) + b_ref[...]


# ---------------------------- pallas_call wrappers ---------------------------

def encoder_layer_fwd(p, x2d, B, S, n_head):
    D = x2d.shape[-1]
    a, f = p['attn'], p['ffn']
    args = (
        x2d,
        a['wqkv'], a['bqkv'].reshape(1, -1),
        a['wo'], a['bo'].reshape(1, -1),
        p['ln1_g'].reshape(1, -1), p['ln1_b'].reshape(1, -1),
        f['w1'], f['b1'].reshape(1, -1),
        f['w2'], f['b2'].reshape(1, -1),
        p['ln2_g'].reshape(1, -1), p['ln2_b'].reshape(1, -1),
    )
    return pl.pallas_call(
        functools.partial(_encoder_layer_kernel, B=B, S=S, n_head=n_head),
        out_shape=jax.ShapeDtypeStruct((B * S, D), jnp.float32),
        in_specs=[_vmem()] * len(args),
        out_specs=_vmem(),
        compiler_params=_CPARAMS,
    )(*args)


def decoder_layer_fwd(p, y2d, enc2d, tgt_keep, src_keep, B, St, Ss, n_head):
    D = y2d.shape[-1]
    sa, ca, f = p['self_attn'], p['cross_attn'], p['ffn']
    args = (
        y2d, enc2d, tgt_keep, src_keep,
        sa['wqkv'], sa['bqkv'].reshape(1, -1),
        sa['wo'], sa['bo'].reshape(1, -1),
        p['ln1_g'].reshape(1, -1), p['ln1_b'].reshape(1, -1),
        ca['wq'], ca['bq'].reshape(1, -1),
        ca['wkv'], ca['bkv'].reshape(1, -1),
        ca['wo'], ca['bo'].reshape(1, -1),
        p['ln2_g'].reshape(1, -1), p['ln2_b'].reshape(1, -1),
        f['w1'], f['b1'].reshape(1, -1),
        f['w2'], f['b2'].reshape(1, -1),
        p['ln3_g'].reshape(1, -1), p['ln3_b'].reshape(1, -1),
    )
    return pl.pallas_call(
        functools.partial(_decoder_layer_kernel, B=B, St=St, Ss=Ss,
                          n_head=n_head),
        out_shape=jax.ShapeDtypeStruct((B * St, D), jnp.float32),
        in_specs=[_vmem()] * len(args),
        out_specs=_vmem(),
        compiler_params=_CPARAMS,
    )(*args)


def output_linear(x2d, w, b):
    # TODO(synk): with a realistic vocab (32k+) this must become a tiled
    # (M//tm, N//tn, K//tk) grid with a VMEM accumulator; fine untiled here.
    M = x2d.shape[0]
    N = w.shape[1]
    return pl.pallas_call(
        _out_linear_kernel,
        out_shape=jax.ShapeDtypeStruct((M, N), jnp.float32),
        in_specs=[_vmem()] * 3,
        out_specs=_vmem(),
        compiler_params=_CPARAMS,
    )(x2d, w, b.reshape(1, -1))


# ------------------------------ model glue ----------------------------------

def sinusoidal_pe(max_len, d_model):
    pos = jnp.arange(max_len, dtype=jnp.float32)[:, None]
    i = jnp.arange(0, d_model, 2, dtype=jnp.float32)
    angle = pos / jnp.power(10000.0, i / d_model)
    pe = jnp.zeros((max_len, d_model), jnp.float32)
    pe = pe.at[:, 0::2].set(jnp.sin(angle))
    pe = pe.at[:, 1::2].set(jnp.cos(angle))
    return pe


def embed(emb_table, pe, tokens):
    # TODO(synk): embedding gather stays in plain JAX (data-dependent gather,
    # not a rectangular-tile hot path).
    tok = jnp.take(emb_table, tokens, axis=0)              # (B, S, D)
    S = tokens.shape[1]
    return tok + pe[:S][None, :, :]


def transformer_fwd(params, src, tgt, cfg):
    n_head = cfg['n_head']
    D = cfg['d_model']
    B, Ss = src.shape
    _, St = tgt.shape

    # compact key-padding masks (B, S) int32; causal part is built in-kernel.
    src_keep = (src != cfg['src_pad_idx']).astype(jnp.int32)
    tgt_keep = (tgt != cfg['tgt_pad_idx']).astype(jnp.int32)

    # encoder (reference Encoder.forward calls layer(x) without a mask)
    x = embed(params['enc_emb'], params['pe'], src).reshape(B * Ss, D)
    for lp in params['enc_layers']:
        x = encoder_layer_fwd(lp, x, B, Ss, n_head)
    enc2d = x

    # decoder
    y = embed(params['dec_emb'], params['pe'], tgt).reshape(B * St, D)
    for lp in params['dec_layers']:
        y = decoder_layer_fwd(lp, y, enc2d, tgt_keep, src_keep,
                              B, St, Ss, n_head)

    logits = output_linear(y, params['out_w'], params['out_b'])
    return logits.reshape(B, St, -1)


# ------------------------------- param init ---------------------------------

class KeyGen:
    def __init__(self, key):
        self.key = key

    def __call__(self):
        self.key, sub = jax.random.split(self.key)
        return sub


def init_linear_params(kg, din, dout):
    return (jax.random.normal(kg(), (din, dout), jnp.float32) * 0.02,
            jnp.zeros((dout,), jnp.float32))


def init_self_mha(kg, d_model):
    wqkv, bqkv = init_linear_params(kg, d_model, 3 * d_model)   # fused Q|K|V
    wo, bo = init_linear_params(kg, d_model, d_model)
    return dict(wqkv=wqkv, bqkv=bqkv, wo=wo, bo=bo)


def init_cross_mha(kg, d_model):
    wq, bq = init_linear_params(kg, d_model, d_model)
    wkv, bkv = init_linear_params(kg, d_model, 2 * d_model)     # fused K|V
    wo, bo = init_linear_params(kg, d_model, d_model)
    return dict(wq=wq, bq=bq, wkv=wkv, bkv=bkv, wo=wo, bo=bo)


def init_ffn(kg, d_model, d_ffn):
    w1, b1 = init_linear_params(kg, d_model, d_ffn)
    w2, b2 = init_linear_params(kg, d_ffn, d_model)
    return dict(w1=w1, b1=b1, w2=w2, b2=b2)


def init_params(key, cfg):
    kg = KeyGen(key)
    d = cfg['d_model']
    params = {
        'enc_emb': jax.random.normal(kg(), (cfg['enc_voc_size'], d), jnp.float32) * 0.02,
        'dec_emb': jax.random.normal(kg(), (cfg['dec_voc_size'], d), jnp.float32) * 0.02,
        'pe': sinusoidal_pe(cfg['max_len'], d),
        'enc_layers': [],
        'dec_layers': [],
    }
    for _ in range(cfg['n_layers']):
        params['enc_layers'].append(dict(
            attn=init_self_mha(kg, d),
            ffn=init_ffn(kg, d, cfg['ffn_hidden']),
            ln1_g=jnp.ones((d,), jnp.float32), ln1_b=jnp.zeros((d,), jnp.float32),
            ln2_g=jnp.ones((d,), jnp.float32), ln2_b=jnp.zeros((d,), jnp.float32),
        ))
    for _ in range(cfg['n_layers']):
        params['dec_layers'].append(dict(
            self_attn=init_self_mha(kg, d),
            cross_attn=init_cross_mha(kg, d),
            ffn=init_ffn(kg, d, cfg['ffn_hidden']),
            ln1_g=jnp.ones((d,), jnp.float32), ln1_b=jnp.zeros((d,), jnp.float32),
            ln2_g=jnp.ones((d,), jnp.float32), ln2_b=jnp.zeros((d,), jnp.float32),
            ln3_g=jnp.ones((d,), jnp.float32), ln3_b=jnp.zeros((d,), jnp.float32),
        ))
    params['out_w'], params['out_b'] = init_linear_params(kg, d, cfg['dec_voc_size'])
    return params


# ----------------------------------- main ------------------------------------

if __name__ == "__main__":
    cfg = dict(
        src_pad_idx=0,
        tgt_pad_idx=0,
        enc_voc_size=32,
        dec_voc_size=32,
        d_model=32,
        n_head=4,
        max_len=16,
        ffn_hidden=64,
        n_layers=2,
        drop_prob=0.0,   # identity at inference
    )
    assert cfg['d_model'] % cfg['n_head'] == 0

    key = jax.random.PRNGKey(0)
    k_param, k_src, k_tgt = jax.random.split(key, 3)

    B, S_src, S_tgt = 2, 8, 8
    src = jax.random.randint(k_src, (B, S_src), 1, cfg['enc_voc_size'], dtype=jnp.int32)
    tgt = jax.random.randint(k_tgt, (B, S_tgt), 1, cfg['dec_voc_size'], dtype=jnp.int32)
    # introduce some padding tokens to exercise the masks
    src = src.at[:, -2:].set(cfg['src_pad_idx'])
    tgt = tgt.at[:, -1:].set(cfg['tgt_pad_idx'])

    params = init_params(k_param, cfg)

    fwd = jax.jit(functools.partial(transformer_fwd, cfg=cfg))
    out = fwd(params, src, tgt)
    out = jax.block_until_ready(out)

    assert out.shape == (B, S_tgt, cfg['dec_voc_size']), out.shape
    assert jnp.all(jnp.isfinite(out))
    print("KERNEL_OK")
</pallas_src>

<mosaic_0001>
module attributes {stable_mosaic.version = 11 : i64} {
  func.func @_out_linear_kernel(%arg0: memref<16x32xf32, #tpu.memory_space<vmem>>, %arg1: memref<32x32xf32, #tpu.memory_space<vmem>>, %arg2: memref<1x32xf32, #tpu.memory_space<vmem>>, %arg3: memref<16x32xf32, #tpu.memory_space<vmem>>) attributes {dimension_semantics = [], scalar_prefetch = 0 : i64, scratch_operands = 0 : i64, tpu.core_type = #tpu.core_type<tc>} {
    %c0 = arith.constant 0 : index
    %c0_0 = arith.constant 0 : index
    %0 = vector.load %arg0[%c0, %c0_0] : memref<16x32xf32, #tpu.memory_space<vmem>>, vector<16x32xf32>
    %1 = arith.truncf %0 : vector<16x32xf32> to vector<16x32xbf16>
    %c0_1 = arith.constant 0 : index
    %c0_2 = arith.constant 0 : index
    %2 = vector.load %arg1[%c0_1, %c0_2] : memref<32x32xf32, #tpu.memory_space<vmem>>, vector<32x32xf32>
    %3 = arith.truncf %2 : vector<32x32xf32> to vector<32x32xbf16>
    %cst = arith.constant dense<0.000000e+00> : vector<16x32xf32>
    %4 = tpu.matmul %1, %3, %cst {dimension_numbers = #tpu.dot_dimension_numbers<[1], [0], [0], [1], [0, 0, 1, 1], [], []>} : vector<16x32xbf16>, vector<32x32xbf16>, vector<16x32xf32> -> vector<16x32xf32>
    %c0_3 = arith.constant 0 : index
    %c0_4 = arith.constant 0 : index
    %5 = vector.load %arg2[%c0_3, %c0_4] : memref<1x32xf32, #tpu.memory_space<vmem>>, vector<1x32xf32>
    %6 = vector.broadcast %5 : vector<1x32xf32> to vector<16x32xf32>
    %7 = arith.addf %4, %6 : vector<16x32xf32>
    %c0_5 = arith.constant 0 : index
    %c0_6 = arith.constant 0 : index
    %8 = vector.load %arg3[%c0_5, %c0_6] : memref<16x32xf32, #tpu.memory_space<vmem>>, vector<16x32xf32>
    tpu.vector_store %arg3[%c0_5, %c0_6], %7 {strides = array<i32>} : memref<16x32xf32, #tpu.memory_space<vmem>>, vector<16x32xf32>,
    return
  }
}

module attributes {stable_mosaic.version = 11 : i64} {
  func.func @_encoder_layer_kernel(%arg0: memref<16x32xf32, #tpu.memory_space<vmem>>, %arg1: memref<32x96xf32, #tpu.memory_space<vmem>>, %arg2: memref<1x96xf32, #tpu.memory_space<vmem>>, %arg3: memref<32x32xf32, #tpu.memory_space<vmem>>, %arg4: memref<1x32xf32, #tpu.memory_space<vmem>>, %arg5: memref<1x32xf32, #tpu.memory_space<vmem>>, %arg6: memref<1x32xf32, #tpu.memory_space<vmem>>, %arg7: memref<32x64xf32, #tpu.memory_space<vmem>>, %arg8: memref<1x64xf32, #tpu.memory_space<vmem>>, %arg9: memref<64x32xf32, #tpu.memory_space<vmem>>, %arg10: memref<1x32xf32, #tpu.memory_space<vmem>>, %arg11: memref<1x32xf32, #tpu.memory_space<vmem>>, %arg12: memref<1x32xf32, #tpu.memory_space<vmem>>, %arg13: memref<16x32xf32, #tpu.memory_space<vmem>>) attributes {dimension_semantics = [], scalar_prefetch = 0 : i64, scratch_operands = 0 : i64, tpu.core_type = #tpu.core_type<tc>} {
    %c0 = arith.constant 0 : index
    %c0_0 = arith.constant 0 : index
    %0 = vector.load %arg0[%c0, %c0_0] : memref<16x32xf32, #tpu.memory_space<vmem>>, vector<16x32xf32>
    %c0_1 = arith.constant 0 : index
    %c0_2 = arith.constant 0 : index
    %1 = vector.load %arg1[%c0_1, %c0_2] : memref<32x96xf32, #tpu.memory_space<vmem>>, vector<32x96xf32>
    %c0_3 = arith.constant 0 : index
    %c0_4 = arith.constant 0 : index
    %2 = vector.load %arg2[%c0_3, %c0_4] : memref<1x96xf32, #tpu.memory_space<vmem>>, vector<1x96xf32>
    %3 = arith.truncf %0 : vector<16x32xf32> to vector<16x32xbf16>
    %4 = arith.truncf %1 : vector<32x96xf32> to vector<32x96xbf16>
    %cst = arith.constant dense<0.000000e+00> : vector<16x96xf32>
    %5 = tpu.matmul %3, %4, %cst {dimension_numbers = #tpu.dot_dimension_numbers<[1], [0], [0], [1], [0, 0, 1, 1], [], []>} : vector<16x32xbf16>, vector<32x96xbf16>, vector<16x96xf32> -> vector<16x96xf32>
    %6 = vector.broadcast %2 : vector<1x96xf32> to vector<16x96xf32>
    %7 = arith.addf %5, %6 : vector<16x96xf32>
    %8 = vector.extract_strided_slice %7 {offsets = [0, 0], sizes = [16, 32], strides = [1, 1]} : vector<16x96xf32> to vector<16x32xf32>
    %9 = vector.extract_strided_slice %7 {offsets = [0, 32], sizes = [16, 32], strides = [1, 1]} : vector<16x96xf32> to vector<16x32xf32>
    %10 = vector.extract_strided_slice %7 {offsets = [0, 64], sizes = [16, 32], strides = [1, 1]} : vector<16x96xf32> to vector<16x32xf32>
    %c0_5 = arith.constant 0 : index
    %c0_6 = arith.constant 0 : index
    %11 = vector.load %arg3[%c0_5, %c0_6] : memref<32x32xf32, #tpu.memory_space<vmem>>, vector<32x32xf32>
    %c0_7 = arith.constant 0 : index
    %c0_8 = arith.constant 0 : index
    %12 = vector.load %arg4[%c0_7, %c0_8] : memref<1x32xf32, #tpu.memory_space<vmem>>, vector<1x32xf32>
    %13 = vector.shape_cast %8 : vector<16x32xf32> to vector<2x8x32xf32>
    %14 = vector.shape_cast %9 : vector<16x32xf32> to vector<2x8x32xf32>
    %15 = vector.shape_cast %10 : vector<16x32xf32> to vector<2x8x32xf32>
    %16 = vector.extract_strided_slice %13 {offsets = [0, 0, 0], sizes = [2, 8, 8], strides = [1, 1, 1]} : vector<2x8x32xf32> to vector<2x8x8xf32>
    %17 = arith.truncf %16 : vector<2x8x8xf32> to vector<2x8x8xbf16>
    %18 = vector.extract_strided_slice %14 {offsets = [0, 0, 0], sizes = [2, 8, 8], strides = [1, 1, 1]} : vector<2x8x32xf32> to vector<2x8x8xf32>
    %19 = arith.truncf %18 : vector<2x8x8xf32> to vector<2x8x8xbf16>
    %20 = vector.extract_strided_slice %15 {offsets = [0, 0, 0], sizes = [2, 8, 8], strides = [1, 1, 1]} : vector<2x8x32xf32> to vector<2x8x8xf32>
    %21 = arith.truncf %20 : vector<2x8x8xf32> to vector<2x8x8xbf16>
    "tpu.trace_start"() <{level = 10 : i32, message = "bqd,bkd->bqk"}> : () -> ()
    %cst_9 = arith.constant dense<0.000000e+00> : vector<2x8x8xf32>
    %22 = tpu.matmul %17, %19, %cst_9 {dimension_numbers = #tpu.dot_dimension_numbers<[2], [2], [1], [1], [0, 0, 0, 1, 1, 1], [0], [0]>} : vector<2x8x8xbf16>, vector<2x8x8xbf16>, vector<2x8x8xf32> -> vector<2x8x8xf32>
    "tpu.trace_stop"() : () -> ()
    %cst_10 = arith.constant 0.353553385 : f32
    %23 = vector.broadcast %cst_10 : f32 to vector<2x8x8xf32>
    %24 = arith.mulf %22, %23 : vector<2x8x8xf32>
    %cst_11 = arith.constant dense<0xFF800000> : vector<2x8xf32>
    %25 = vector.multi_reduction <maximumf>, %24, %cst_11 [2] : vector<2x8x8xf32> to vector<2x8xf32>
    %26 = vector.shape_cast %25 : vector<2x8xf32> to vector<2x8x1xf32>
    %27 = vector.broadcast %26 : vector<2x8x1xf32> to vector<2x8x8xf32>
    %28 = arith.subf %24, %27 : vector<2x8x8xf32>
    %29 = math.exp %28 : vector<2x8x8xf32>
    %cst_12 = arith.constant dense<0.000000e+00> : vector<2x8xf32>
    %30 = vector.multi_reduction <add>, %29, %cst_12 [2] : vector<2x8x8xf32> to vector<2x8xf32>
    %31 = vector.shape_cast %30 : vector<2x8xf32> to vector<2x8x1xf32>
    %32 = tpu.reciprocal %31 {approx = true} : vector<2x8x1xf32> -> vector<2x8x1xf32>
    %33 = vector.broadcast %32 : vector<2x8x1xf32> to vector<2x8x8xf32>
    %34 = arith.mulf %29, %33 : vector<2x8x8xf32>
    %35 = arith.truncf %34 : vector<2x8x8xf32> to vector<2x8x8xbf16>
    "tpu.trace_start"() <{level = 10 : i32, message = "bqk,bkd->bqd"}> : () -> ()
    %cst_13 = arith.constant dense<0.000000e+00> : vector<2x8x8xf32>
    %36 = tpu.matmul %35, %21, %cst_13 {dimension_numbers = #tpu.dot_dimension_numbers<[2], [1], [1], [2], [0, 0, 0, 1, 1, 2], [0], [0]>} : vector<2x8x8xbf16>, vector<2x8x8xbf16>, vector<2x8x8xf32> -> vector<2x8x8xf32>
    "tpu.trace_stop"() : () -> ()
    %37 = arith.truncf %36 : vector<2x8x8xf32> to vector<2x8x8xbf16>
    %38 = vector.extract_strided_slice %11 {offsets = [0, 0], sizes = [8, 32], strides = [1, 1]} : vector<32x32xf32> to vector<8x32xf32>
    %39 = arith.truncf %38 : vector<8x32xf32> to vector<8x32xbf16>
    %cst_14 = arith.constant dense<0.000000e+00> : vector<2x8x32xf32>
    %40 = tpu.matmul %37, %39, %cst_14 {dimension_numbers = #tpu.dot_dimension_numbers<[2], [0], [0, 1], [1], [0, 0, 0, 1, 1, 1], [], []>} : vector<2x8x8xbf16>, vector<8x32xbf16>, vector<2x8x32xf32> -> vector<2x8x32xf32>
    %41 = vector.extract_strided_slice %13 {offsets = [0, 0, 8], sizes = [2, 8, 8], strides = [1, 1, 1]} : vector<2x8x32xf32> to vector<2x8x8xf32>
    %42 = arith.truncf %41 : vector<2x8x8xf32> to vector<2x8x8xbf16>
    %43 = vector.extract_strided_slice %14 {offsets = [0, 0, 8], sizes = [2, 8, 8], strides = [1, 1, 1]} : vector<2x8x32xf32> to vector<2x8x8xf32>
    %44 = arith.truncf %43 : vector<2x8x8xf32> to vector<2x8x8xbf16>
    %45 = vector.extract_strided_slice %15 {offsets = [0, 0, 8], sizes = [2, 8, 8], strides = [1, 1, 1]} : vector<2x8x32xf32> to vector<2x8x8xf32>
    %46 = arith.truncf %45 : vector<2x8x8xf32> to vector<2x8x8xbf16>
    "tpu.trace_start"() <{level = 10 : i32, message = "bqd,bkd->bqk"}> : () -> ()
    %cst_15 = arith.constant dense<0.000000e+00> : vector<2x8x8xf32>
    %47 = tpu.matmul %42, %44, %cst_15 {dimension_numbers = #tpu.dot_dimension_numbers<[2], [2], [1], [1], [0, 0, 0, 1, 1, 1], [0], [0]>} : vector<2x8x8xbf16>, vector<2x8x8xbf16>, vector<2x8x8xf32> -> vector<2x8x8xf32>
    "tpu.trace_stop"() : () -> ()
    %cst_16 = arith.constant 0.353553385 : f32
    %48 = vector.broadcast %cst_16 : f32 to vector<2x8x8xf32>
    %49 = arith.mulf %47, %48 : vector<2x8x8xf32>
    %cst_17 = arith.constant dense<0xFF800000> : vector<2x8xf32>
    %50 = vector.multi_reduction <maximumf>, %49, %cst_17 [2] : vector<2x8x8xf32> to vector<2x8xf32>
    %51 = vector.shape_cast %50 : vector<2x8xf32> to vector<2x8x1xf32>
    %52 = vector.broadcast %51 : vector<2x8x1xf32> to vector<2x8x8xf32>
    %53 = arith.subf %49, %52 : vector<2x8x8xf32>
    %54 = math.exp %53 : vector<2x8x8xf32>
    %cst_18 = arith.constant dense<0.000000e+00> : vector<2x8xf32>
    %55 = vector.multi_reduction <add>, %54, %cst_18 [2] : vector<2x8x8xf32> to vector<2x8xf32>
    %56 = vector.shape_cast %55 : vector<2x8xf32> to vector<2x8x1xf32>
    %57 = tpu.reciprocal %56 {approx = true} : vector<2x8x1xf32> -> vector<2x8x1xf32>
    %58 = vector.broadcast %57 : vector<2x8x1xf32> to vector<2x8x8xf32>
    %59 = arith.mulf %54, %58 : vector<2x8x8xf32>
    %60 = arith.truncf %59 : vector<2x8x8xf32> to vector<2x8x8xbf16>
    "tpu.trace_start"() <{level = 10 : i32, message = "bqk,bkd->bqd"}> : () -> ()
    %cst_19 = arith.constant dense<0.000000e+00> : vector<2x8x8xf32>
    %61 = tpu.matmul %60, %46, %cst_19 {dimension_numbers = #tpu.dot_dimension_numbers<[2], [1], [1], [2], [0, 0, 0, 1, 1, 2], [0], [0]>} : vector<2x8x8xbf16>, vector<2x8x8xbf16>, vector<2x8x8xf32> -> vector<2x8x8xf32>
    "tpu.trace_stop"() : () -> ()
    %62 = arith.truncf %61 : vector<2x8x8xf32> to vector<2x8x8xbf16>
    %63 = vector.extract_strided_slice %11 {offsets = [8, 0], sizes = [8, 32], strides = [1, 1]} : vector<32x32xf32> to vector<8x32xf32>
    %64 = arith.truncf %63 : vector<8x32xf32> to vector<8x32xbf16>
    %cst_20 = arith.constant dense<0.000000e+00> : vector<2x8x32xf32>
    %65 = tpu.matmul %62, %64, %cst_20 {dimension_numbers = #tpu.dot_dimension_numbers<[2], [0], [0, 1], [1], [0, 0, 0, 1, 1, 1], [], []>} : vector<2x8x8xbf16>, vector<8x32xbf16>, vector<2x8x32xf32> -> vector<2x8x32xf32>
    %66 = arith.addf %40, %65 : vector<2x8x32xf32>
    %67 = vector.extract_strided_slice %13 {offsets = [0, 0, 16], sizes = [2, 8, 8], strides = [1, 1, 1]} : vector<2x8x32xf32> to vector<2x8x8xf32>
    %68 = arith.truncf %67 : vector<2x8x8xf32> to vector<2x8x8xbf16>
    %69 = vector.extract_strided_slice %14 {offsets = [0, 0, 16], sizes = [2, 8, 8], strides = [1, 1, 1]} : vector<2x8x32xf32> to vector<2x8x8xf32>
    %70 = arith.truncf %69 : vector<2x8x8xf32> to vector<2x8x8xbf16>
    %71 = vector.extract_strided_slice %15 {offsets = [0, 0, 16], sizes = [2, 8, 8], strides = [1, 1, 1]} : vector<2x8x32xf32> to vector<2x8x8xf32>
    %72 = arith.truncf %71 : vector<2x8x8xf32> to vector<2x8x8xbf16>
    "tpu.trace_start"() <{level = 10 : i32, message = "bqd,bkd->bqk"}> : () -> ()
    %cst_21 = arith.constant dense<0.000000e+00> : vector<2x8x8xf32>
    %73 = tpu.matmul %68, %70, %cst_21 {dimension_numbers = #tpu.dot_dimension_numbers<[2], [2], [1], [1], [0, 0, 0, 1, 1, 1], [0], [0]>} : vector<2x8x8xbf16>, vector<2x8x8xbf16>, vector<2x8x8xf32> -> vector<2x8x8xf32>
    "tpu.trace_stop"() : () -> ()
    %cst_22 = arith.constant 0.353553385 : f32
    %74 = vector.broadcast %cst_22 : f32 to vector<2x8x8xf32>
    %75 = arith.mulf %73, %74 : vector<2x8x8xf32>
    %cst_23 = arith.constant dense<0xFF800000> : vector<2x8xf32>
    %76 = vector.multi_reduction <maximumf>, %75, %cst_23 [2] : vector<2x8x8xf32> to vector<2x8xf32>
    %77 = vector.shape_cast %76 : vector<2x8xf32> to vector<2x8x1xf32>
    %78 = vector.broadcast %77 : vector<2x8x1xf32> to vector<2x8x8xf32>
    %79 = arith.subf %75, %78 : vector<2x8x8xf32>
    %80 = math.exp %79 : vector<2x8x8xf32>
    %cst_24 = arith.constant dense<0.000000e+00> : vector<2x8xf32>
    %81 = vector.multi_reduction <add>, %80, %cst_24 [2] : vector<2x8x8xf32> to vector<2x8xf32>
    %82 = vector.shape_cast %81 : vector<2x8xf32> to vector<2x8x1xf32>
    %83 = tpu.reciprocal %82 {approx = true} : vector<2x8x1xf32> -> vector<2x8x1xf32>
    %84 = vector.broadcast %83 : vector<2x8x1xf32> to vector<2x8x8xf32>
    %85 = arith.mulf %80, %84 : vector<2x8x8xf32>
    %86 = arith.truncf %85 : vector<2x8x8xf32> to vector<2x8x8xbf16>
    "tpu.trace_start"() <{level = 10 : i32, message = "bqk,bkd->bqd"}> : () -> ()
    %cst_25 = arith.constant dense<0.000000e+00> : vector<2x8x8xf32>
    %87 = tpu.matmul %86, %72, %cst_25 {dimension_numbers = #tpu.dot_dimension_numbers<[2], [1], [1], [2], [0, 0, 0, 1, 1, 2], [0], [0]>} : vector<2x8x8xbf16>, vector<2x8x8xbf16>, vector<2x8x8xf32> -> vector<2x8x8xf32>
    "tpu.trace_stop"() : () -> ()
    %88 = arith.truncf %87 : vector<2x8x8xf32> to vector<2x8x8xbf16>
    %89 = vector.extract_strided_slice %11 {offsets = [16, 0], sizes = [8, 32], strides = [1, 1]} : vector<32x32xf32> to vector<8x32xf32>
    %90 = arith.truncf %89 : vector<8x32xf32> to vector<8x32xbf16>
    %cst_26 = arith.constant dense<0.000000e+00> : vector<2x8x32xf32>
    %91 = tpu.matmul %88, %90, %cst_26 {dimension_numbers = #tpu.dot_dimension_numbers<[2], [0], [0, 1], [1], [0, 0, 0, 1, 1, 1], [], []>} : vector<2x8x8xbf16>, vector<8x32xbf16>, vector<2x8x32xf32> -> vector<2x8x32xf32>
    %92 = arith.addf %66, %91 : vector<2x8x32xf32>
    %93 = vector.extract_strided_slice %13 {offsets = [0, 0, 24], sizes = [2, 8, 8], strides = [1, 1, 1]} : vector<2x8x32xf32> to vector<2x8x8xf32>
    %94 = arith.truncf %93 : vector<2x8x8xf32> to vector<2x8x8xbf16>
    %95 = vector.extract_strided_slice %14 {offsets = [0, 0, 24], sizes = [2, 8, 8], strides = [1, 1, 1]} : vector<2x8x32xf32> to vector<2x8x8xf32>
    %96 = arith.truncf %95 : vector<2x8x8xf32> to vector<2x8x8xbf16>
    %97 = vector.extract_strided_slice %15 {offsets = [0, 0, 24], sizes = [2, 8, 8], strides = [1, 1, 1]} : vector<2x8x32xf32> to vector<2x8x8xf32>
    %98 = arith.truncf %97 : vector<2x8x8xf32> to vector<2x8x8xbf16>
    "tpu.trace_start"() <{level = 10 : i32, message = "bqd,bkd->bqk"}> : () -> ()
    %cst_27 = arith.constant dense<0.000000e+00> : vector<2x8x8xf32>
    %99 = tpu.matmul %94, %96, %cst_27 {dimension_numbers = #tpu.dot_dimension_numbers<[2], [2], [1], [1], [0, 0, 0, 1, 1, 1], [0], [0]>} : vector<2x8x8xbf16>, vector<2x8x8xbf16>, vector<2x8x8xf32> -> vector<2x8x8xf32>
    "tpu.trace_stop"() : () -> ()
    %cst_28 = arith.constant 0.353553385 : f32
    %100 = vector.broadcast %cst_28 : f32 to vector<2x8x8xf32>
    %101 = arith.mulf %99, %100 : vector<2x8x8xf32>
    %cst_29 = arith.constant dense<0xFF800000> : vector<2x8xf32>
    %102 = vector.multi_reduction <maximumf>, %101, %cst_29 [2] : vector<2x8x8xf32> to vector<2x8xf32>
    %103 = vector.shape_cast %102 : vector<2x8xf32> to vector<2x8x1xf32>
    %104 = vector.broadcast %103 : vector<2x8x1xf32> to vector<2x8x8xf32>
    %105 = arith.subf %101, %104 : vector<2x8x8xf32>
    %106 = math.exp %105 : vector<2x8x8xf32>
    %cst_30 = arith.constant dense<0.000000e+00> : vector<2x8xf32>
    %107 = vector.multi_reduction <add>, %106, %cst_30 [2] : vector<2x8x8xf32> to vector<2x8xf32>
    %108 = vector.shape_cast %107 : vector<2x8xf32> to vector<2x8x1xf32>
    %109 = tpu.reciprocal %108 {approx = true} : vector<2x8x1xf32> -> vector<2x8x1xf32>
    %110 = vector.broadcast %109 : vector<2x8x1xf32> to vector<2x8x8xf32>
    %111 = arith.mulf %106, %110 : vector<2x8x8xf32>
    %112 = arith.truncf %111 : vector<2x8x8xf32> to vector<2x8x8xbf16>
    "tpu.trace_start"() <{level = 10 : i32, message = "bqk,bkd->bqd"}> : () -> ()
    %cst_31 = arith.constant dense<0.000000e+00> : vector<2x8x8xf32>
    %113 = tpu.matmul %112, %98, %cst_31 {dimension_numbers = #tpu.dot_dimension_numbers<[2], [1], [1], [2], [0, 0, 0, 1, 1, 2], [0], [0]>} : vector<2x8x8xbf16>, vector<2x8x8xbf16>, vector<2x8x8xf32> -> vector<2x8x8xf32>
    "tpu.trace_stop"() : () -> ()
    %114 = arith.truncf %113 : vector<2x8x8xf32> to vector<2x8x8xbf16>
    %115 = vector.extract_strided_slice %11 {offsets = [24, 0], sizes = [8, 32], strides = [1, 1]} : vector<32x32xf32> to vector<8x32xf32>
    %116 = arith.truncf %115 : vector<8x32xf32> to vector<8x32xbf16>
    %cst_32 = arith.constant dense<0.000000e+00> : vector<2x8x32xf32>
    %117 = tpu.matmul %114, %116, %cst_32 {dimension_numbers = #tpu.dot_dimension_numbers<[2], [0], [0, 1], [1], [0, 0, 0, 1, 1, 1], [], []>} : vector<2x8x8xbf16>, vector<8x32xbf16>, vector<2x8x32xf32> -> vector<2x8x32xf32>
    %118 = arith.addf %92, %117 : vector<2x8x32xf32>
    %119 = vector.shape_cast %118 : vector<2x8x32xf32> to vector<16x32xf32>
    %120 = vector.broadcast %12 : vector<1x32xf32> to vector<16x32xf32>
    %121 = arith.addf %119, %120 : vector<16x32xf32>
    %122 = arith.addf %0, %121 : vector<16x32xf32>
    %c0_33 = arith.constant 0 : index
    %c0_34 = arith.constant 0 : index
    %123 = vector.load %arg5[%c0_33, %c0_34] : memref<1x32xf32, #tpu.memory_space<vmem>>, vector<1x32xf32>
    %c0_35 = arith.constant 0 : index
    %c0_36 = arith.constant 0 : index
    %124 = vector.load %arg6[%c0_35, %c0_36] : memref<1x32xf32, #tpu.memory_space<vmem>>, vector<1x32xf32>
    %cst_37 = arith.constant dense<0.000000e+00> : vector<16xf32>
    %125 = vector.multi_reduction <add>, %122, %cst_37 [1] : vector<16x32xf32> to vector<16xf32>
    %126 = vector.shape_cast %125 : vector<16xf32> to vector<16x1xf32>
    %cst_38 = arith.constant 3.200000e+01 : f32
    %127 = vector.broadcast %cst_38 : f32 to vector<16x1xf32>
    %128 = arith.divf %126, %127 : vector<16x1xf32>
    %129 = vector.broadcast %128 : vector<16x1xf32> to vector<16x32xf32>
    %130 = arith.subf %122, %129 : vector<16x32xf32>
    %131 = arith.mulf %130, %130 : vector<16x32xf32>
    %cst_39 = arith.constant dense<0.000000e+00> : vector<16xf32>
    %132 = vector.multi_reduction <add>, %131, %cst_39 [1] : vector<16x32xf32> to vector<16xf32>
    %133 = vector.shape_cast %132 : vector<16xf32> to vector<16x1xf32>
    %cst_40 = arith.constant 3.200000e+01 : f32
    %134 = vector.broadcast %cst_40 : f32 to vector<16x1xf32>
    %135 = arith.divf %133, %134 : vector<16x1xf32>
    %136 = vector.broadcast %128 : vector<16x1xf32> to vector<16x32xf32>
    %137 = arith.subf %122, %136 : vector<16x32xf32>
    %cst_41 = arith.constant 9.99999974E-6 : f32
    %138 = vector.broadcast %cst_41 : f32 to vector<16x1xf32>
    %139 = arith.addf %135, %138 : vector<16x1xf32>
    %140 = math.rsqrt %139 : vector<16x1xf32>
    %141 = vector.broadcast %140 : vector<16x1xf32> to vector<16x32xf32>
    %142 = arith.mulf %137, %141 : vector<16x32xf32>
    %143 = vector.broadcast %123 : vector<1x32xf32> to vector<16x32xf32>
    %144 = arith.mulf %142, %143 : vector<16x32xf32>
    %145 = vector.broadcast %124 : vector<1x32xf32> to vector<16x32xf32>
    %146 = arith.addf %144, %145 : vector<16x32xf32>
    %c0_42 = arith.constant 0 : index
    %c0_43 = arith.constant 0 : index
    %147 = vector.load %arg7[%c0_42, %c0_43] : memref<32x64xf32, #tpu.memory_space<vmem>>, vector<32x64xf32>
    %c0_44 = arith.constant 0 : index
    %c0_45 = arith.constant 0 : index
    %148 = vector.load %arg8[%c0_44, %c0_45] : memref<1x64xf32, #tpu.memory_space<vmem>>, vector<1x64xf32>
    %149 = arith.truncf %146 : vector<16x32xf32> to vector<16x32xbf16>
    %150 = arith.truncf %147 : vector<32x64xf32> to vector<32x64xbf16>
    %cst_46 = arith.constant dense<0.000000e+00> : vector<16x64xf32>
    %151 = tpu.matmul %149, %150, %cst_46 {dimension_numbers = #tpu.dot_dimension_numbers<[1], [0], [0], [1], [0, 0, 1, 1], [], []>} : vector<16x32xbf16>, vector<32x64xbf16>, vector<16x64xf32> -> vector<16x64xf32>
    %152 = vector.broadcast %148 : vector<1x64xf32> to vector<16x64xf32>
    %153 = arith.addf %151, %152 : vector<16x64xf32>
    %cst_47 = arith.constant 0.000000e+00 : f32
    %154 = vector.broadcast %cst_47 : f32 to vector<16x64xf32>
    %155 = arith.maximumf %153, %154 : vector<16x64xf32>
    %c0_48 = arith.constant 0 : index
    %c0_49 = arith.constant 0 : index
    %156 = vector.load %arg9[%c0_48, %c0_49] : memref<64x32xf32, #tpu.memory_space<vmem>>, vector<64x32xf32>
    %c0_50 = arith.constant 0 : index
    %c0_51 = arith.constant 0 : index
    %157 = vector.load %arg10[%c0_50, %c0_51] : memref<1x32xf32, #tpu.memory_space<vmem>>, vector<1x32xf32>
    %158 = arith.truncf %155 : vector<16x64xf32> to vector<16x64xbf16>
    %159 = arith.truncf %156 : vector<64x32xf32> to vector<64x32xbf16>
    %cst_52 = arith.constant dense<0.000000e+00> : vector<16x32xf32>
    %160 = tpu.matmul %158, %159, %cst_52 {dimension_numbers = #tpu.dot_dimension_numbers<[1], [0], [0], [1], [0, 0, 1, 1], [], []>} : vector<16x64xbf16>, vector<64x32xbf16>, vector<16x32xf32> -> vector<16x32xf32>
    %161 = vector.broadcast %157 : vector<1x32xf32> to vector<16x32xf32>
    %162 = arith.addf %160, %161 : vector<16x32xf32>
    %163 = arith.addf %146, %162 : vector<16x32xf32>
    %c0_53 = arith.constant 0 : index
    %c0_54 = arith.constant 0 : index
    %164 = vector.load %arg11[%c0_53, %c0_54] : memref<1x32xf32, #tpu.memory_space<vmem>>, vector<1x32xf32>
    %c0_55 = arith.constant 0 : index
    %c0_56 = arith.constant 0 : index
    %165 = vector.load %arg12[%c0_55, %c0_56] : memref<1x32xf32, #tpu.memory_space<vmem>>, vector<1x32xf32>
    %cst_57 = arith.constant dense<0.000000e+00> : vector<16xf32>
    %166 = vector.multi_reduction <add>, %163, %cst_57 [1] : vector<16x32xf32> to vector<16xf32>
    %167 = vector.shape_cast %166 : vector<16xf32> to vector<16x1xf32>
    %cst_58 = arith.constant 3.200000e+01 : f32
    %168 = vector.broadcast %cst_58 : f32 to vector<16x1xf32>
    %169 = arith.divf %167, %168 : vector<16x1xf32>
    %170 = vector.broadcast %169 : vector<16x1xf32> to vector<16x32xf32>
    %171 = arith.subf %163, %170 : vector<16x32xf32>
    %172 = arith.mulf %171, %171 : vector<16x32xf32>
    %cst_59 = arith.constant dense<0.000000e+00> : vector<16xf32>
    %173 = vector.multi_reduction <add>, %172, %cst_59 [1] : vector<16x32xf32> to vector<16xf32>
    %174 = vector.shape_cast %173 : vector<16xf32> to vector<16x1xf32>
    %cst_60 = arith.constant 3.200000e+01 : f32
    %175 = vector.broadcast %cst_60 : f32 to vector<16x1xf32>
    %176 = arith.divf %174, %175 : vector<16x1xf32>
    %177 = vector.broadcast %169 : vector<16x1xf32> to vector<16x32xf32>
    %178 = arith.subf %163, %177 : vector<16x32xf32>
    %cst_61 = arith.constant 9.99999974E-6 : f32
    %179 = vector.broadcast %cst_61 : f32 to vector<16x1xf32>
    %180 = arith.addf %176, %179 : vector<16x1xf32>
    %181 = math.rsqrt %180 : vector<16x1xf32>
    %182 = vector.broadcast %181 : vector<16x1xf32> to vector<16x32xf32>
    %183 = arith.mulf %178, %182 : vector<16x32xf32>
    %184 = vector.broadcast %164 : vector<1x32xf32> to vector<16x32xf32>
    %185 = arith.mulf %183, %184 : vector<16x32xf32>
    %186 = vector.broadcast %165 : vector<1x32xf32> to vector<16x32xf32>
    %187 = arith.addf %185, %186 : vector<16x32xf32>
    %c0_62 = arith.constant 0 : index
    %c0_63 = arith.constant 0 : index
    %188 = vector.load %arg13[%c0_62, %c0_63] : memref<16x32xf32, #tpu.memory_space<vmem>>, vector<16x32xf32>
    tpu.vector_store %arg13[%c0_62, %c0_63], %187 {strides = array<i32>} : memref<16x32xf32, #tpu.memory_space<vmem>>, vector<16x32xf32>,
    return
  }
}

module attributes {stable_mosaic.version = 11 : i64} {
  func.func @_decoder_layer_kernel(%arg0: memref<16x32xf32, #tpu.memory_space<vmem>>, %arg1: memref<16x32xf32, #tpu.memory_space<vmem>>, %arg2: memref<2x8xi32, #tpu.memory_space<vmem>>, %arg3: memref<2x8xi32, #tpu.memory_space<vmem>>, %arg4: memref<32x96xf32, #tpu.memory_space<vmem>>, %arg5: memref<1x96xf32, #tpu.memory_space<vmem>>, %arg6: memref<32x32xf32, #tpu.memory_space<vmem>>, %arg7: memref<1x32xf32, #tpu.memory_space<vmem>>, %arg8: memref<1x32xf32, #tpu.memory_space<vmem>>, %arg9: memref<1x32xf32, #tpu.memory_space<vmem>>, %arg10: memref<32x32xf32, #tpu.memory_space<vmem>>, %arg11: memref<1x32xf32, #tpu.memory_space<vmem>>, %arg12: memref<32x64xf32, #tpu.memory_space<vmem>>, %arg13: memref<1x64xf32, #tpu.memory_space<vmem>>, %arg14: memref<32x32xf32, #tpu.memory_space<vmem>>, %arg15: memref<1x32xf32, #tpu.memory_space<vmem>>, %arg16: memref<1x32xf32, #tpu.memory_space<vmem>>, %arg17: memref<1x32xf32, #tpu.memory_space<vmem>>, %arg18: memref<32x64xf32, #tpu.memory_space<vmem>>, %arg19: memref<1x64xf32, #tpu.memory_space<vmem>>, %arg20: memref<64x32xf32, #tpu.memory_space<vmem>>, %arg21: memref<1x32xf32, #tpu.memory_space<vmem>>, %arg22: memref<1x32xf32, #tpu.memory_space<vmem>>, %arg23: memref<1x32xf32, #tpu.memory_space<vmem>>, %arg24: memref<16x32xf32, #tpu.memory_space<vmem>>) attributes {dimension_semantics = [], scalar_prefetch = 0 : i64, scratch_operands = 0 : i64, tpu.core_type = #tpu.core_type<tc>} {
    %c0 = arith.constant 0 : index
    %c0_0 = arith.constant 0 : index
    %0 = vector.load %arg0[%c0, %c0_0] : memref<16x32xf32, #tpu.memory_space<vmem>>, vector<16x32xf32>
    %c0_1 = arith.constant 0 : index
    %c0_2 = arith.constant 0 : index
    %1 = vector.load %arg1[%c0_1, %c0_2] : memref<16x32xf32, #tpu.memory_space<vmem>>, vector<16x32xf32>
    %c0_3 = arith.constant 0 : index
    %c0_4 = arith.constant 0 : index
    %2 = vector.load %arg4[%c0_3, %c0_4] : memref<32x96xf32, #tpu.memory_space<vmem>>, vector<32x96xf32>
    %c0_5 = arith.constant 0 : index
    %c0_6 = arith.constant 0 : index
    %3 = vector.load %arg5[%c0_5, %c0_6] : memref<1x96xf32, #tpu.memory_space<vmem>>, vector<1x96xf32>
    %4 = arith.truncf %0 : vector<16x32xf32> to vector<16x32xbf16>
    %5 = arith.truncf %2 : vector<32x96xf32> to vector<32x96xbf16>
    %cst = arith.constant dense<0.000000e+00> : vector<16x96xf32>
    %6 = tpu.matmul %4, %5, %cst {dimension_numbers = #tpu.dot_dimension_numbers<[1], [0], [0], [1], [0, 0, 1, 1], [], []>} : vector<16x32xbf16>, vector<32x96xbf16>, vector<16x96xf32> -> vector<16x96xf32>
    %7 = vector.broadcast %3 : vector<1x96xf32> to vector<16x96xf32>
    %8 = arith.addf %6, %7 : vector<16x96xf32>
    %9 = vector.extract_strided_slice %8 {offsets = [0, 0], sizes = [16, 32], strides = [1, 1]} : vector<16x96xf32> to vector<16x32xf32>
    %10 = vector.extract_strided_slice %8 {offsets = [0, 32], sizes = [16, 32], strides = [1, 1]} : vector<16x96xf32> to vector<16x32xf32>
    %11 = vector.extract_strided_slice %8 {offsets = [0, 64], sizes = [16, 32], strides = [1, 1]} : vector<16x96xf32> to vector<16x32xf32>
    %c0_7 = arith.constant 0 : index
    %c0_8 = arith.constant 0 : index
    %12 = vector.load %arg6[%c0_7, %c0_8] : memref<32x32xf32, #tpu.memory_space<vmem>>, vector<32x32xf32>
    %c0_9 = arith.constant 0 : index
    %c0_10 = arith.constant 0 : index
    %13 = vector.load %arg7[%c0_9, %c0_10] : memref<1x32xf32, #tpu.memory_space<vmem>>, vector<1x32xf32>
    %c0_11 = arith.constant 0 : index
    %c0_12 = arith.constant 0 : index
    %14 = vector.load %arg2[%c0_11, %c0_12] : memref<2x8xi32, #tpu.memory_space<vmem>>, vector<2x8xi32>
    %15 = vector.shape_cast %9 : vector<16x32xf32> to vector<2x8x32xf32>
    %16 = vector.shape_cast %10 : vector<16x32xf32> to vector<2x8x32xf32>
    %17 = vector.shape_cast %11 : vector<16x32xf32> to vector<2x8x32xf32>
    %c0_i32 = arith.constant 0 : i32
    %18 = vector.broadcast %c0_i32 : i32 to vector<2x8xi32>
    %19 = arith.cmpi sgt, %14, %18 : vector<2x8xi32>
    %20 = vector.shape_cast %19 : vector<2x8xi1> to vector<2x1x8xi1>
    %21 = vector.shape_cast %20 : vector<2x1x8xi1> to vector<2x1x8xi1>
    %22 = vector.broadcast %21 : vector<2x1x8xi1> to vector<2x8x8xi1>
    %23 = tpu.iota {dimensions = array<i32: 0>} : vector<8x8xi32>
    %24 = tpu.iota {dimensions = array<i32: 1>} : vector<8x8xi32>
    %25 = arith.cmpi sge, %23, %24 : vector<8x8xi32>
    %26 = vector.shape_cast %25 : vector<8x8xi1> to vector<1x8x8xi1>
    %27 = vector.shape_cast %26 : vector<1x8x8xi1> to vector<1x8x8xi1>
    %28 = vector.broadcast %27 : vector<1x8x8xi1> to vector<2x8x8xi1>
    %29 = arith.andi %22, %28 : vector<2x8x8xi1>
    %30 = vector.extract_strided_slice %15 {offsets = [0, 0, 0], sizes = [2, 8, 8], strides = [1, 1, 1]} : vector<2x8x32xf32> to vector<2x8x8xf32>
    %31 = arith.truncf %30 : vector<2x8x8xf32> to vector<2x8x8xbf16>
    %32 = vector.extract_strided_slice %16 {offsets = [0, 0, 0], sizes = [2, 8, 8], strides = [1, 1, 1]} : vector<2x8x32xf32> to vector<2x8x8xf32>
    %33 = arith.truncf %32 : vector<2x8x8xf32> to vector<2x8x8xbf16>
    %34 = vector.extract_strided_slice %17 {offsets = [0, 0, 0], sizes = [2, 8, 8], strides = [1, 1, 1]} : vector<2x8x32xf32> to vector<2x8x8xf32>
    %35 = arith.truncf %34 : vector<2x8x8xf32> to vector<2x8x8xbf16>
    "tpu.trace_start"() <{level = 10 : i32, message = "bqd,bkd->bqk"}> : () -> ()
    %cst_13 = arith.constant dense<0.000000e+00> : vector<2x8x8xf32>
    %36 = tpu.matmul %31, %33, %cst_13 {dimension_numbers = #tpu.dot_dimension_numbers<[2], [2], [1], [1], [0, 0, 0, 1, 1, 1], [0], [0]>} : vector<2x8x8xbf16>, vector<2x8x8xbf16>, vector<2x8x8xf32> -> vector<2x8x8xf32>
    "tpu.trace_stop"() : () -> ()
    %cst_14 = arith.constant 0.353553385 : f32
    %37 = vector.broadcast %cst_14 : f32 to vector<2x8x8xf32>
    %38 = arith.mulf %36, %37 : vector<2x8x8xf32>
    %cst_15 = arith.constant -1.000000e+09 : f32
    %39 = vector.broadcast %cst_15 : f32 to vector<2x8x8xf32>
    %40 = arith.select %29, %38, %39 : vector<2x8x8xi1>, vector<2x8x8xf32>
    %cst_16 = arith.constant dense<0xFF800000> : vector<2x8xf32>
    %41 = vector.multi_reduction <maximumf>, %40, %cst_16 [2] : vector<2x8x8xf32> to vector<2x8xf32>
    %42 = vector.shape_cast %41 : vector<2x8xf32> to vector<2x8x1xf32>
    %43 = vector.broadcast %42 : vector<2x8x1xf32> to vector<2x8x8xf32>
    %44 = arith.subf %40, %43 : vector<2x8x8xf32>
    %45 = math.exp %44 : vector<2x8x8xf32>
    %cst_17 = arith.constant dense<0.000000e+00> : vector<2x8xf32>
    %46 = vector.multi_reduction <add>, %45, %cst_17 [2] : vector<2x8x8xf32> to vector<2x8xf32>
    %47 = vector.shape_cast %46 : vector<2x8xf32> to vector<2x8x1xf32>
    %48 = tpu.reciprocal %47 {approx = true} : vector<2x8x1xf32> -> vector<2x8x1xf32>
    %49 = vector.broadcast %48 : vector<2x8x1xf32> to vector<2x8x8xf32>
    %50 = arith.mulf %45, %49 : vector<2x8x8xf32>
    %51 = arith.truncf %50 : vector<2x8x8xf32> to vector<2x8x8xbf16>
    "tpu.trace_start"() <{level = 10 : i32, message = "bqk,bkd->bqd"}> : () -> ()
    %cst_18 = arith.constant dense<0.000000e+00> : vector<2x8x8xf32>
    %52 = tpu.matmul %51, %35, %cst_18 {dimension_numbers = #tpu.dot_dimension_numbers<[2], [1], [1], [2], [0, 0, 0, 1, 1, 2], [0], [0]>} : vector<2x8x8xbf16>, vector<2x8x8xbf16>, vector<2x8x8xf32> -> vector<2x8x8xf32>
    "tpu.trace_stop"() : () -> ()
    %53 = arith.truncf %52 : vector<2x8x8xf32> to vector<2x8x8xbf16>
    %54 = vector.extract_strided_slice %12 {offsets = [0, 0], sizes = [8, 32], strides = [1, 1]} : vector<32x32xf32> to vector<8x32xf32>
    %55 = arith.truncf %54 : vector<8x32xf32> to vector<8x32xbf16>
    %cst_19 = arith.constant dense<0.000000e+00> : vector<2x8x32xf32>
    %56 = tpu.matmul %53, %55, %cst_19 {dimension_numbers = #tpu.dot_dimension_numbers<[2], [0], [0, 1], [1], [0, 0, 0, 1, 1, 1], [], []>} : vector<2x8x8xbf16>, vector<8x32xbf16>, vector<2x8x32xf32> -> vector<2x8x32xf32>
    %57 = vector.extract_strided_slice %15 {offsets = [0, 0, 8], sizes = [2, 8, 8], strides = [1, 1, 1]} : vector<2x8x32xf32> to vector<2x8x8xf32>
    %58 = arith.truncf %57 : vector<2x8x8xf32> to vector<2x8x8xbf16>
    %59 = vector.extract_strided_slice %16 {offsets = [0, 0, 8], sizes = [2, 8, 8], strides = [1, 1, 1]} : vector<2x8x32xf32> to vector<2x8x8xf32>
    %60 = arith.truncf %59 : vector<2x8x8xf32> to vector<2x8x8xbf16>
    %61 = vector.extract_strided_slice %17 {offsets = [0, 0, 8], sizes = [2, 8, 8], strides = [1, 1, 1]} : vector<2x8x32xf32> to vector<2x8x8xf32>
    %62 = arith.truncf %61 : vector<2x8x8xf32> to vector<2x8x8xbf16>
    "tpu.trace_start"() <{level = 10 : i32, message = "bqd,bkd->bqk"}> : () -> ()
    %cst_20 = arith.constant dense<0.000000e+00> : vector<2x8x8xf32>
    %63 = tpu.matmul %58, %60, %cst_20 {dimension_numbers = #tpu.dot_dimension_numbers<[2], [2], [1], [1], [0, 0, 0, 1, 1, 1], [0], [0]>} : vector<2x8x8xbf16>, vector<2x8x8xbf16>, vector<2x8x8xf32> -> vector<2x8x8xf32>
    "tpu.trace_stop"() : () -> ()
    %cst_21 = arith.constant 0.353553385 : f32
    %64 = vector.broadcast %cst_21 : f32 to vector<2x8x8xf32>
    %65 = arith.mulf %63, %64 : vector<2x8x8xf32>
    %cst_22 = arith.constant -1.000000e+09 : f32
    %66 = vector.broadcast %cst_22 : f32 to vector<2x8x8xf32>
    %67 = arith.select %29, %65, %66 : vector<2x8x8xi1>, vector<2x8x8xf32>
    %cst_23 = arith.constant dense<0xFF800000> : vector<2x8xf32>
    %68 = vector.multi_reduction <maximumf>, %67, %cst_23 [2] : vector<2x8x8xf32> to vector<2x8xf32>
    %69 = vector.shape_cast %68 : vector<2x8xf32> to vector<2x8x1xf32>
    %70 = vector.broadcast %69 : vector<2x8x1xf32> to vector<2x8x8xf32>
    %71 = arith.subf %67, %70 : vector<2x8x8xf32>
    %72 = math.exp %71 : vector<2x8x8xf32>
    %cst_24 = arith.constant dense<0.000000e+00> : vector<2x8xf32>
    %73 = vector.multi_reduction <add>, %72, %cst_24 [2] : vector<2x8x8xf32> to vector<2x8xf32>
    %74 = vector.shape_cast %73 : vector<2x8xf32> to vector<2x8x1xf32>
    %75 = tpu.reciprocal %74 {approx = true} : vector<2x8x1xf32> -> vector<2x8x1xf32>
    %76 = vector.broadcast %75 : vector<2x8x1xf32> to vector<2x8x8xf32>
    %77 = arith.mulf %72, %76 : vector<2x8x8xf32>
    %78 = arith.truncf %77 : vector<2x8x8xf32> to vector<2x8x8xbf16>
    "tpu.trace_start"() <{level = 10 : i32, message = "bqk,bkd->bqd"}> : () -> ()
    %cst_25 = arith.constant dense<0.000000e+00> : vector<2x8x8xf32>
    %79 = tpu.matmul %78, %62, %cst_25 {dimension_numbers = #tpu.dot_dimension_numbers<[2], [1], [1], [2], [0, 0, 0, 1, 1, 2], [0], [0]>} : vector<2x8x8xbf16>, vector<2x8x8xbf16>, vector<2x8x8xf32> -> vector<2x8x8xf32>
    "tpu.trace_stop"() : () -> ()
    %80 = arith.truncf %79 : vector<2x8x8xf32> to vector<2x8x8xbf16>
    %81 = vector.extract_strided_slice %12 {offsets = [8, 0], sizes = [8, 32], strides = [1, 1]} : vector<32x32xf32> to vector<8x32xf32>
    %82 = arith.truncf %81 : vector<8x32xf32> to vector<8x32xbf16>
    %cst_26 = arith.constant dense<0.000000e+00> : vector<2x8x32xf32>
    %83 = tpu.matmul %80, %82, %cst_26 {dimension_numbers = #tpu.dot_dimension_numbers<[2], [0], [0, 1], [1], [0, 0, 0, 1, 1, 1], [], []>} : vector<2x8x8xbf16>, vector<8x32xbf16>, vector<2x8x32xf32> -> vector<2x8x32xf32>
    %84 = arith.addf %56, %83 : vector<2x8x32xf32>
    %85 = vector.extract_strided_slice %15 {offsets = [0, 0, 16], sizes = [2, 8, 8], strides = [1, 1, 1]} : vector<2x8x32xf32> to vector<2x8x8xf32>
    %86 = arith.truncf %85 : vector<2x8x8xf32> to vector<2x8x8xbf16>
    %87 = vector.extract_strided_slice %16 {offsets = [0, 0, 16], sizes = [2, 8, 8], strides = [1, 1, 1]} : vector<2x8x32xf32> to vector<2x8x8xf32>
    %88 = arith.truncf %87 : vector<2x8x8xf32> to vector<2x8x8xbf16>
    %89 = vector.extract_strided_slice %17 {offsets = [0, 0, 16], sizes = [2, 8, 8], strides = [1, 1, 1]} : vector<2x8x32xf32> to vector<2x8x8xf32>
    %90 = arith.truncf %89 : vector<2x8x8xf32> to vector<2x8x8xbf16>
    "tpu.trace_start"() <{level = 10 : i32, message = "bqd,bkd->bqk"}> : () -> ()
    %cst_27 = arith.constant dense<0.000000e+00> : vector<2x8x8xf32>
    %91 = tpu.matmul %86, %88, %cst_27 {dimension_numbers = #tpu.dot_dimension_numbers<[2], [2], [1], [1], [0, 0, 0, 1, 1, 1], [0], [0]>} : vector<2x8x8xbf16>, vector<2x8x8xbf16>, vector<2x8x8xf32> -> vector<2x8x8xf32>
    "tpu.trace_stop"() : () -> ()
    %cst_28 = arith.constant 0.353553385 : f32
    %92 = vector.broadcast %cst_28 : f32 to vector<2x8x8xf32>
    %93 = arith.mulf %91, %92 : vector<2x8x8xf32>
    %cst_29 = arith.constant -1.000000e+09 : f32
    %94 = vector.broadcast %cst_29 : f32 to vector<2x8x8xf32>
    %95 = arith.select %29, %93, %94 : vector<2x8x8xi1>, vector<2x8x8xf32>
    %cst_30 = arith.constant dense<0xFF800000> : vector<2x8xf32>
    %96 = vector.multi_reduction <maximumf>, %95, %cst_30 [2] : vector<2x8x8xf32> to vector<2x8xf32>
    %97 = vector.shape_cast %96 : vector<2x8xf32> to vector<2x8x1xf32>
    %98 = vector.broadcast %97 : vector<2x8x1xf32> to vector<2x8x8xf32>
    %99 = arith.subf %95, %98 : vector<2x8x8xf32>
    %100 = math.exp %99 : vector<2x8x8xf32>
    %cst_31 = arith.constant dense<0.000000e+00> : vector<2x8xf32>
    %101 = vector.multi_reduction <add>, %100, %cst_31 [2] : vector<2x8x8xf32> to vector<2x8xf32>
    %102 = vector.shape_cast %101 : vector<2x8xf32> to vector<2x8x1xf32>
    %103 = tpu.reciprocal %102 {approx = true} : vector<2x8x1xf32> -> vector<2x8x1xf32>
    %104 = vector.broadcast %103 : vector<2x8x1xf32> to vector<2x8x8xf32>
    %105 = arith.mulf %100, %104 : vector<2x8x8xf32>
    %106 = arith.truncf %105 : vector<2x8x8xf32> to vector<2x8x8xbf16>
    "tpu.trace_start"() <{level = 10 : i32, message = "bqk,bkd->bqd"}> : () -> ()
    %cst_32 = arith.constant dense<0.000000e+00> : vector<2x8x8xf32>
    %107 = tpu.matmul %106, %90, %cst_32 {dimension_numbers = #tpu.dot_dimension_numbers<[2], [1], [1], [2], [0, 0, 0, 1, 1, 2], [0], [0]>} : vector<2x8x8xbf16>, vector<2x8x8xbf16>, vector<2x8x8xf32> -> vector<2x8x8xf32>
    "tpu.trace_stop"() : () -> ()
    %108 = arith.truncf %107 : vector<2x8x8xf32> to vector<2x8x8xbf16>
    %109 = vector.extract_strided_slice %12 {offsets = [16, 0], sizes = [8, 32], strides = [1, 1]} : vector<32x32xf32> to vector<8x32xf32>
    %110 = arith.truncf %109 : vector<8x32xf32> to vector<8x32xbf16>
    %cst_33 = arith.constant dense<0.000000e+00> : vector<2x8x32xf32>
    %111 = tpu.matmul %108, %110, %cst_33 {dimension_numbers = #tpu.dot_dimension_numbers<[2], [0], [0, 1], [1], [0, 0, 0, 1, 1, 1], [], []>} : vector<2x8x8xbf16>, vector<8x32xbf16>, vector<2x8x32xf32> -> vector<2x8x32xf32>
    %112 = arith.addf %84, %111 : vector<2x8x32xf32>
    %113 = vector.extract_strided_slice %15 {offsets = [0, 0, 24], sizes = [2, 8, 8], strides = [1, 1, 1]} : vector<2x8x32xf32> to vector<2x8x8xf32>
    %114 = arith.truncf %113 : vector<2x8x8xf32> to vector<2x8x8xbf16>
    %115 = vector.extract_strided_slice %16 {offsets = [0, 0, 24], sizes = [2, 8, 8], strides = [1, 1, 1]} : vector<2x8x32xf32> to vector<2x8x8xf32>
    %116 = arith.truncf %115 : vector<2x8x8xf32> to vector<2x8x8xbf16>
    %117 = vector.extract_strided_slice %17 {offsets = [0, 0, 24], sizes = [2, 8, 8], strides = [1, 1, 1]} : vector<2x8x32xf32> to vector<2x8x8xf32>
    %118 = arith.truncf %117 : vector<2x8x8xf32> to vector<2x8x8xbf16>
    "tpu.trace_start"() <{level = 10 : i32, message = "bqd,bkd->bqk"}> : () -> ()
    %cst_34 = arith.constant dense<0.000000e+00> : vector<2x8x8xf32>
    %119 = tpu.matmul %114, %116, %cst_34 {dimension_numbers = #tpu.dot_dimension_numbers<[2], [2], [1], [1], [0, 0, 0, 1, 1, 1], [0], [0]>} : vector<2x8x8xbf16>, vector<2x8x8xbf16>, vector<2x8x8xf32> -> vector<2x8x8xf32>
    "tpu.trace_stop"() : () -> ()
    %cst_35 = arith.constant 0.353553385 : f32
    %120 = vector.broadcast %cst_35 : f32 to vector<2x8x8xf32>
    %121 = arith.mulf %119, %120 : vector<2x8x8xf32>
    %cst_36 = arith.constant -1.000000e+09 : f32
    %122 = vector.broadcast %cst_36 : f32 to vector<2x8x8xf32>
    %123 = arith.select %29, %121, %122 : vector<2x8x8xi1>, vector<2x8x8xf32>
    %cst_37 = arith.constant dense<0xFF800000> : vector<2x8xf32>
    %124 = vector.multi_reduction <maximumf>, %123, %cst_37 [2] : vector<2x8x8xf32> to vector<2x8xf32>
    %125 = vector.shape_cast %124 : vector<2x8xf32> to vector<2x8x1xf32>
    %126 = vector.broadcast %125 : vector<2x8x1xf32> to vector<2x8x8xf32>
    %127 = arith.subf %123, %126 : vector<2x8x8xf32>
    %128 = math.exp %127 : vector<2x8x8xf32>
    %cst_38 = arith.constant dense<0.000000e+00> : vector<2x8xf32>
    %129 = vector.multi_reduction <add>, %128, %cst_38 [2] : vector<2x8x8xf32> to vector<2x8xf32>
    %130 = vector.shape_cast %129 : vector<2x8xf32> to vector<2x8x1xf32>
    %131 = tpu.reciprocal %130 {approx = true} : vector<2x8x1xf32> -> vector<2x8x1xf32>
    %132 = vector.broadcast %131 : vector<2x8x1xf32> to vector<2x8x8xf32>
    %133 = arith.mulf %128, %132 : vector<2x8x8xf32>
    %134 = arith.truncf %133 : vector<2x8x8xf32> to vector<2x8x8xbf16>
    "tpu.trace_start"() <{level = 10 : i32, message = "bqk,bkd->bqd"}> : () -> ()
    %cst_39 = arith.constant dense<0.000000e+00> : vector<2x8x8xf32>
    %135 = tpu.matmul %134, %118, %cst_39 {dimension_numbers = #tpu.dot_dimension_numbers<[2], [1], [1], [2], [0, 0, 0, 1, 1, 2], [0], [0]>} : vector<2x8x8xbf16>, vector<2x8x8xbf16>, vector<2x8x8xf32> -> vector<2x8x8xf32>
    "tpu.trace_stop"() : () -> ()
    %136 = arith.truncf %135 : vector<2x8x8xf32> to vector<2x8x8xbf16>
    %137 = vector.extract_strided_slice %12 {offsets = [24, 0], sizes = [8, 32], strides = [1, 1]} : vector<32x32xf32> to vector<8x32xf32>
    %138 = arith.truncf %137 : vector<8x32xf32> to vector<8x32xbf16>
    %cst_40 = arith.constant dense<0.000000e+00> : vector<2x8x32xf32>
    %139 = tpu.matmul %136, %138, %cst_40 {dimension_numbers = #tpu.dot_dimension_numbers<[2], [0], [0, 1], [1], [0, 0, 0, 1, 1, 1], [], []>} : vector<2x8x8xbf16>, vector<8x32xbf16>, vector<2x8x32xf32> -> vector<2x8x32xf32>
    %140 = arith.addf %112, %139 : vector<2x8x32xf32>
    %141 = vector.shape_cast %140 : vector<2x8x32xf32> to vector<16x32xf32>
    %142 = vector.broadcast %13 : vector<1x32xf32> to vector<16x32xf32>
    %143 = arith.addf %141, %142 : vector<16x32xf32>
    %144 = arith.addf %0, %143 : vector<16x32xf32>
    %c0_41 = arith.constant 0 : index
    %c0_42 = arith.constant 0 : index
    %145 = vector.load %arg8[%c0_41, %c0_42] : memref<1x32xf32, #tpu.memory_space<vmem>>, vector<1x32xf32>
    %c0_43 = arith.constant 0 : index
    %c0_44 = arith.constant 0 : index
    %146 = vector.load %arg9[%c0_43, %c0_44] : memref<1x32xf32, #tpu.memory_space<vmem>>, vector<1x32xf32>
    %cst_45 = arith.constant dense<0.000000e+00> : vector<16xf32>
    %147 = vector.multi_reduction <add>, %144, %cst_45 [1] : vector<16x32xf32> to vector<16xf32>
    %148 = vector.shape_cast %147 : vector<16xf32> to vector<16x1xf32>
    %cst_46 = arith.constant 3.200000e+01 : f32
    %149 = vector.broadcast %cst_46 : f32 to vector<16x1xf32>
    %150 = arith.divf %148, %149 : vector<16x1xf32>
    %151 = vector.broadcast %150 : vector<16x1xf32> to vector<16x32xf32>
    %152 = arith.subf %144, %151 : vector<16x32xf32>
    %153 = arith.mulf %152, %152 : vector<16x32xf32>
    %cst_47 = arith.constant dense<0.000000e+00> : vector<16xf32>
    %154 = vector.multi_reduction <add>, %153, %cst_47 [1] : vector<16x32xf32> to vector<16xf32>
    %155 = vector.shape_cast %154 : vector<16xf32> to vector<16x1xf32>
    %cst_48 = arith.constant 3.200000e+01 : f32
    %156 = vector.broadcast %cst_48 : f32 to vector<16x1xf32>
    %157 = arith.divf %155, %156 : vector<16x1xf32>
    %158 = vector.broadcast %150 : vector<16x1xf32> to vector<16x32xf32>
    %159 = arith.subf %144, %158 : vector<16x32xf32>
    %cst_49 = arith.constant 9.99999974E-6 : f32
    %160 = vector.broadcast %cst_49 : f32 to vector<16x1xf32>
    %161 = arith.addf %157, %160 : vector<16x1xf32>
    %162 = math.rsqrt %161 : vector<16x1xf32>
    %163 = vector.broadcast %162 : vector<16x1xf32> to vector<16x32xf32>
    %164 = arith.mulf %159, %163 : vector<16x32xf32>
    %165 = vector.broadcast %145 : vector<1x32xf32> to vector<16x32xf32>
    %166 = arith.mulf %164, %165 : vector<16x32xf32>
    %167 = vector.broadcast %146 : vector<1x32xf32> to vector<16x32xf32>
    %168 = arith.addf %166, %167 : vector<16x32xf32>
    %c0_50 = arith.constant 0 : index
    %c0_51 = arith.constant 0 : index
    %169 = vector.load %arg10[%c0_50, %c0_51] : memref<32x32xf32, #tpu.memory_space<vmem>>, vector<32x32xf32>
    %c0_52 = arith.constant 0 : index
    %c0_53 = arith.constant 0 : index
    %170 = vector.load %arg11[%c0_52, %c0_53] : memref<1x32xf32, #tpu.memory_space<vmem>>, vector<1x32xf32>
    %171 = arith.truncf %168 : vector<16x32xf32> to vector<16x32xbf16>
    %172 = arith.truncf %169 : vector<32x32xf32> to vector<32x32xbf16>
    %cst_54 = arith.constant dense<0.000000e+00> : vector<16x32xf32>
    %173 = tpu.matmul %171, %172, %cst_54 {dimension_numbers = #tpu.dot_dimension_numbers<[1], [0], [0], [1], [0, 0, 1, 1], [], []>} : vector<16x32xbf16>, vector<32x32xbf16>, vector<16x32xf32> -> vector<16x32xf32>
    %174 = vector.broadcast %170 : vector<1x32xf32> to vector<16x32xf32>
    %175 = arith.addf %173, %174 : vector<16x32xf32>
    %c0_55 = arith.constant 0 : index
    %c0_56 = arith.constant 0 : index
    %176 = vector.load %arg12[%c0_55, %c0_56] : memref<32x64xf32, #tpu.memory_space<vmem>>, vector<32x64xf32>
    %c0_57 = arith.constant 0 : index
    %c0_58 = arith.constant 0 : index
    %177 = vector.load %arg13[%c0_57, %c0_58] : memref<1x64xf32, #tpu.memory_space<vmem>>, vector<1x64xf32>
    %178 = arith.truncf %1 : vector<16x32xf32> to vector<16x32xbf16>
    %179 = arith.truncf %176 : vector<32x64xf32> to vector<32x64xbf16>
    %cst_59 = arith.constant dense<0.000000e+00> : vector<16x64xf32>
    %180 = tpu.matmul %178, %179, %cst_59 {dimension_numbers = #tpu.dot_dimension_numbers<[1], [0], [0], [1], [0, 0, 1, 1], [], []>} : vector<16x32xbf16>, vector<32x64xbf16>, vector<16x64xf32> -> vector<16x64xf32>
    %181 = vector.broadcast %177 : vector<1x64xf32> to vector<16x64xf32>
    %182 = arith.addf %180, %181 : vector<16x64xf32>
    %183 = vector.extract_strided_slice %182 {offsets = [0, 0], sizes = [16, 32], strides = [1, 1]} : vector<16x64xf32> to vector<16x32xf32>
    %184 = vector.extract_strided_slice %182 {offsets = [0, 32], sizes = [16, 32], strides = [1, 1]} : vector<16x64xf32> to vector<16x32xf32>
    %c0_60 = arith.constant 0 : index
    %c0_61 = arith.constant 0 : index
    %185 = vector.load %arg14[%c0_60, %c0_61] : memref<32x32xf32, #tpu.memory_space<vmem>>, vector<32x32xf32>
    %c0_62 = arith.constant 0 : index
    %c0_63 = arith.constant 0 : index
    %186 = vector.load %arg15[%c0_62, %c0_63] : memref<1x32xf32, #tpu.memory_space<vmem>>, vector<1x32xf32>
    %c0_64 = arith.constant 0 : index
    %c0_65 = arith.constant 0 : index
    %187 = vector.load %arg3[%c0_64, %c0_65] : memref<2x8xi32, #tpu.memory_space<vmem>>, vector<2x8xi32>
    %188 = vector.shape_cast %175 : vector<16x32xf32> to vector<2x8x32xf32>
    %189 = vector.shape_cast %183 : vector<16x32xf32> to vector<2x8x32xf32>
    %190 = vector.shape_cast %184 : vector<16x32xf32> to vector<2x8x32xf32>
    %c0_i32_66 = arith.constant 0 : i32
    %191 = vector.broadcast %c0_i32_66 : i32 to vector<2x8xi32>
    %192 = arith.cmpi sgt, %187, %191 : vector<2x8xi32>
    %193 = vector.shape_cast %192 : vector<2x8xi1> to vector<2x1x8xi1>
    %194 = vector.shape_cast %193 : vector<2x1x8xi1> to vector<2x1x8xi1>
    %195 = vector.broadcast %194 : vector<2x1x8xi1> to vector<2x8x8xi1>
    %196 = vector.extract_strided_slice %188 {offsets = [0, 0, 0], sizes = [2, 8, 8], strides = [1, 1, 1]} : vector<2x8x32xf32> to vector<2x8x8xf32>
    %197 = arith.truncf %196 : vector<2x8x8xf32> to vector<2x8x8xbf16>
    %198 = vector.extract_strided_slice %189 {offsets = [0, 0, 0], sizes = [2, 8, 8], strides = [1, 1, 1]} : vector<2x8x32xf32> to vector<2x8x8xf32>
    %199 = arith.truncf %198 : vector<2x8x8xf32> to vector<2x8x8xbf16>
    %200 = vector.extract_strided_slice %190 {offsets = [0, 0, 0], sizes = [2, 8, 8], strides = [1, 1, 1]} : vector<2x8x32xf32> to vector<2x8x8xf32>
    %201 = arith.truncf %200 : vector<2x8x8xf32> to vector<2x8x8xbf16>
    "tpu.trace_start"() <{level = 10 : i32, message = "bqd,bkd->bqk"}> : () -> ()
    %cst_67 = arith.constant dense<0.000000e+00> : vector<2x8x8xf32>
    %202 = tpu.matmul %197, %199, %cst_67 {dimension_numbers = #tpu.dot_dimension_numbers<[2], [2], [1], [1], [0, 0, 0, 1, 1, 1], [0], [0]>} : vector<2x8x8xbf16>, vector<2x8x8xbf16>, vector<2x8x8xf32> -> vector<2x8x8xf32>
    "tpu.trace_stop"() : () -> ()
    %cst_68 = arith.constant 0.353553385 : f32
    %203 = vector.broadcast %cst_68 : f32 to vector<2x8x8xf32>
    %204 = arith.mulf %202, %203 : vector<2x8x8xf32>
    %cst_69 = arith.constant -1.000000e+09 : f32
    %205 = vector.broadcast %cst_69 : f32 to vector<2x8x8xf32>
    %206 = arith.select %195, %204, %205 : vector<2x8x8xi1>, vector<2x8x8xf32>
    %cst_70 = arith.constant dense<0xFF800000> : vector<2x8xf32>
    %207 = vector.multi_reduction <maximumf>, %206, %cst_70 [2] : vector<2x8x8xf32> to vector<2x8xf32>
    %208 = vector.shape_cast %207 : vector<2x8xf32> to vector<2x8x1xf32>
    %209 = vector.broadcast %208 : vector<2x8x1xf32> to vector<2x8x8xf32>
    %210 = arith.subf %206, %209 : vector<2x8x8xf32>
    %211 = math.exp %210 : vector<2x8x8xf32>
    %cst_71 = arith.constant dense<0.000000e+00> : vector<2x8xf32>
    %212 = vector.multi_reduction <add>, %211, %cst_71 [2] : vector<2x8x8xf32> to vector<2x8xf32>
    %213 = vector.shape_cast %212 : vector<2x8xf32> to vector<2x8x1xf32>
    %214 = tpu.reciprocal %213 {approx = true} : vector<2x8x1xf32> -> vector<2x8x1xf32>
    %215 = vector.broadcast %214 : vector<2x8x1xf32> to vector<2x8x8xf32>
    %216 = arith.mulf %211, %215 : vector<2x8x8xf32>
    %217 = arith.truncf %216 : vector<2x8x8xf32> to vector<2x8x8xbf16>
    "tpu.trace_start"() <{level = 10 : i32, message = "bqk,bkd->bqd"}> : () -> ()
    %cst_72 = arith.constant dense<0.000000e+00> : vector<2x8x8xf32>
    %218 = tpu.matmul %217, %201, %cst_72 {dimension_numbers = #tpu.dot_dimension_numbers<[2], [1], [1], [2], [0, 0, 0, 1, 1, 2], [0], [0]>} : vector<2x8x8xbf16>, vector<2x8x8xbf16>, vector<2x8x8xf32> -> vector<2x8x8xf32>
    "tpu.trace_stop"() : () -> ()
    %219 = arith.truncf %218 : vector<2x8x8xf32> to vector<2x8x8xbf16>
    %220 = vector.extract_strided_slice %185 {offsets = [0, 0], sizes = [8, 32], strides = [1, 1]} : vector<32x32xf32> to vector<8x32xf32>
    %221 = arith.truncf %220 : vector<8x32xf32> to vector<8x32xbf16>
    %cst_73 = arith.constant dense<0.000000e+00> : vector<2x8x32xf32>
    %222 = tpu.matmul %219, %221, %cst_73 {dimension_numbers = #tpu.dot_dimension_numbers<[2], [0], [0, 1], [1], [0, 0, 0, 1, 1, 1], [], []>} : vector<2x8x8xbf16>, vector<8x32xbf16>, vector<2x8x32xf32> -> vector<2x8x32xf32>
    %223 = vector.extract_strided_slice %188 {offsets = [0, 0, 8], sizes = [2, 8, 8], strides = [1, 1, 1]} : vector<2x8x32xf32> to vector<2x8x8xf32>
    %224 = arith.truncf %223 : vector<2x8x8xf32> to vector<2x8x8xbf16>
    %225 = vector.extract_strided_slice %189 {offsets = [0, 0, 8], sizes = [2, 8, 8], strides = [1, 1, 1]} : vector<2x8x32xf32> to vector<2x8x8xf32>
    %226 = arith.truncf %225 : vector<2x8x8xf32> to vector<2x8x8xbf16>
    %227 = vector.extract_strided_slice %190 {offsets = [0, 0, 8], sizes = [2, 8, 8], strides = [1, 1, 1]} : vector<2x8x32xf32> to vector<2x8x8xf32>
    %228 = arith.truncf %227 : vector<2x8x8xf32> to vector<2x8x8xbf16>
    "tpu.trace_start"() <{level = 10 : i32, message = "bqd,bkd->bqk"}> : () -> ()
    %cst_74 = arith.constant dense<0.000000e+00> : vector<2x8x8xf32>
    %229 = tpu.matmul %224, %226, %cst_74 {dimension_numbers = #tpu.dot_dimension_numbers<[2], [2], [1], [1], [0, 0, 0, 1, 1, 1], [0], [0]>} : vector<2x8x8xbf16>, vector<2x8x8xbf16>, vector<2x8x8xf32> -> vector<2x8x8xf32>
    "tpu.trace_stop"() : () -> ()
    %cst_75 = arith.constant 0.353553385 : f32
    %230 = vector.broadcast %cst_75 : f32 to vector<2x8x8xf32>
    %231 = arith.mulf %229, %230 : vector<2x8x8xf32>
    %cst_76 = arith.constant -1.000000e+09 : f32
    %232 = vector.broadcast %cst_76 : f32 to vector<2x8x8xf32>
    %233 = arith.select %195, %231, %232 : vector<2x8x8xi1>, vector<2x8x8xf32>
    %cst_77 = arith.constant dense<0xFF800000> : vector<2x8xf32>
    %234 = vector.multi_reduction <maximumf>, %233, %cst_77 [2] : vector<2x8x8xf32> to vector<2x8xf32>
    %235 = vector.shape_cast %234 : vector<2x8xf32> to vector<2x8x1xf32>
    %236 = vector.broadcast %235 : vector<2x8x1xf32> to vector<2x8x8xf32>
    %237 = arith.subf %233, %236 : vector<2x8x8xf32>
    %238 = math.exp %237 : vector<2x8x8xf32>
    %cst_78 = arith.constant dense<0.000000e+00> : vector<2x8xf32>
    %239 = vector.multi_reduction <add>, %238, %cst_78 [2] : vector<2x8x8xf32> to vector<2x8xf32>
    %240 = vector.shape_cast %239 : vector<2x8xf32> to vector<2x8x1xf32>
    %241 = tpu.reciprocal %240 {approx = true} : vector<2x8x1xf32> -> vector<2x8x1xf32>
    %242 = vector.broadcast %241 : vector<2x8x1xf32> to vector<2x8x8xf32>
    %243 = arith.mulf %238, %242 : vector<2x8x8xf32>
    %244 = arith.truncf %243 : vector<2x8x8xf32> to vector<2x8x8xbf16>
    "tpu.trace_start"() <{level = 10 : i32, message = "bqk,bkd->bqd"}> : () -> ()
    %cst_79 = arith.constant dense<0.000000e+00> : vector<2x8x8xf32>
    %245 = tpu.matmul %244, %228, %cst_79 {dimension_numbers = #tpu.dot_dimension_numbers<[2], [1], [1], [2], [0, 0, 0, 1, 1, 2], [0], [0]>} : vector<2x8x8xbf16>, vector<2x8x8xbf16>, vector<2x8x8xf32> -> vector<2x8x8xf32>
    "tpu.trace_stop"() : () -> ()
    %246 = arith.truncf %245 : vector<2x8x8xf32> to vector<2x8x8xbf16>
    %247 = vector.extract_strided_slice %185 {offsets = [8, 0], sizes = [8, 32], strides = [1, 1]} : vector<32x32xf32> to vector<8x32xf32>
    %248 = arith.truncf %247 : vector<8x32xf32> to vector<8x32xbf16>
    %cst_80 = arith.constant dense<0.000000e+00> : vector<2x8x32xf32>
    %249 = tpu.matmul %246, %248, %cst_80 {dimension_numbers = #tpu.dot_dimension_numbers<[2], [0], [0, 1], [1], [0, 0, 0, 1, 1, 1], [], []>} : vector<2x8x8xbf16>, vector<8x32xbf16>, vector<2x8x32xf32> -> vector<2x8x32xf32>
    %250 = arith.addf %222, %249 : vector<2x8x32xf32>
    %251 = vector.extract_strided_slice %188 {offsets = [0, 0, 16], sizes = [2, 8, 8], strides = [1, 1, 1]} : vector<2x8x32xf32> to vector<2x8x8xf32>
    %252 = arith.truncf %251 : vector<2x8x8xf32> to vector<2x8x8xbf16>
    %253 = vector.extract_strided_slice %189 {offsets = [0, 0, 16], sizes = [2, 8, 8], strides = [1, 1, 1]} : vector<2x8x32xf32> to vector<2x8x8xf32>
    %254 = arith.truncf %253 : vector<2x8x8xf32> to vector<2x8x8xbf16>
    %255 = vector.extract_strided_slice %190 {offsets = [0, 0, 16], sizes = [2, 8, 8], strides = [1, 1, 1]} : vector<2x8x32xf32> to vector<2x8x8xf32>
    %256 = arith.truncf %255 : vector<2x8x8xf32> to vector<2x8x8xbf16>
    "tpu.trace_start"() <{level = 10 : i32, message = "bqd,bkd->bqk"}> : () -> ()
    %cst_81 = arith.constant dense<0.000000e+00> : vector<2x8x8xf32>
    %257 = tpu.matmul %252, %254, %cst_81 {dimension_numbers = #tpu.dot_dimension_numbers<[2], [2], [1], [1], [0, 0, 0, 1, 1, 1], [0], [0]>} : vector<2x8x8xbf16>, vector<2x8x8xbf16>, vector<2x8x8xf32> -> vector<2x8x8xf32>
    "tpu.trace_stop"() : () -> ()
    %cst_82 = arith.constant 0.353553385 : f32
    %258 = vector.broadcast %cst_82 : f32 to vector<2x8x8xf32>
    %259 = arith.mulf %257, %258 : vector<2x8x8xf32>
    %cst_83 = arith.constant -1.000000e+09 : f32
    %260 = vector.broadcast %cst_83 : f32 to vector<2x8x8xf32>
    %261 = arith.select %195, %259, %260 : vector<2x8x8xi1>, vector<2x8x8xf32>
    %cst_84 = arith.constant dense<0xFF800000> : vector<2x8xf32>
    %262 = vector.multi_reduction <maximumf>, %261, %cst_84 [2] : vector<2x8x8xf32> to vector<2x8xf32>
    %263 = vector.shape_cast %262 : vector<2x8xf32> to vector<2x8x1xf32>
    %264 = vector.broadcast %263 : vector<2x8x1xf32> to vector<2x8x8xf32>
    %265 = arith.subf %261, %264 : vector<2x8x8xf32>
    %266 = math.exp %265 : vector<2x8x8xf32>
    %cst_85 = arith.constant dense<0.000000e+00> : vector<2x8xf32>
    %267 = vector.multi_reduction <add>, %266, %cst_85 [2] : vector<2x8x8xf32> to vector<2x8xf32>
    %268 = vector.shape_cast %267 : vector<2x8xf32> to vector<2x8x1xf32>
    %269 = tpu.reciprocal %268 {approx = true} : vector<2x8x1xf32> -> vector<2x8x1xf32>
    %270 = vector.broadcast %269 : vector<2x8x1xf32> to vector<2x8x8xf32>
    %271 = arith.mulf %266, %270 : vector<2x8x8xf32>
    %272 = arith.truncf %271 : vector<2x8x8xf32> to vector<2x8x8xbf16>
    "tpu.trace_start"() <{level = 10 : i32, message = "bqk,bkd->bqd"}> : () -> ()
    %cst_86 = arith.constant dense<0.000000e+00> : vector<2x8x8xf32>
    %273 = tpu.matmul %272, %256, %cst_86 {dimension_numbers = #tpu.dot_dimension_numbers<[2], [1], [1], [2], [0, 0, 0, 1, 1, 2], [0], [0]>} : vector<2x8x8xbf16>, vector<2x8x8xbf16>, vector<2x8x8xf32> -> vector<2x8x8xf32>
    "tpu.trace_stop"() : () -> ()
    %274 = arith.truncf %273 : vector<2x8x8xf32> to vector<2x8x8xbf16>
    %275 = vector.extract_strided_slice %185 {offsets = [16, 0], sizes = [8, 32], strides = [1, 1]} : vector<32x32xf32> to vector<8x32xf32>
    %276 = arith.truncf %275 : vector<8x32xf32> to vector<8x32xbf16>
    %cst_87 = arith.constant dense<0.000000e+00> : vector<2x8x32xf32>
    %277 = tpu.matmul %274, %276, %cst_87 {dimension_numbers = #tpu.dot_dimension_numbers<[2], [0], [0, 1], [1], [0, 0, 0, 1, 1, 1], [], []>} : vector<2x8x8xbf16>, vector<8x32xbf16>, vector<2x8x32xf32> -> vector<2x8x32xf32>
    %278 = arith.addf %250, %277 : vector<2x8x32xf32>
    %279 = vector.extract_strided_slice %188 {offsets = [0, 0, 24], sizes = [2, 8, 8], strides = [1, 1, 1]} : vector<2x8x32xf32> to vector<2x8x8xf32>
    %280 = arith.truncf %279 : vector<2x8x8xf32> to vector<2x8x8xbf16>
    %281 = vector.extract_strided_slice %189 {offsets = [0, 0, 24], sizes = [2, 8, 8], strides = [1, 1, 1]} : vector<2x8x32xf32> to vector<2x8x8xf32>
    %282 = arith.truncf %281 : vector<2x8x8xf32> to vector<2x8x8xbf16>
    %283 = vector.extract_strided_slice %190 {offsets = [0, 0, 24], sizes = [2, 8, 8], strides = [1, 1, 1]} : vector<2x8x32xf32> to vector<2x8x8xf32>
    %284 = arith.truncf %283 : vector<2x8x8xf32> to vector<2x8x8xbf16>
    "tpu.trace_start"() <{level = 10 : i32, message = "bqd,bkd->bqk"}> : () -> ()
    %cst_88 = arith.constant dense<0.000000e+00> : vector<2x8x8xf32>
    %285 = tpu.matmul %280, %282, %cst_88 {dimension_numbers = #tpu.dot_dimension_numbers<[2], [2], [1], [1], [0, 0, 0, 1, 1, 1], [0], [0]>} : vector<2x8x8xbf16>, vector<2x8x8xbf16>, vector<2x8x8xf32> -> vector<2x8x8xf32>
    "tpu.trace_stop"() : () -> ()
    %cst_89 = arith.constant 0.353553385 : f32
    %286 = vector.broadcast %cst_89 : f32 to vector<2x8x8xf32>
    %287 = arith.mulf %285, %286 : vector<2x8x8xf32>
    %cst_90 = arith.constant -1.000000e+09 : f32
    %288 = vector.broadcast %cst_90 : f32 to vector<2x8x8xf32>
    %289 = arith.select %195, %287, %288 : vector<2x8x8xi1>, vector<2x8x8xf32>
    %cst_91 = arith.constant dense<0xFF800000> : vector<2x8xf32>
    %290 = vector.multi_reduction <maximumf>, %289, %cst_91 [2] : vector<2x8x8xf32> to vector<2x8xf32>
    %291 = vector.shape_cast %290 : vector<2x8xf32> to vector<2x8x1xf32>
    %292 = vector.broadcast %291 : vector<2x8x1xf32> to vector<2x8x8xf32>
    %293 = arith.subf %289, %292 : vector<2x8x8xf32>
    %294 = math.exp %293 : vector<2x8x8xf32>
    %cst_92 = arith.constant dense<0.000000e+00> : vector<2x8xf32>
    %295 = vector.multi_reduction <add>, %294, %cst_92 [2] : vector<2x8x8xf32> to vector<2x8xf32>
    %296 = vector.shape_cast %295 : vector<2x8xf32> to vector<2x8x1xf32>
    %297 = tpu.reciprocal %296 {approx = true} : vector<2x8x1xf32> -> vector<2x8x1xf32>
    %298 = vector.broadcast %297 : vector<2x8x1xf32> to vector<2x8x8xf32>
    %299 = arith.mulf %294, %298 : vector<2x8x8xf32>
    %300 = arith.truncf %299 : vector<2x8x8xf32> to vector<2x8x8xbf16>
    "tpu.trace_start"() <{level = 10 : i32, message = "bqk,bkd->bqd"}> : () -> ()
    %cst_93 = arith.constant dense<0.000000e+00> : vector<2x8x8xf32>
    %301 = tpu.matmul %300, %284, %cst_93 {dimension_numbers = #tpu.dot_dimension_numbers<[2], [1], [1], [2], [0, 0, 0, 1, 1, 2], [0], [0]>} : vector<2x8x8xbf16>, vector<2x8x8xbf16>, vector<2x8x8xf32> -> vector<2x8x8xf32>
    "tpu.trace_stop"() : () -> ()
    %302 = arith.truncf %301 : vector<2x8x8xf32> to vector<2x8x8xbf16>
    %303 = vector.extract_strided_slice %185 {offsets = [24, 0], sizes = [8, 32], strides = [1, 1]} : vector<32x32xf32> to vector<8x32xf32>
    %304 = arith.truncf %303 : vector<8x32xf32> to vector<8x32xbf16>
    %cst_94 = arith.constant dense<0.000000e+00> : vector<2x8x32xf32>
    %305 = tpu.matmul %302, %304, %cst_94 {dimension_numbers = #tpu.dot_dimension_numbers<[2], [0], [0, 1], [1], [0, 0, 0, 1, 1, 1], [], []>} : vector<2x8x8xbf16>, vector<8x32xbf16>, vector<2x8x32xf32> -> vector<2x8x32xf32>
    %306 = arith.addf %278, %305 : vector<2x8x32xf32>
    %307 = vector.shape_cast %306 : vector<2x8x32xf32> to vector<16x32xf32>
    %308 = vector.broadcast %186 : vector<1x32xf32> to vector<16x32xf32>
    %309 = arith.addf %307, %308 : vector<16x32xf32>
    %310 = arith.addf %168, %309 : vector<16x32xf32>
    %c0_95 = arith.constant 0 : index
    %c0_96 = arith.constant 0 : index
    %311 = vector.load %arg16[%c0_95, %c0_96] : memref<1x32xf32, #tpu.memory_space<vmem>>, vector<1x32xf32>
    %c0_97 = arith.constant 0 : index
    %c0_98 = arith.constant 0 : index
    %312 = vector.load %arg17[%c0_97, %c0_98] : memref<1x32xf32, #tpu.memory_space<vmem>>, vector<1x32xf32>
    %cst_99 = arith.constant dense<0.000000e+00> : vector<16xf32>
    %313 = vector.multi_reduction <add>, %310, %cst_99 [1] : vector<16x32xf32> to vector<16xf32>
    %314 = vector.shape_cast %313 : vector<16xf32> to vector<16x1xf32>
    %cst_100 = arith.constant 3.200000e+01 : f32
    %315 = vector.broadcast %cst_100 : f32 to vector<16x1xf32>
    %316 = arith.divf %314, %315 : vector<16x1xf32>
    %317 = vector.broadcast %316 : vector<16x1xf32> to vector<16x32xf32>
    %318 = arith.subf %310, %317 : vector<16x32xf32>
    %319 = arith.mulf %318, %318 : vector<16x32xf32>
    %cst_101 = arith.constant dense<0.000000e+00> : vector<16xf32>
    %320 = vector.multi_reduction <add>, %319, %cst_101 [1] : vector<16x32xf32> to vector<16xf32>
    %321 = vector.shape_cast %320 : vector<16xf32> to vector<16x1xf32>
    %cst_102 = arith.constant 3.200000e+01 : f32
    %322 = vector.broadcast %cst_102 : f32 to vector<16x1xf32>
    %323 = arith.divf %321, %322 : vector<16x1xf32>
    %324 = vector.broadcast %316 : vector<16x1xf32> to vector<16x32xf32>
    %325 = arith.subf %310, %324 : vector<16x32xf32>
    %cst_103 = arith.constant 9.99999974E-6 : f32
    %326 = vector.broadcast %cst_103 : f32 to vector<16x1xf32>
    %327 = arith.addf %323, %326 : vector<16x1xf32>
    %328 = math.rsqrt %327 : vector<16x1xf32>
    %329 = vector.broadcast %328 : vector<16x1xf32> to vector<16x32xf32>
    %330 = arith.mulf %325, %329 : vector<16x32xf32>
    %331 = vector.broadcast %311 : vector<1x32xf32> to vector<16x32xf32>
    %332 = arith.mulf %330, %331 : vector<16x32xf32>
    %333 = vector.broadcast %312 : vector<1x32xf32> to vector<16x32xf32>
    %334 = arith.addf %332, %333 : vector<16x32xf32>
    %c0_104 = arith.constant 0 : index
    %c0_105 = arith.constant 0 : index
    %335 = vector.load %arg18[%c0_104, %c0_105] : memref<32x64xf32, #tpu.memory_space<vmem>>, vector<32x64xf32>
    %c0_106 = arith.constant 0 : index
    %c0_107 = arith.constant 0 : index
    %336 = vector.load %arg19[%c0_106, %c0_107] : memref<1x64xf32, #tpu.memory_space<vmem>>, vector<1x64xf32>
    %337 = arith.truncf %334 : vector<16x32xf32> to vector<16x32xbf16>
    %338 = arith.truncf %335 : vector<32x64xf32> to vector<32x64xbf16>
    %cst_108 = arith.constant dense<0.000000e+00> : vector<16x64xf32>
    %339 = tpu.matmul %337, %338, %cst_108 {dimension_numbers = #tpu.dot_dimension_numbers<[1], [0], [0], [1], [0, 0, 1, 1], [], []>} : vector<16x32xbf16>, vector<32x64xbf16>, vector<16x64xf32> -> vector<16x64xf32>
    %340 = vector.broadcast %336 : vector<1x64xf32> to vector<16x64xf32>
    %341 = arith.addf %339, %340 : vector<16x64xf32>
    %cst_109 = arith.constant 0.000000e+00 : f32
    %342 = vector.broadcast %cst_109 : f32 to vector<16x64xf32>
    %343 = arith.maximumf %341, %342 : vector<16x64xf32>
    %c0_110 = arith.constant 0 : index
    %c0_111 = arith.constant 0 : index
    %344 = vector.load %arg20[%c0_110, %c0_111] : memref<64x32xf32, #tpu.memory_space<vmem>>, vector<64x32xf32>
    %c0_112 = arith.constant 0 : index
    %c0_113 = arith.constant 0 : index
    %345 = vector.load %arg21[%c0_112, %c0_113] : memref<1x32xf32, #tpu.memory_space<vmem>>, vector<1x32xf32>
    %346 = arith.truncf %343 : vector<16x64xf32> to vector<16x64xbf16>
    %347 = arith.truncf %344 : vector<64x32xf32> to vector<64x32xbf16>
    %cst_114 = arith.constant dense<0.000000e+00> : vector<16x32xf32>
    %348 = tpu.matmul %346, %347, %cst_114 {dimension_numbers = #tpu.dot_dimension_numbers<[1], [0], [0], [1], [0, 0, 1, 1], [], []>} : vector<16x64xbf16>, vector<64x32xbf16>, vector<16x32xf32> -> vector<16x32xf32>
    %349 = vector.broadcast %345 : vector<1x32xf32> to vector<16x32xf32>
    %350 = arith.addf %348, %349 : vector<16x32xf32>
    %351 = arith.addf %334, %350 : vector<16x32xf32>
    %c0_115 = arith.constant 0 : index
    %c0_116 = arith.constant 0 : index
    %352 = vector.load %arg22[%c0_115, %c0_116] : memref<1x32xf32, #tpu.memory_space<vmem>>, vector<1x32xf32>
    %c0_117 = arith.constant 0 : index
    %c0_118 = arith.constant 0 : index
    %353 = vector.load %arg23[%c0_117, %c0_118] : memref<1x32xf32, #tpu.memory_space<vmem>>, vector<1x32xf32>
    %cst_119 = arith.constant dense<0.000000e+00> : vector<16xf32>
    %354 = vector.multi_reduction <add>, %351, %cst_119 [1] : vector<16x32xf32> to vector<16xf32>
    %355 = vector.shape_cast %354 : vector<16xf32> to vector<16x1xf32>
    %cst_120 = arith.constant 3.200000e+01 : f32
    %356 = vector.broadcast %cst_120 : f32 to vector<16x1xf32>
    %357 = arith.divf %355, %356 : vector<16x1xf32>
    %358 = vector.broadcast %357 : vector<16x1xf32> to vector<16x32xf32>
    %359 = arith.subf %351, %358 : vector<16x32xf32>
    %360 = arith.mulf %359, %359 : vector<16x32xf32>
    %cst_121 = arith.constant dense<0.000000e+00> : vector<16xf32>
    %361 = vector.multi_reduction <add>, %360, %cst_121 [1] : vector<16x32xf32> to vector<16xf32>
    %362 = vector.shape_cast %361 : vector<16xf32> to vector<16x1xf32>
    %cst_122 = arith.constant 3.200000e+01 : f32
    %363 = vector.broadcast %cst_122 : f32 to vector<16x1xf32>
    %364 = arith.divf %362, %363 : vector<16x1xf32>
    %365 = vector.broadcast %357 : vector<16x1xf32> to vector<16x32xf32>
    %366 = arith.subf %351, %365 : vector<16x32xf32>
    %cst_123 = arith.constant 9.99999974E-6 : f32
    %367 = vector.broadcast %cst_123 : f32 to vector<16x1xf32>
    %368 = arith.addf %364, %367 : vector<16x1xf32>
    %369 = math.rsqrt %368 : vector<16x1xf32>
    %370 = vector.broadcast %369 : vector<16x1xf32> to vector<16x32xf32>
    %371 = arith.mulf %366, %370 : vector<16x32xf32>
    %372 = vector.broadcast %352 : vector<1x32xf32> to vector<16x32xf32>
    %373 = arith.mulf %371, %372 : vector<16x32xf32>
    %374 = vector.broadcast %353 : vector<1x32xf32> to vector<16x32xf32>
    %375 = arith.addf %373, %374 : vector<16x32xf32>
    %c0_124 = arith.constant 0 : index
    %c0_125 = arith.constant 0 : index
    %376 = vector.load %arg24[%c0_124, %c0_125] : memref<16x32xf32, #tpu.memory_space<vmem>>, vector<16x32xf32>
    tpu.vector_store %arg24[%c0_124, %c0_125], %375 {strides = array<i32>} : memref<16x32xf32, #tpu.memory_space<vmem>>, vector<16x32xf32>,
    return
  }
}

</mosaic_0001>

<bundles_post_ra>
// kernel: transformer_fwd.9
= control target key start
LH: loop header
LB: loop body
LE: loop exit
PB: predicated region body
PF: predicated region fallthrough
CT: control target
= control target key end

     0   :  { %v137_v3 = vmov 0.0   ;;  %vm138_vm0 = vmmov 0   ;;  %s195_s0 = inlined_call_operand.vmem [shape: f32[16,32], index: 0, kind: input, shape index: {}]   ;;  %s196_s1 = inlined_call_operand.vmem [shape: f32[32,32], index: 1, kind: input, shape index: {}]   ;;  %s197_s2 = inlined_call_operand.vmem [shape: f32[1,32], index: 2, kind: input, shape index: {}]   ;;  %s198_s3 = inlined_call_operand.hbm [shape: f32[16,32], index: 3, kind: output, shape index: {}]  }
   0x1   :  { %v19_v0 = vld [vmem:[%s196_s1] sm:$0xff]  ;;  %v20_v1 = vld [vmem:[%s196_s1 + $0x8] sm:$0xff]  ;;  %v21_v2 = vld [vmem:[%s196_s1 + $0x10] sm:$0xff]  ;;  %100 = vmatprep.subr.bf16.mxu0 %v137_v3  ;;  %104 = vmatprep.mubr.msk.bf16.mxu0 %vm138_vm0, %v137_v3 }
   0x2   :  { %v23_v4 = vpack.c.bf16 %v20_v1, %v19_v0  ;;  %v22_v5 = vld [vmem:[%s196_s1 + $0x18] sm:$0xff] }
   0x3   :  { %8 = vsyncpa [#allocation3], 0  ;;  %v24_v6 = vpack.c.bf16 %v22_v5, %v21_v2  ;;  %v16_v7 = vld [vmem:[%s195_s0] sm:$0xff]  ;;  %v17_v8 = vld [vmem:[%s195_s0 + $0x8] sm:$0xff]  ;;  %vm32_vm1 = vcmask 261120   ;;  %s139_s25 = smov [#allocation2]  }
   0x4   :  { %101 = vmatpush3.bf16.msra.mxu0 %v23_v4  ;;  %v18_v9 = vpack.c.bf16 %v17_v8, %v16_v7  ;;  %v95_v10 = vld [vmem:[%s197_s2] ss:$0 sm:$0xff]  ;;  %s84_s26 = sshll.u32 %s139_s25, 4  ;;  %s85_s26 = int_to_ptr.vmem [resolvable:$true] %s84_s26 }
   0x5   :  { %102 = vmatprep.subr.bf16.mxu0 %v137_v3  ;;  %s113_s0 = scalar_lea.vmem %s85_s26, 256  ;;  %p118_p1 = scmp.lt.s32.totalorder %s85_s26, %s85_s26 }
   0x6   :  { %p114_p0 = scmp.ne.s32.totalorder %s85_s26, %s113_s0  ;;  %p119_p2 = scmp.lt.s32.totalorder %s113_s0, %s113_s0 }
   0x8   :  { %103 = vmatpush3.bf16.msra.mxu0 %v24_v6  ;;  %p120_p3 = por %p119_p2, %p118_p1 }
   0xa   :  { %p121_p4 = pnand %p120_p3, %p114_p0 }
   0xb   :  { %105 = vmatmul.mubr.msk.bf16.vlgmr.msra.gmra.mrb[0].mxu0 %vm32_vm1, %v18_v9 }
  0xde   :  { %v70_v11 = vpop.f32.mrb[0].mxu0 }
  0xdf   :  { %v71_v12 = vadd.f32 %v95_v10, %v70_v11  ;;  %v106_v13 = vpop.f32.mrb[1].mxu0 }
  0xe0   :  { %v73_v14 = vpop.f32.mrb[2].mxu0 }
  0xe1   :  { %77 = vst.msk [vmem:[#allocation2] sm:$0xff] %vm32_vm1, %v71_v12  ;;  %v74_v15 = vadd.f32 %v95_v10, %v73_v14  ;;  %v107_v16 = vpop.f32.mrb[3].mxu0 }
  0xe3   :  { %78 = vst.msk [vmem:[#allocation2 + $0x8] sm:$0xff] %vm32_vm1, %v74_v15 }
  0xe4   :  { %124 = shalt.err (!%p121_p4)
}
  0xe5   :  { %s125_s28 = scalar_lea.hbm %s198_s3, 256 }
  0xe6   :  { %p126_p5 = scmp.ne.s32.totalorder %s198_s3, %s125_s28  ;;  %p129_p6 = scmp.lt.u32.totalorder %s125_s28, %s198_s3 }
  0xe8   :  { %p131_p7 = pnand %p129_p6, %p126_p5 }
  0xea   :  { %134 = shalt.err (!%p131_p7)
}
  0xeb   :  { %s140_s6 = smov 128   ;;  %s141_s7 = smov 8  }
  0xec   :  { %90 = dma.vmem_to_hbm [thread:$0]  %s85_s26, 256, %s198_s3, [#allocation3], %s140_s6, %s140_s6, %s141_s7  }
  0xed   :  { %135 = dma.done.wait [#allocation3], 256  }
  0xee   :  { %136 = vsyncadd [#allocation3], 4294967040 }
  0xef   :  { %94 = vsyncpa [#allocation3], 1 }

// kernel: transformer_fwd.5
= control target key start
LH: loop header
LB: loop body
LE: loop exit
PB: predicated region body
PF: predicated region fallthrough
CT: control target
= control target key end

     0   :  { %v1748_v0 = vmov 0.0   ;;  %vm1749_vm0 = vmmov 0   ;;  %vm61_vm1 = vcmask 261120   ;;  %vm116_vm2 = vcmask 64512   ;;  %s1752_s21 = smov 88   ;;  %s1753_s22 = smov 120   ;;  %s2130_s1 = inlined_call_operand.vmem [shape: f32[32,96], index: 1, kind: input, shape index: {}]   ;;  %s2131_s0 = inlined_call_operand.vmem [shape: f32[16,32], index: 0, kind: input, shape index: {}]   ;;  %s2132_s2 = inlined_call_operand.vmem [shape: f32[1,96], index: 2, kind: input, shape index: {}]   ;;  %s2133_s3 = inlined_call_operand.vmem [shape: f32[32,32], index: 3, kind: input, shape index: {}]   ;;  %s2134_s4 = inlined_call_operand.vmem [shape: f32[1,32], index: 4, kind: input, shape index: {}]   ;;  %s2135_s7 = inlined_call_operand.vmem [shape: f32[32,64], index: 7, kind: input, shape index: {}]   ;;  %s2136_s9 = inlined_call_operand.vmem [shape: f32[64,32], index: 9, kind: input, shape index: {}]   ;;  %s2137_s5 = inlined_call_operand.vmem [shape: f32[1,32], index: 5, kind: input, shape index: {}]   ;;  %s2138_s6 = inlined_call_operand.vmem [shape: f32[1,32], index: 6, kind: input, shape index: {}]   ;;  %s2139_s8 = inlined_call_operand.vmem [shape: f32[1,64], index: 8, kind: input, shape index: {}]   ;;  %s2140_s10 = inlined_call_operand.vmem [shape: f32[1,32], index: 10, kind: input, shape index: {}]   ;;  %s2141_s11 = inlined_call_operand.vmem [shape: f32[1,32], index: 11, kind: input, shape index: {}]   ;;  %s2142_s12 = inlined_call_operand.vmem [shape: f32[1,32], index: 12, kind: input, shape index: {}]   ;;  %s2143_s13 = inlined_call_operand.vmem [shape: f32[16,32], index: 13, kind: output, shape index: {}]  }
   0x1   :  { %1547 = vmatprep.subr.bf16.mxu1 %v1748_v0  ;;  %v47_v1 = vld [vmem:[%s2130_s1] sm:$0xff]  ;;  %v48_v2 = vld [vmem:[%s2130_s1 + $0x8] sm:$0xff]  ;;  %v49_v3 = vld [vmem:[%s2130_s1 + $0x10] sm:$0xff]  ;;  %1551 = vmatprep.mubr.msk.bf16.mxu1 %vm1749_vm0, %v1748_v0  ;;  %vm243_vm3 = vcmask 1043456   ;;  %s1754_s23 = smov 56   ;;  %s1755_s24 = smov 112  }
   0x2   :  { %v53_v4 = vpack.c.bf16 %v48_v2, %v47_v1  ;;  %v50_v5 = vld [vmem:[%s2130_s1 + $0x18] sm:$0xff]  ;;  %1561 = vmatprep.subr.bf16.mxu0 %v1748_v0  ;;  %1563 = vmatprep.mubr.msk.bf16.mxu0 %vm1749_vm0, %v1748_v0  ;;  %v1852_v7 = vld [vmem:[%s2131_s0] sm:$0xff]  ;;  %v1857_v8 = vld [vmem:[%s2131_s0 + $0x8] sm:$0xff]  ;;  %s1750_s0 = smov 96   ;;  %s1756_s25 = smov 80   ;;  %vm1360_vm4 = vcmask 523264  }
   0x3   :  { %v54_v6 = vpack.c.bf16 %v50_v5, %v49_v3  ;;  %v52_v9 = vpack.c.bf16 %v1857_v8, %v1852_v7  ;;  %v1457_v10 = vld [vmem:[%s2132_s2] ss:$0 sm:$0xff]  ;;  %s1751_s2 = smov 64   ;;  %s1757_s30 = smov 48  }
   0x4   :  { %1548 = vmatpush3.bf16.msra.mxu1 %v53_v4  ;;  %s1758_s14 = smov 72   ;;  %s1759_s15 = smov 104  }
   0x5   :  { %1549 = vmatprep.subr.bf16.mxu1 %v1748_v0  ;;  %s1760_s18 = smov 40  }
   0x8   :  { %1550 = vmatpush3.bf16.msra.mxu1 %v54_v6 }
   0x9   :  { %1555 = vmatprep.subr.bf16.mxu1 %v1748_v0 }
   0xb   :  { %1552 = vmatmul.mubr.msk.bf16.vlgmr.msra.gmra.mrb[0].mxu1 %vm61_vm1, %v52_v9 }
   0xc   :  { %1557 = vmatprep.mubr.msk.bf16.mxu1 %vm1749_vm0, %v1748_v0 }
  0xde   :  { %v99_v11 = vpop.f32.mrb[0].mxu1 }
  0xdf   :  { %v100_v12 = vadd.f32 %v1457_v10, %v99_v11  ;;  %v1553_v13 = vpop.f32.mrb[1].mxu1 }
  0xe0   :  { %v102_v14 = vpop.f32.mrb[2].mxu1 }
  0xe1   :  { %v1869_v15 = vpack.c.bf16 %v100_v12, %v100_v12  ;;  %v103_v16 = vadd.f32 %v1457_v10, %v102_v14  ;;  %v1554_v17 = vpop.f32.mrb[3].mxu1 }
  0xe3   :  { %114 = vrot.lane.b32.xlu0 %v1869_v15, %s1750_s0  ;;  %v1872_v18 = vpack.c.bf16 %v103_v16, %v103_v16 }
  0xe7   :  { %164 = vrot.lane.b32.xlu0 %v1872_v18, %s1750_s0 }
 0x155   :  { %v115_v19 = vpop.permute.xlu0 %114 }
 0x156   :  { %v121_v20 = vsel %vm116_vm2, %v115_v19, 0 }
 0x157   :  { %1556 = vmatpush3.bf16.xpose.msra.mxu1 %v121_v20 }
 0x158   :  { %1567 = vmatprep.subr.bf16.mxu1 %v1748_v0 }
 0x159   :  { %v165_v21 = vpop.permute.xlu0 %164 }
 0x15a   :  { %v170_v22 = vsel %vm116_vm2, %v165_v21, 0 }
 0x15b   :  { %1562 = vmatpush3.bf16.xpose.msra.mxu0 %v170_v22 }
 0x15c   :  { %1573 = vmatprep.subr.bf16.mxu0 %v1748_v0 }
 0x15e   :  { %1558 = vmatmul.mubr.msk.bf16.vlgmr.msra.gmra.mrb[4].mxu1 %vm116_vm2, %v1869_v15 }
 0x15f   :  { %1569 = vmatprep.mubr.msk.bf16.mxu1 %vm1749_vm0, %v1748_v0 }
 0x162   :  { %1564 = vmatmul.mubr.msk.bf16.vlgmr.msra.gmra.mrb[0].mxu0 %vm116_vm2, %v1872_v18 }
 0x163   :  { %1575 = vmatprep.mubr.msk.bf16.mxu0 %vm1749_vm0, %v1748_v0 }
 0x231   :  { %v157_v23 = vpop.f32.mrb[4].mxu1 }
 0x232   :  { %v212_v24 = vmul.f32 0.35355338, %v157_v23  ;;  %v1559_v25 = vpop.f32.mrb[5].mxu1 }
 0x233   :  { %v160_v26 = vpop.f32.mrb[6].mxu1 }
 0x234   :  { %v1560_v27 = vpop.f32.mrb[7].mxu1  ;;  %v214_v28 = vsel %vm116_vm2, %v212_v24, -inf }
 0x235   :  { %v206_v29 = vpop.f32.mrb[0].mxu0  ;;  %215 = vmax.xlane.f32.xlu1 %v214_v28 }
 0x236   :  { %v213_v30 = vmul.f32 0.35355338, %v206_v29  ;;  %v1565_v31 = vpop.f32.mrb[1].mxu0 }
 0x237   :  { %v209_v32 = vpop.f32.mrb[2].mxu0 }
 0x238   :  { %v1566_v33 = vpop.f32.mrb[3].mxu0  ;;  %v217_v34 = vsel %vm116_vm2, %v213_v30, -inf }
 0x239   :  { %218 = vmax.xlane.f32.xlu1 %v217_v34 }
 0x24a   :  { %238 = vrot.lane.b32.xlu1 %v1869_v15, %s1751_s2 }
 0x24e   :  { %287 = vrot.lane.b32.xlu1 %v1872_v18, %s1751_s2 }
 0x252   :  { %340 = vrot.lane.b32.xlu1 %v1869_v15, %s1752_s21 }
 0x2c2   :  { %v216_v35 = vpop.xlane.xlu1 %215 }
 0x2c3   :  { %v220_v36 = vsub.f32 %v212_v24, %v216_v35 }
 0x2c5   :  { %v222_v37 = vmul.f32 1.442695, %v220_v36 }
 0x2c6   :  { %v219_v38 = vpop.xlane.xlu1 %218 }
 0x2c7   :  { %1708 = vpow2.f32 %v222_v37  ;;  %v221_v39 = vsub.f32 %v213_v30, %v219_v38 }
 0x2c9   :  { %v224_v40 = vmul.f32 1.442695, %v221_v39  ;;  %v107_v39 = vld [vmem:[%s2133_s3 + $0x8] sm:$0xff] }
 0x2ca   :  { %v239_v41 = vpop.permute.xlu1 %238 }
 0x2cb   :  { %1710 = vpow2.f32 %v224_v40  ;;  %v245_v42 = vsel %vm243_vm3, %v239_v41, 0 }
 0x2cc   :  { %1568 = vmatpush3.bf16.msra.mxu1 %v245_v42  ;;  %v562_v42 = vpack.c.bf16 %v107_v39, %v107_v39 }
 0x2cd   :  { %1579 = vmatprep.subr.bf16.mxu1 %v1748_v0 }
 0x2ce   :  { %v288_v43 = vpop.permute.xlu1 %287 }
 0x2cf   :  { %v293_v44 = vsel %vm243_vm3, %v288_v43, 0 }
 0x2d0   :  { %1574 = vmatpush3.bf16.msra.mxu0 %v293_v44  ;;  %v106_v44 = vld [vmem:[%s2133_s3] sm:$0xff] }
 0x2d1   :  { %v1709_v45 = vpop.eup %1708  ;;  %1585 = vmatprep.subr.bf16.mxu0 %v1748_v0 }
 0x2d2   :  { %v226_v46 = vsel %vm116_vm2, %v1709_v45, 0.0  ;;  %v341_v49 = vpop.permute.xlu1 %340 }
 0x2d3   :  { %227 = vadd.xlane.f32.xlu0 %v226_v46  ;;  %v346_v56 = vsel %vm116_vm2, %v341_v49, 0 }
 0x2d5   :  { %v1711_v47 = vpop.eup %1710 }
 0x2d6   :  { %v229_v48 = vsel %vm116_vm2, %v1711_v47, 0.0 }
 0x2d7   :  { %230 = vadd.xlane.f32.xlu1 %v229_v48  ;;  %v572_v48 = vsel %vm243_vm3, %v562_v42, 0 }
 0x2e8   :  { %390 = vrot.lane.b32.xlu1 %v1872_v18, %s1752_s21 }
 0x2e9   :  { %338 = vrot.lane.b32.xlu0 %v1869_v15, %s1753_s22 }
 0x2ec   :  { %388 = vrot.lane.b32.xlu1 %v1872_v18, %s1753_s22 }
 0x360   :  { %v228_v50 = vpop.xlane.xlu0 %227 }
 0x361   :  { %1712 = vrcp.f32 %v228_v50 }
 0x364   :  { %v231_v51 = vpop.xlane.xlu1 %230  ;;  %v339_v61 = vpop.permute.xlu0 %338 }
 0x365   :  { %1714 = vrcp.f32 %v231_v51 }
 0x368   :  { %v391_v58 = vpop.permute.xlu1 %390 }
 0x369   :  { %v396_v60 = vsel %vm116_vm2, %v391_v58, 0 }
 0x36b   :  { %v1713_v52 = vpop.eup %1712 }
 0x36c   :  { %v234_v53 = vmul.f32 %v1713_v52, %v1709_v45  ;;  %v389_v62 = vpop.permute.xlu1 %388 }
 0x36e   :  { %v236_v54 = vpack.c.bf16 %v234_v53, %v234_v53 }
 0x36f   :  { %v1715_v55 = vpop.eup %1714 }
 0x370   :  { %v235_v57 = vmul.f32 %v1715_v55, %v1711_v47  ;;  %1570 = vmatmul.mubr.msk.bf16.vlgmr.msra.gmra.mrb[8].mxu1 %vm116_vm2, %v236_v54  ;;  %v337_v47 = vpack.c.bf16 %v106_v44, %v106_v44 }
 0x371   :  { %1580 = vmatpush3.bf16.xpose.msra.mxu1 %v346_v56  ;;  %1581 = vmatprep.mubr.msk.bf16.mxu1 %vm1749_vm0, %v1748_v0 }
 0x372   :  { %v237_v59 = vpack.c.bf16 %v235_v57, %v235_v57  ;;  %1591 = vmatprep.subr.bf16.mxu1 %v1748_v0  ;;  %v624_v52 = vsel %vm243_vm3, %v337_v47, 0 }
 0x374   :  { %1576 = vmatmul.mubr.msk.bf16.vlgmr.msra.gmra.mrb[4].mxu0 %vm116_vm2, %v237_v59 }
 0x375   :  { %1586 = vmatpush3.bf16.xpose.msra.mxu0 %v396_v60  ;;  %1587 = vmatprep.mubr.msk.bf16.mxu0 %vm1749_vm0, %v1748_v0 }
 0x376   :  { %1597 = vmatprep.subr.bf16.mxu0 %v1748_v0 }
 0x378   :  { %1582 = vmatmul.mubr.msk.bf16.vlgmr.msra.gmra.mrb[12].mxu1 %vm116_vm2, %v339_v61 }
 0x379   :  { %1593 = vmatprep.mubr.msk.bf16.mxu1 %vm1749_vm0, %v1748_v0 }
 0x37c   :  { %1588 = vmatmul.mubr.msk.bf16.vlgmr.msra.gmra.mrb[8].mxu0 %vm116_vm2, %v389_v62 }
 0x37d   :  { %1599 = vmatprep.mubr.msk.bf16.mxu0 %vm1749_vm0, %v1748_v0 }
 0x443   :  { %v1917_v63 = vpop.f32.mrb[8].mxu1 }
 0x444   :  { %v1571_v1 = vpop.f32.mrb[9].mxu1 }
 0x445   :  { %v284_v2 = vpop.f32.mrb[10].mxu1 }
 0x446   :  { %v1572_v3 = vpop.f32.mrb[11].mxu1 }
 0x447   :  { %v1919_v4 = vpop.f32.mrb[4].mxu0 }
 0x448   :  { %v1493_v5 = vpack.c.bf16 %v1919_v4, %v1917_v63  ;;  %v1577_v6 = vpop.f32.mrb[5].mxu0 }
 0x449   :  { %v332_v9 = vpop.f32.mrb[6].mxu0 }
 0x44a   :  { %v1578_v10 = vpop.f32.mrb[7].mxu0 }
 0x44b   :  { %v382_v11 = vpop.f32.mrb[12].mxu1 }
 0x44c   :  { %v438_v12 = vmul.f32 0.35355338, %v382_v11  ;;  %v1583_v13 = vpop.f32.mrb[13].mxu1 }
 0x44d   :  { %v385_v14 = vpop.f32.mrb[14].mxu1 }
 0x44e   :  { %v1584_v16 = vpop.f32.mrb[15].mxu1  ;;  %v440_v17 = vsel %vm116_vm2, %v438_v12, -inf }
 0x44f   :  { %v432_v19 = vpop.f32.mrb[8].mxu0  ;;  %441 = vmax.xlane.f32.xlu1 %v440_v17 }
 0x450   :  { %v439_v20 = vmul.f32 0.35355338, %v432_v19  ;;  %v1589_v21 = vpop.f32.mrb[9].mxu0 }
 0x451   :  { %v435_v22 = vpop.f32.mrb[10].mxu0 }
 0x452   :  { %v1590_v23 = vpop.f32.mrb[11].mxu0  ;;  %v443_v24 = vsel %vm116_vm2, %v439_v20, -inf }
 0x453   :  { %444 = vmax.xlane.f32.xlu0 %v443_v24 }
 0x469   :  { %512 = vrot.lane.b32.xlu0 %v1872_v18, %s1754_s23 }
 0x46d   :  { %667 = vrot.lane.b32.xlu0 %v1869_v15, %s1755_s24 }
 0x4dc   :  { %v442_v25 = vpop.xlane.xlu1 %441 }
 0x4dd   :  { %v446_v26 = vsub.f32 %v438_v12, %v442_v25 }
 0x4df   :  { %v448_v27 = vmul.f32 1.442695, %v446_v26 }
 0x4e0   :  { %v445_v28 = vpop.xlane.xlu0 %444 }
 0x4e1   :  { %1716 = vpow2.f32 %v448_v27  ;;  %v447_v29 = vsub.f32 %v439_v20, %v445_v28 }
 0x4e3   :  { %v450_v30 = vmul.f32 1.442695, %v447_v29 }
 0x4e4   :  { %v513_v31 = vpop.permute.xlu0 %512 }
 0x4e5   :  { %1718 = vpow2.f32 %v450_v30  ;;  %v518_v32 = vsel %vm243_vm3, %v513_v31, 0 }
 0x4e6   :  { %1598 = vmatpush3.bf16.msra.mxu0 %v518_v32 }
 0x4e7   :  { %1609 = vmatprep.subr.bf16.mxu0 %v1748_v0 }
 0x4e8   :  { %v668_v6 = vpop.permute.xlu0 %667 }
 0x4eb   :  { %v1717_v33 = vpop.eup %1716 }
 0x4ec   :  { %v452_v34 = vsel %vm116_vm2, %v1717_v33, 0.0 }
 0x4ed   :  { %453 = vadd.xlane.f32.xlu1 %v452_v34 }
 0x4ef   :  { %v1719_v35 = vpop.eup %1718 }
 0x4f0   :  { %v455_v36 = vsel %vm116_vm2, %v1719_v35, 0.0 }
 0x4f1   :  { %456 = vadd.xlane.f32.xlu1 %v455_v36 }
 0x502   :  { %464 = vrot.lane.b32.xlu1 %v1869_v15, %s1754_s23 }
 0x506   :  { %669 = vrot.lane.b32.xlu1 %v1869_v15, %s1756_s25 }
 0x50a   :  { %719 = vrot.lane.b32.xlu1 %v1872_v18, %s1756_s25 }
 0x50e   :  { %717 = vrot.lane.b32.xlu1 %v1872_v18, %s1755_s24 }
 0x57a   :  { %v454_v37 = vpop.xlane.xlu1 %453 }
 0x57b   :  { %1720 = vrcp.f32 %v454_v37 }
 0x57e   :  { %v457_v38 = vpop.xlane.xlu1 %456 }
 0x57f   :  { %1722 = vrcp.f32 %v457_v38 }
 0x582   :  { %v465_v40 = vpop.permute.xlu1 %464 }
 0x583   :  { %v470_v41 = vsel %vm243_vm3, %v465_v40, 0 }
 0x584   :  { %1592 = vmatpush3.bf16.msra.mxu1 %v470_v41 }
 0x585   :  { %v1721_v43 = vpop.eup %1720  ;;  %1603 = vmatprep.subr.bf16.mxu1 %v1748_v0 }
 0x586   :  { %v460_v45 = vmul.f32 %v1721_v43, %v1717_v33  ;;  %v670_v53 = vpop.permute.xlu1 %669 }
 0x587   :  { %v675_v2 = vsel %vm116_vm2, %v670_v53, 0 }
 0x588   :  { %v462_v46 = vpack.c.bf16 %v460_v45, %v460_v45 }
 0x589   :  { %v1723_v49 = vpop.eup %1722 }
 0x58a   :  { %v461_v50 = vmul.f32 %v1723_v49, %v1719_v35  ;;  %1594 = vmatmul.mubr.msk.bf16.vlgmr.msra.gmra.mrb[16].mxu1 %vm116_vm2, %v462_v46  ;;  %v720_v54 = vpop.permute.xlu1 %719 }
 0x58b   :  { %1604 = vmatpush3.bf16.msra.mxu1 %v572_v48  ;;  %1605 = vmatprep.mubr.msk.bf16.mxu1 %vm1749_vm0, %v1748_v0  ;;  %v725_v55 = vsel %vm116_vm2, %v720_v54, 0 }
 0x58c   :  { %v463_v51 = vpack.c.bf16 %v461_v50, %v461_v50  ;;  %1615 = vmatprep.subr.bf16.mxu1 %v1748_v0 }
 0x58e   :  { %1600 = vmatmul.mubr.msk.bf16.vlgmr.msra.gmra.mrb[12].mxu0 %vm116_vm2, %v463_v51  ;;  %v718_v56 = vpop.permute.xlu1 %717 }
 0x58f   :  { %1610 = vmatpush3.bf16.msra.mxu0 %v624_v52  ;;  %1611 = vmatprep.mubr.msk.bf16.mxu0 %vm1749_vm0, %v1748_v0 }
 0x590   :  { %1621 = vmatprep.subr.bf16.mxu0 %v1748_v0 }
 0x596   :  { %1612 = vmatmul.mubr.msk.bf16.vlgmr.msra.gmra.mrb[16].mxu0 %vm116_vm2, %v1493_v5 }
 0x597   :  { %1623 = vmatprep.mubr.msk.bf16.mxu0 %vm1749_vm0, %v1748_v0 }
 0x598   :  { %1622 = vmatpush3.bf16.xpose.msra.mxu0 %v725_v55 }
 0x599   :  { %1633 = vmatprep.subr.bf16.mxu0 %v1748_v0 }
 0x59f   :  { %1624 = vmatmul.mubr.msk.bf16.vlgmr.msra.gmra.mrb[20].mxu0 %vm116_vm2, %v718_v56  ;;  %v108_v56 = vld [vmem:[%s2133_s3 + $0x10] sm:$0xff] }
 0x5a0   :  { %1635 = vmatprep.mubr.msk.bf16.mxu0 %vm1749_vm0, %v1748_v0 }
 0x65d   :  { %v506_v57 = vpop.f32.mrb[16].mxu1 }
 0x65e   :  { %v1595_v58 = vpop.f32.mrb[17].mxu1 }
 0x65f   :  { %v509_v59 = vpop.f32.mrb[18].mxu1 }
 0x660   :  { %v1596_v60 = vpop.f32.mrb[19].mxu1 }
 0x661   :  { %v554_v61 = vpop.f32.mrb[12].mxu0 }
 0x662   :  { %v1492_v62 = vpack.c.bf16 %v554_v61, %v506_v57  ;;  %v1601_v63 = vpop.f32.mrb[13].mxu0  ;;  %v891_v57 = vpack.c.bf16 %v108_v56, %v108_v56 }
 0x663   :  { %v557_v1 = vpop.f32.mrb[14].mxu0 }
 0x664   :  { %v1602_v3 = vpop.f32.mrb[15].mxu0  ;;  %1606 = vmatmul.mubr.msk.bf16.vlgmr.msra.gmra.mrb[20].mxu1 %vm116_vm2, %v1492_v62  ;;  %v901_v58 = vsel %vm243_vm3, %v891_v57, 0 }
 0x665   :  { %1616 = vmatpush3.bf16.xpose.msra.mxu1 %v675_v2  ;;  %1617 = vmatprep.mubr.msk.bf16.mxu1 %vm1749_vm0, %v1748_v0 }
 0x666   :  { %1627 = vmatprep.subr.bf16.mxu1 %v1748_v0 }
 0x669   :  { %v660_v4 = vpop.f32.mrb[16].mxu0 }
 0x66a   :  { %v1613_v5 = vpop.f32.mrb[17].mxu0 }
 0x66b   :  { %v663_v9 = vpop.f32.mrb[18].mxu0 }
 0x66c   :  { %v1614_v10 = vpop.f32.mrb[19].mxu0  ;;  %1618 = vmatmul.mubr.msk.bf16.vlgmr.msra.gmra.mrb[24].mxu1 %vm116_vm2, %v668_v6 }
 0x66d   :  { %1629 = vmatprep.mubr.msk.bf16.mxu1 %vm1749_vm0, %v1748_v0 }
 0x672   :  { %v761_v11 = vpop.f32.mrb[20].mxu0 }
 0x673   :  { %v768_v12 = vmul.f32 0.35355338, %v761_v11  ;;  %v1625_v13 = vpop.f32.mrb[21].mxu0 }
 0x674   :  { %v764_v14 = vpop.f32.mrb[22].mxu0 }
 0x675   :  { %v1626_v16 = vpop.f32.mrb[23].mxu0  ;;  %v772_v17 = vsel %vm116_vm2, %v768_v12, -inf }
 0x676   :  { %773 = vmax.xlane.f32.xlu1 %v772_v17 }
 0x687   :  { %793 = vrot.lane.b32.xlu1 %v1869_v15, %s1757_s30 }
 0x68b   :  { %948 = vrot.lane.b32.xlu1 %v1869_v15, %s1758_s14 }
 0x68f   :  { %998 = vrot.lane.b32.xlu1 %v1872_v18, %s1758_s14 }
 0x693   :  { %996 = vrot.lane.b32.xlu1 %v1872_v18, %s1759_s15 }
 0x703   :  { %v774_v19 = vpop.xlane.xlu1 %773 }
 0x704   :  { %v776_v22 = vsub.f32 %v768_v12, %v774_v19 }
 0x706   :  { %v779_v23 = vmul.f32 1.442695, %v776_v22 }
 0x707   :  { %v794_v20 = vpop.permute.xlu1 %793 }
 0x708   :  { %v799_v21 = vsel %vm243_vm3, %v794_v20, 0  ;;  %1724 = vpow2.f32 %v779_v23 }
 0x709   :  { %1628 = vmatpush3.bf16.msra.mxu1 %v799_v21 }
 0x70a   :  { %1639 = vmatprep.subr.bf16.mxu1 %v1748_v0 }
 0x70b   :  { %v949_v51 = vpop.permute.xlu1 %948 }
 0x70c   :  { %v954_v53 = vsel %vm116_vm2, %v949_v51, 0 }
 0x70f   :  { %v999_v63 = vpop.permute.xlu1 %998 }
 0x710   :  { %v1004_v5 = vsel %vm116_vm2, %v999_v63, 0 }
 0x712   :  { %v1725_v36 = vpop.eup %1724 }
 0x713   :  { %v784_v37 = vsel %vm116_vm2, %v1725_v36, 0.0  ;;  %v997_v16 = vpop.permute.xlu1 %996 }
 0x737   :  { %v608_v24 = vpop.f32.mrb[20].mxu1 }
 0x738   :  { %v1981_v25 = vadd.f32 %v660_v4, %v608_v24  ;;  %v1607_v26 = vpop.f32.mrb[21].mxu1 }
 0x739   :  { %v611_v27 = vpop.f32.mrb[22].mxu1 }
 0x73a   :  { %v1983_v28 = vadd.f32 %v663_v9, %v611_v27  ;;  %v1608_v29 = vpop.f32.mrb[23].mxu1 }
 0x73f   :  { %v711_v30 = vpop.f32.mrb[24].mxu1 }
 0x740   :  { %v767_v31 = vmul.f32 0.35355338, %v711_v30  ;;  %v1619_v32 = vpop.f32.mrb[25].mxu1 }
 0x741   :  { %v714_v33 = vpop.f32.mrb[26].mxu1 }
 0x742   :  { %v1620_v34 = vpop.f32.mrb[27].mxu1  ;;  %v769_v35 = vsel %vm116_vm2, %v767_v31, -inf }
 0x743   :  { %770 = vmax.xlane.f32.xlu0 %v769_v35 }
 0x747   :  { %785 = vadd.xlane.f32.xlu0 %v784_v37 }
 0x7d0   :  { %v771_v38 = vpop.xlane.xlu0 %770 }
 0x7d1   :  { %v775_v39 = vsub.f32 %v767_v31, %v771_v38 }
 0x7d3   :  { %v777_v40 = vmul.f32 1.442695, %v775_v39 }
 0x7d4   :  { %v786_v43 = vpop.xlane.xlu0 %785 }
 0x7d5   :  { %1726 = vpow2.f32 %v777_v40 }
 0x7d6   :  { %1728 = vrcp.f32 %v786_v43 }
 0x7df   :  { %v1727_v41 = vpop.eup %1726 }
 0x7e0   :  { %v781_v42 = vsel %vm116_vm2, %v1727_v41, 0.0  ;;  %v1729_v44 = vpop.eup %1728 }
 0x7e1   :  { %782 = vadd.xlane.f32.xlu0 %v781_v42  ;;  %v790_v46 = vmul.f32 %v1729_v44, %v1725_v36 }
 0x7e3   :  { %v792_v49 = vpack.c.bf16 %v790_v46, %v790_v46 }
 0x7f7   :  { %841 = vrot.lane.b32.xlu0 %v1872_v18, %s1757_s30 }
 0x7fb   :  { %946 = vrot.lane.b32.xlu0 %v1869_v15, %s1759_s15 }
 0x86e   :  { %v783_v45 = vpop.xlane.xlu0 %782 }
 0x86f   :  { %1730 = vrcp.f32 %v783_v45  ;;  %v109_v45 = vld [vmem:[%s2133_s3 + $0x18] sm:$0xff] }
 0x870   :  { %v1170_v46 = vpack.c.bf16 %v109_v45, %v109_v45 }
 0x872   :  { %v842_v47 = vpop.permute.xlu0 %841 }
 0x873   :  { %v847_v48 = vsel %vm243_vm3, %v842_v47, 0  ;;  %v1180_v47 = vsel %vm243_vm3, %v1170_v46, 0 }
 0x874   :  { %1634 = vmatpush3.bf16.msra.mxu0 %v847_v48 }
 0x875   :  { %1645 = vmatprep.subr.bf16.mxu0 %v1748_v0 }
 0x876   :  { %v947_v55 = vpop.permute.xlu0 %946 }
 0x877   :  { %1636 = vmatmul.mubr.msk.bf16.vlgmr.msra.gmra.mrb[24].mxu0 %vm116_vm2, %v792_v49 }
 0x878   :  { %1647 = vmatprep.mubr.msk.bf16.mxu0 %vm1749_vm0, %v1748_v0 }
 0x879   :  { %v1731_v50 = vpop.eup %1730 }
 0x87a   :  { %v789_v52 = vmul.f32 %v1731_v50, %v1727_v41 }
 0x87c   :  { %v791_v54 = vpack.c.bf16 %v789_v52, %v789_v52 }
 0x87d   :  { %1646 = vmatpush3.bf16.xpose.msra.mxu0 %v954_v53 }
 0x87e   :  { %1630 = vmatmul.mubr.msk.bf16.vlgmr.msra.gmra.mrb[28].mxu1 %vm116_vm2, %v791_v54  ;;  %1657 = vmatprep.subr.bf16.mxu0 %v1748_v0 }
 0x87f   :  { %1641 = vmatprep.mubr.msk.bf16.mxu1 %vm1749_vm0, %v1748_v0  ;;  %1640 = vmatpush3.bf16.msra.mxu1 %v901_v58 }
 0x880   :  { %1651 = vmatprep.subr.bf16.mxu1 %v1748_v0 }
 0x884   :  { %1648 = vmatmul.mubr.msk.bf16.vlgmr.msra.gmra.mrb[28].mxu0 %vm116_vm2, %v947_v55 }
 0x885   :  { %1659 = vmatprep.mubr.msk.bf16.mxu0 %vm1749_vm0, %v1748_v0 }
 0x94a   :  { %v883_v59 = vpop.f32.mrb[24].mxu0 }
 0x94b   :  { %v1637_v60 = vpop.f32.mrb[25].mxu0 }
 0x94c   :  { %v886_v61 = vpop.f32.mrb[26].mxu0 }
 0x94d   :  { %v1638_v62 = vpop.f32.mrb[27].mxu0 }
 0x94e   :  { %v1483_v62 = vld [vmem:[%s2134_s4] ss:$0 sm:$0xff] }
 0x951   :  { %v835_v1 = vpop.f32.mrb[28].mxu1 }
 0x952   :  { %v1494_v2 = vpack.c.bf16 %v883_v59, %v835_v1  ;;  %v1631_v3 = vpop.f32.mrb[29].mxu1 }
 0x953   :  { %v838_v4 = vpop.f32.mrb[30].mxu1 }
 0x954   :  { %v1632_v6 = vpop.f32.mrb[31].mxu1  ;;  %1642 = vmatmul.mubr.msk.bf16.vlgmr.msra.gmra.mrb[32].mxu1 %vm116_vm2, %v1494_v2 }
 0x955   :  { %1652 = vmatpush3.bf16.xpose.msra.mxu1 %v1004_v5  ;;  %1653 = vmatprep.mubr.msk.bf16.mxu1 %vm1749_vm0, %v1748_v0 }
 0x956   :  { %1663 = vmatprep.subr.bf16.mxu1 %v1748_v0 }
 0x957   :  { %v990_v9 = vpop.f32.mrb[28].mxu0 }
 0x958   :  { %v1046_v10 = vmul.f32 0.35355338, %v990_v9  ;;  %v1649_v11 = vpop.f32.mrb[29].mxu0 }
 0x959   :  { %v993_v12 = vpop.f32.mrb[30].mxu0 }
 0x95a   :  { %v1650_v13 = vpop.f32.mrb[31].mxu0  ;;  %v1048_v14 = vsel %vm116_vm2, %v1046_v10, -inf }
 0x95b   :  { %1049 = vmax.xlane.f32.xlu0 %v1048_v14 }
 0x95c   :  { %1654 = vmatmul.mubr.msk.bf16.vlgmr.msra.gmra.mrb[36].mxu1 %vm116_vm2, %v997_v16 }
 0x95d   :  { %1665 = vmatprep.mubr.msk.bf16.mxu1 %vm1749_vm0, %v1748_v0 }
 0x9e8   :  { %v1050_v17 = vpop.xlane.xlu0 %1049 }
 0x9e9   :  { %v1054_v19 = vsub.f32 %v1046_v10, %v1050_v17 }
 0x9eb   :  { %v1056_v20 = vmul.f32 1.442695, %v1054_v19 }
 0x9ed   :  { %1732 = vpow2.f32 %v1056_v20 }
 0x9f7   :  { %v1733_v21 = vpop.eup %1732 }
 0x9f8   :  { %v1060_v22 = vsel %vm116_vm2, %v1733_v21, 0.0 }
 0x9f9   :  { %1061 = vadd.xlane.f32.xlu0 %v1060_v22 }
 0xa27   :  { %v937_v23 = vpop.f32.mrb[32].mxu1 }
 0xa28   :  { %v2021_v24 = vadd.f32 %v937_v23, %v1981_v25  ;;  %v1643_v26 = vpop.f32.mrb[33].mxu1 }
 0xa29   :  { %v940_v27 = vpop.f32.mrb[34].mxu1  ;;  %v1281_v26 = vld [vmem:[%s2135_s7 + $0x8] sm:$0xff] }
 0xa2a   :  { %v2024_v29 = vadd.f32 %v940_v27, %v1983_v28  ;;  %v1644_v30 = vpop.f32.mrb[35].mxu1 }
 0xa2b   :  { %v1283_v30 = vld [vmem:[%s2135_s7 + $0x18] sm:$0xff] }
 0xa2f   :  { %v1040_v31 = vpop.f32.mrb[36].mxu1 }
 0xa30   :  { %v1047_v32 = vmul.f32 0.35355338, %v1040_v31  ;;  %v1655_v33 = vpop.f32.mrb[37].mxu1 }
 0xa31   :  { %v1043_v34 = vpop.f32.mrb[38].mxu1  ;;  %v1341_v33 = vld [vmem:[%s2136_s9 + $0x8] sm:$0xff] }
 0xa32   :  { %v1656_v35 = vpop.f32.mrb[39].mxu1  ;;  %v1051_v36 = vsel %vm116_vm2, %v1047_v32, -inf  ;;  %v1342_v34 = vld [vmem:[%s2136_s9 + $0x10] sm:$0xff] }
 0xa33   :  { %1052 = vmax.xlane.f32.xlu1 %v1051_v36  ;;  %v1343_v36 = vld [vmem:[%s2136_s9 + $0x18] sm:$0xff] }
 0xa44   :  { %1072 = vrot.lane.b32.xlu1 %v1869_v15, %s1760_s18 }
 0xa86   :  { %v1062_v37 = vpop.xlane.xlu0 %1061 }
 0xa87   :  { %1734 = vrcp.f32 %v1062_v37  ;;  %v1351_v37 = vpack.c.bf16 %v1343_v36, %v1342_v34 }
 0xa91   :  { %v1735_v25 = vpop.eup %1734 }
 0xa92   :  { %v1068_v40 = vmul.f32 %v1735_v25, %v1733_v21 }
 0xa94   :  { %v1070_v43 = vpack.c.bf16 %v1068_v40, %v1068_v40 }
 0xac0   :  { %v1053_v38 = vpop.xlane.xlu1 %1052 }
 0xac1   :  { %v1055_v39 = vsub.f32 %v1047_v32, %v1053_v38  ;;  %v1340_v32 = vld [vmem:[%s2136_s9] sm:$0xff] }
 0xac2   :  { %v1350_v35 = vpack.c.bf16 %v1341_v33, %v1340_v32 }
 0xac3   :  { %v1058_v28 = vmul.f32 1.442695, %v1055_v39 }
 0xac4   :  { %v1073_v41 = vpop.permute.xlu1 %1072 }
 0xac5   :  { %1736 = vpow2.f32 %v1058_v28  ;;  %v1078_v42 = vsel %vm243_vm3, %v1073_v41, 0 }
 0xac6   :  { %1658 = vmatpush3.bf16.msra.mxu0 %v1078_v42 }
 0xac7   :  { %1669 = vmatprep.subr.bf16.mxu0 %v1748_v0 }
 0xac9   :  { %1660 = vmatmul.mubr.msk.bf16.vlgmr.msra.gmra.mrb[32].mxu0 %vm116_vm2, %v1070_v43  ;;  %v1484_v43 = vld [vmem:[%s2137_s5] ss:$0 sm:$0xff] }
 0xaca   :  { %1671 = vmatprep.mubr.msk.bf16.mxu0 %vm1749_vm0, %v1748_v0  ;;  %1670 = vmatpush3.bf16.msra.mxu0 %v1180_v47  ;;  %v1485_v47 = vld [vmem:[%s2138_s6] ss:$0 sm:$0xff] }
 0xacb   :  { %1683 = vmatprep.subr.bf16.mxu0 %v1748_v0 }
 0xacf   :  { %v1737_v15 = vpop.eup %1736 }
 0xad0   :  { %v1063_v44 = vsel %vm116_vm2, %v1737_v15, 0.0 }
 0xad1   :  { %1064 = vadd.xlane.f32.xlu0 %v1063_v44 }
 0xae7   :  { %1120 = vrot.lane.b32.xlu0 %v1872_v18, %s1760_s18 }
 0xb5e   :  { %v1065_v48 = vpop.xlane.xlu0 %1064 }
 0xb5f   :  { %1738 = vrcp.f32 %v1065_v48 }
 0xb62   :  { %v1121_v49 = vpop.permute.xlu0 %1120 }
 0xb63   :  { %v1126_v50 = vsel %vm243_vm3, %v1121_v49, 0 }
 0xb64   :  { %1664 = vmatpush3.bf16.msra.mxu1 %v1126_v50 }
 0xb65   :  { %1675 = vmatprep.subr.bf16.mxu1 %v1748_v0 }
 0xb69   :  { %v1739_v51 = vpop.eup %1738 }
 0xb6a   :  { %v1069_v18 = vmul.f32 %v1739_v51, %v1737_v15 }
 0xb6c   :  { %v1071_v52 = vpack.c.bf16 %v1069_v18, %v1069_v18  ;;  %v1344_v18 = vld [vmem:[%s2136_s9 + $0x20] sm:$0xff] }
 0xb6e   :  { %1666 = vmatmul.mubr.msk.bf16.vlgmr.msra.gmra.mrb[40].mxu1 %vm116_vm2, %v1071_v52  ;;  %v1345_v52 = vld [vmem:[%s2136_s9 + $0x28] sm:$0xff] }
 0xb6f   :  { %1679 = vmatprep.mubr.msk.bf16.mxu1 %vm1749_vm0, %v1748_v0 }
 0xb9c   :  { %v1114_v53 = vpop.f32.mrb[32].mxu0 }
 0xb9d   :  { %v1661_v54 = vpop.f32.mrb[33].mxu0 }
 0xb9e   :  { %v1117_v55 = vpop.f32.mrb[34].mxu0  ;;  %v1346_v54 = vld [vmem:[%s2136_s9 + $0x30] sm:$0xff] }
 0xb9f   :  { %v1662_v56 = vpop.f32.mrb[35].mxu0  ;;  %v1347_v55 = vld [vmem:[%s2136_s9 + $0x38] sm:$0xff] }
 0xba0   :  { %v1353_v56 = vpack.c.bf16 %v1347_v55, %v1346_v54 }
 0xc41   :  { %v1162_v57 = vpop.f32.mrb[40].mxu1 }
 0xc42   :  { %v1495_v58 = vpack.c.bf16 %v1162_v57, %v1114_v53  ;;  %v1667_v59 = vpop.f32.mrb[41].mxu1  ;;  %v1352_v53 = vpack.c.bf16 %v1345_v52, %v1344_v18  ;;  %v1486_v57 = vld [vmem:[%s2139_s8] ss:$0 sm:$0xff] }
 0xc43   :  { %v1165_v60 = vpop.f32.mrb[42].mxu1 }
 0xc44   :  { %v1668_v61 = vpop.f32.mrb[43].mxu1  ;;  %1672 = vmatmul.mubr.msk.bf16.vlgmr.msra.gmra.mrb[36].mxu0 %vm116_vm2, %v1495_v58 }
 0xc45   :  { %1691 = vmatprep.mubr.msk.bf16.mxu0 %vm1749_vm0, %v1748_v0  ;;  %1684 = vmatpush3.bf16.msra.mxu0 %v1350_v35  ;;  %v1490_v35 = vld [vmem:[%s2141_s11] ss:$0 sm:$0xff] }
 0xc46   :  { %1685 = vmatprep.subr.bf16.mxu0 %v1748_v0 }
 0xc49   :  { %1686 = vmatpush3.bf16.msra.mxu0 %v1351_v37 }
 0xc4a   :  { %1687 = vmatprep.subr.bf16.mxu0 %v1748_v0 }
 0xc4d   :  { %1688 = vmatpush3.bf16.msra.mxu0 %v1352_v53 }
 0xc4e   :  { %1689 = vmatprep.subr.bf16.mxu0 %v1748_v0 }
 0xc51   :  { %1690 = vmatpush3.bf16.msra.mxu0 %v1353_v56 }
 0xd17   :  { %v1216_v63 = vpop.f32.mrb[36].mxu0 }
 0xd18   :  { %v1223_v1 = vadd.f32 %v1216_v63, %v2021_v24  ;;  %v1673_v2 = vpop.f32.mrb[37].mxu0 }
 0xd19   :  { %v1219_v3 = vpop.f32.mrb[38].mxu0 }
 0xd1a   :  { %v1231_v4 = vadd.f32 %v1483_v62, %v1223_v1  ;;  %v1224_v5 = vadd.f32 %v1219_v3, %v2024_v29  ;;  %v1674_v6 = vpop.f32.mrb[39].mxu0  ;;  %v1282_v29 = vld [vmem:[%s2135_s7 + $0x10] sm:$0xff]  ;;  %v1488_v3 = vld [vmem:[%s2140_s10] ss:$0 sm:$0xff] }
 0xd1b   :  { %v1287_v31 = vpack.c.bf16 %v1283_v30, %v1282_v29 }
 0xd1c   :  { %v1232_v9 = vadd.f32 %v1483_v62, %v1224_v5  ;;  %v1233_v10 = vadd.f32 %v1231_v4, %v1852_v7 }
 0xd1e   :  { %v1237_v11 = vsel %vm61_vm1, %v1233_v10, 0.0  ;;  %v1234_v12 = vadd.f32 %v1232_v9, %v1857_v8  ;;  %v1280_v8 = vld [vmem:[%s2135_s7] sm:$0xff] }
 0xd1f   :  { %1238 = vadd.xlane.f32.xlu1 %v1237_v11  ;;  %v1286_v27 = vpack.c.bf16 %v1281_v26, %v1280_v8 }
 0xd20   :  { %v1240_v13 = vsel %vm61_vm1, %v1234_v12, 0.0 }
 0xd21   :  { %1241 = vadd.xlane.f32.xlu0 %v1240_v13  ;;  %1676 = vmatpush3.bf16.msra.mxu1 %v1286_v27 }
 0xd22   :  { %1677 = vmatprep.subr.bf16.mxu1 %v1748_v0 }
 0xd25   :  { %1678 = vmatpush3.bf16.msra.mxu1 %v1287_v31 }
 0xdac   :  { %v1239_v14 = vpop.xlane.xlu1 %1238 }
 0xdad   :  { %v1244_v16 = vmul.f32 0.03125, %v1239_v14 }
 0xdae   :  { %v1242_v17 = vpop.xlane.xlu0 %1241 }
 0xdaf   :  { %v1246_v19 = vsub.f32 %v1233_v10, %v1244_v16  ;;  %v1245_v20 = vmul.f32 0.03125, %v1242_v17 }
 0xdb1   :  { %v1247_v21 = vsub.f32 %v1234_v12, %v1245_v20  ;;  %v1248_v22 = vmul.f32 %v1246_v19, %v1246_v19 }
 0xdb3   :  { %v1250_v23 = vsel %vm61_vm1, %v1248_v22, 0.0  ;;  %v1249_v24 = vmul.f32 %v1247_v21, %v1247_v21 }
 0xdb4   :  { %1251 = vadd.xlane.f32.xlu1 %v1250_v23 }
 0xdb5   :  { %v1253_v7 = vsel %vm61_vm1, %v1249_v24, 0.0 }
 0xdb6   :  { %1254 = vadd.xlane.f32.xlu0 %v1253_v7 }
 0xe41   :  { %v1252_v25 = vpop.xlane.xlu1 %1251 }
 0xe42   :  { %v1256_v38 = vmul.f32 0.03125, %v1252_v25  ;;  %v1491_v25 = vld [vmem:[%s2142_s12] ss:$0 sm:$0xff] }
 0xe43   :  { %v1255_v39 = vpop.xlane.xlu0 %1254 }
 0xe44   :  { %v1258_v40 = vadd.f32 1e-05, %v1256_v38  ;;  %v1257_v28 = vmul.f32 0.03125, %v1255_v39 }
 0xe46   :  { %1740 = vrsqrt.f32 %v1258_v40  ;;  %v1259_v41 = vadd.f32 1e-05, %v1257_v28 }
 0xe48   :  { %1742 = vrsqrt.f32 %v1259_v41 }
 0xe50   :  { %v1741_v42 = vpop.eup %1740 }
 0xe51   :  { %v1262_v15 = vmul.f32 %v1741_v42, %v1246_v19 }
 0xe52   :  { %v1743_v44 = vpop.eup %1742 }
 0xe53   :  { %v1270_v45 = vmul.f32 %v1484_v43, %v1262_v15  ;;  %v1263_v46 = vmul.f32 %v1743_v44, %v1247_v21 }
 0xe55   :  { %v1271_v48 = vmul.f32 %v1484_v43, %v1263_v46  ;;  %v1278_v49 = vadd.f32 %v1485_v47, %v1270_v45 }
 0xe57   :  { %v1279_v50 = vadd.f32 %v1485_v47, %v1271_v48 }
 0xe59   :  { %v1285_v51 = vpack.c.bf16 %v1279_v50, %v1278_v49 }
 0xe5b   :  { %1680 = vmatmul.mubr.msk.bf16.vlgmr.msra.gmra.mrb[44].mxu1 %vm61_vm1, %v1285_v51 }
 0xf2e   :  { %v1331_v58 = vpop.f32.mrb[44].mxu1 }
 0xf2f   :  { %v1332_v59 = vadd.f32 %v1486_v57, %v1331_v58  ;;  %v1681_v60 = vpop.f32.mrb[45].mxu1 }
 0xf30   :  { %v1334_v61 = vpop.f32.mrb[46].mxu1 }
 0xf31   :  { %v1335_v62 = vadd.f32 %v1486_v57, %v1334_v61  ;;  %v1682_v0 = vpop.f32.mrb[47].mxu1  ;;  %v1338_v63 = vmax.f32 %v1332_v59, 0.0 }
 0xf33   :  { %v1339_v1 = vmax.f32 %v1335_v62, 0.0 }
 0xf35   :  { %v1349_v2 = vpack.c.bf16 %v1339_v1, %v1338_v63 }
 0xf37   :  { %1692 = vmatmul.mubr.msk.bf16.vlgmr.msra.gmra.mrb[40].mxu0 %vm1360_vm4, %v1349_v2 }
0x100a   :  { %v1398_v4 = vpop.f32.mrb[40].mxu0 }
0x100b   :  { %v1399_v5 = vadd.f32 %v1488_v3, %v1398_v4  ;;  %v1693_v6 = vpop.f32.mrb[41].mxu0 }
0x100c   :  { %v1401_v9 = vpop.f32.mrb[42].mxu0 }
0x100d   :  { %v1402_v10 = vadd.f32 %v1488_v3, %v1401_v9  ;;  %v1694_v11 = vpop.f32.mrb[43].mxu0  ;;  %v1405_v12 = vadd.f32 %v1399_v5, %v1278_v49 }
0x100f   :  { %v1409_v13 = vsel %vm61_vm1, %v1405_v12, 0.0  ;;  %v1406_v14 = vadd.f32 %v1402_v10, %v1279_v50 }
0x1010   :  { %1410 = vadd.xlane.f32.xlu1 %v1409_v13 }
0x1011   :  { %v1412_v16 = vsel %vm61_vm1, %v1406_v14, 0.0 }
0x1012   :  { %1413 = vadd.xlane.f32.xlu0 %v1412_v16 }
0x109d   :  { %v1411_v17 = vpop.xlane.xlu1 %1410 }
0x109e   :  { %v1415_v19 = vmul.f32 0.03125, %v1411_v17 }
0x109f   :  { %v1414_v20 = vpop.xlane.xlu0 %1413 }
0x10a0   :  { %v1417_v21 = vsub.f32 %v1405_v12, %v1415_v19  ;;  %v1416_v22 = vmul.f32 0.03125, %v1414_v20 }
0x10a2   :  { %v1418_v23 = vsub.f32 %v1406_v14, %v1416_v22  ;;  %v1419_v24 = vmul.f32 %v1417_v21, %v1417_v21 }
0x10a4   :  { %v1421_v7 = vsel %vm61_vm1, %v1419_v24, 0.0  ;;  %v1420_v8 = vmul.f32 %v1418_v23, %v1418_v23 }
0x10a5   :  { %1422 = vadd.xlane.f32.xlu1 %v1421_v7 }
0x10a6   :  { %v1424_v26 = vsel %vm61_vm1, %v1420_v8, 0.0 }
0x10a7   :  { %1425 = vadd.xlane.f32.xlu0 %v1424_v26 }
0x1132   :  { %v1423_v27 = vpop.xlane.xlu1 %1422 }
0x1133   :  { %v1427_v29 = vmul.f32 0.03125, %v1423_v27 }
0x1134   :  { %v1426_v30 = vpop.xlane.xlu0 %1425 }
0x1135   :  { %v1429_v31 = vadd.f32 1e-05, %v1427_v29  ;;  %v1428_v32 = vmul.f32 0.03125, %v1426_v30 }
0x1137   :  { %1744 = vrsqrt.f32 %v1429_v31  ;;  %v1430_v33 = vadd.f32 1e-05, %v1428_v32 }
0x1139   :  { %1746 = vrsqrt.f32 %v1430_v33 }
0x1141   :  { %v1745_v34 = vpop.eup %1744 }
0x1142   :  { %v1433_v36 = vmul.f32 %v1745_v34, %v1417_v21 }
0x1143   :  { %v1747_v37 = vpop.eup %1746 }
0x1144   :  { %v1441_v38 = vmul.f32 %v1490_v35, %v1433_v36  ;;  %v1434_v39 = vmul.f32 %v1747_v37, %v1418_v23 }
0x1146   :  { %v1449_v40 = vadd.f32 %v1491_v25, %v1441_v38  ;;  %v1442_v28 = vmul.f32 %v1490_v35, %v1434_v39 }
0x1148   :  { %1451 = vst.msk [vmem:[%s2143_s13] sm:$0xff] %vm61_vm1, %v1449_v40  ;;  %v1450_v41 = vadd.f32 %v1491_v25, %v1442_v28 }
0x114a   :  { %1452 = vst.msk [vmem:[%s2143_s13 + $0x8] sm:$0xff] %vm61_vm1, %v1450_v41 }

// kernel: transformer_fwd.7
= control target key start
LH: loop header
LB: loop body
LE: loop exit
PB: predicated region body
PF: predicated region fallthrough
CT: control target
= control target key end

     0   :  { %v3428_v0 = vmov 0.0   ;;  %vm3429_vm0 = vmmov 0   ;;  %vm96_vm1 = vcmask 261120   ;;  %vm199_vm2 = vcmask 64512   ;;  %s3434_s29 = smov 88   ;;  %s3436_s30 = smov 56   ;;  %s4221_s4 = inlined_call_operand.vmem [shape: f32[32,96], index: 4, kind: input, shape index: {}]   ;;  %s4222_s0 = inlined_call_operand.vmem [shape: f32[16,32], index: 0, kind: input, shape index: {}]   ;;  %s4223_s5 = inlined_call_operand.vmem [shape: f32[1,96], index: 5, kind: input, shape index: {}]   ;;  %s4224_s2 = inlined_call_operand.vmem [shape: s32[2,8], index: 2, kind: input, shape index: {}]   ;;  %s4225_s6 = inlined_call_operand.vmem [shape: f32[32,32], index: 6, kind: input, shape index: {}]   ;;  %s4226_s7 = inlined_call_operand.vmem [shape: f32[1,32], index: 7, kind: input, shape index: {}]   ;;  %s4227_s12 = inlined_call_operand.vmem [shape: f32[32,64], index: 12, kind: input, shape index: {}]   ;;  %s4228_s1 = inlined_call_operand.vmem [shape: f32[16,32], index: 1, kind: input, shape index: {}]   ;;  %s4229_s10 = inlined_call_operand.vmem [shape: f32[32,32], index: 10, kind: input, shape index: {}]   ;;  %s4230_s8 = inlined_call_operand.vmem [shape: f32[1,32], index: 8, kind: input, shape index: {}]   ;;  %s4231_s9 = inlined_call_operand.vmem [shape: f32[1,32], index: 9, kind: input, shape index: {}]   ;;  %s4232_s13 = inlined_call_operand.vmem [shape: f32[1,64], index: 13, kind: input, shape index: {}]   ;;  %s4233_s11 = inlined_call_operand.vmem [shape: f32[1,32], index: 11, kind: input, shape index: {}]   ;;  %s4234_s3 = inlined_call_operand.vmem [shape: s32[2,8], index: 3, kind: input, shape index: {}]   ;;  %s4235_s14 = inlined_call_operand.vmem [shape: f32[32,32], index: 14, kind: input, shape index: {}]   ;;  %s4236_s15 = inlined_call_operand.vmem [shape: f32[1,32], index: 15, kind: input, shape index: {}]   ;;  %s4237_s18 = inlined_call_operand.vmem [shape: f32[32,64], index: 18, kind: input, shape index: {}]   ;;  %s4238_s20 = inlined_call_operand.vmem [shape: f32[64,32], index: 20, kind: input, shape index: {}]   ;;  %s4239_s16 = inlined_call_operand.vmem [shape: f32[1,32], index: 16, kind: input, shape index: {}]   ;;  %s4240_s17 = inlined_call_operand.vmem [shape: f32[1,32], index: 17, kind: input, shape index: {}]   ;;  %s4241_s19 = inlined_call_operand.vmem [shape: f32[1,64], index: 19, kind: input, shape index: {}]   ;;  %s4242_s21 = inlined_call_operand.vmem [shape: f32[1,32], index: 21, kind: input, shape index: {}]   ;;  %s4243_s22 = inlined_call_operand.vmem [shape: f32[1,32], index: 22, kind: input, shape index: {}]   ;;  %s4244_s23 = inlined_call_operand.vmem [shape: f32[1,32], index: 23, kind: input, shape index: {}]   ;;  %s4245_s24 = inlined_call_operand.vmem [shape: f32[16,32], index: 24, kind: output, shape index: {}]  }
   0x1   :  { %4258 = sst [smem:[#allocation2_spill]] %s4221_s4  ;;  %3053 = vmatprep.subr.bf16.mxu1 %v3428_v0  ;;  %3057 = vmatprep.mubr.msk.bf16.mxu1 %vm3429_vm0, %v3428_v0  ;;  %v3431_v23 = vmov 1966171168   ;;  %v152_v25 = vlaneseq  ;;  %v3432_v30 = vmov 0   ;;  %vm328_vm11 = vcmask 1043456   ;;  %s3437_s4 = smov 112  }
   0x2   :  { %4259 = sst [smem:[#allocation3_spill]] %s4222_s0  ;;  %s4267_s27 = sld [smem:[#allocation2_spill]]  ;;  %3067 = vmatprep.subr.bf16.mxu0 %v3428_v0  ;;  %3069 = vmatprep.mubr.msk.bf16.mxu0 %vm3429_vm0, %v3428_v0  ;;  %v150_v24 = vunpack.c.l.s4 %v3431_v23 }
   0x3   :  { %4260 = sst [smem:[#allocation4_spill]] %s4223_s5  ;;  %s4268_s25 = sld [smem:[#allocation3_spill]]  ;;  %v153_v28 = vshrl.u32 %v152_v25, 7  ;;  %v188_v39 = vand.u32 127, %v152_v25 }
   0x4   :  { %4261 = sst [smem:[#allocation5_spill]] %s4224_s2  ;;  %s4269_s26 = sld [smem:[#allocation4_spill]]  ;;  %v151_v27 = vunpack.c.0.s8 %v150_v24 }
   0x5   :  { %4262 = sst [smem:[#allocation6_spill]] %s4225_s6  ;;  %s4270_s5 = sld [smem:[#allocation5_spill]]  ;;  %v3635_v36 = vsub.s32 0, %v153_v28  ;;  %vm189_vm7 = vcmp.ge.s32.totalorder %v153_v28, %v188_v39 }
   0x6   :  { %4263 = sst [smem:[#allocation7_spill]] %s4226_s7  ;;  %v3629_v29 = vsub.s32 %v151_v27, %v153_v28  ;;  %s3435_s2 = smov 120  }
   0x7   :  { %4264 = sst [smem:[#allocation8_spill]] %s4227_s12  ;;  %s4275_s0 = sld [smem:[#allocation6_spill]] }
   0x8   :  { %4265 = sst [smem:[#allocation9_spill]] %s4228_s1  ;;  %v82_v1 = vld [vmem:[%s4267_s27] sm:$0xff]  ;;  %v83_v2 = vld [vmem:[%s4267_s27 + $0x8] sm:$0xff]  ;;  %v84_v3 = vld [vmem:[%s4267_s27 + $0x10] sm:$0xff]  ;;  %s3433_s1 = smov 64  }
   0x9   :  { %4266 = sst [smem:[#allocation10_spill]] %s4229_s10  ;;  %v88_v4 = vpack.c.bf16 %v83_v2, %v82_v1  ;;  %v85_v5 = vld [vmem:[%s4267_s27 + $0x18] sm:$0xff]  ;;  %v3589_v7 = vld [vmem:[%s4268_s25] sm:$0xff]  ;;  %v3594_v8 = vld [vmem:[%s4268_s25 + $0x8] sm:$0xff]  ;;  %s3430_s27 = smov 96  }
   0xa   :  { %v89_v6 = vpack.c.bf16 %v85_v5, %v84_v3  ;;  %v87_v9 = vpack.c.bf16 %v3594_v8, %v3589_v7  ;;  %v2882_v10 = vld [vmem:[%s4269_s26] ss:$0 sm:$0xff]  ;;  %s4256_s25 = smov 80   ;;  %s3439_s28 = smov 48  }
   0xb   :  { %3054 = vmatpush3.bf16.msra.mxu1 %v88_v4  ;;  %v146_v26 = vld [vmem:[%s4270_s5] sm:$0x3]  ;;  %s4252_s12 = smov 72   ;;  %s4254_s5 = smov 104  }
   0xc   :  { %3055 = vmatprep.subr.bf16.mxu1 %v3428_v0  ;;  %vm147_vm3 = vcmp.gt.s32.totalorder %v146_v26, 0  ;;  %s3442_s10 = smov 40  }
   0xd   :  { %v148_v31 = vsel %vm147_vm3, 1, %v3432_v30 }
   0xe   :  { %v155_v32 = vrot.slane %v148_v31, %v3629_v29 }
   0xf   :  { %3056 = vmatpush3.bf16.msra.mxu1 %v89_v6 }
  0x10   :  { %3061 = vmatprep.subr.bf16.mxu1 %v3428_v0  ;;  %v163_v33 = vrot.slane %v155_v32, %v3629_v29  ;;  %v156_v34 = vcombine.high %v155_v32, %v155_v32 }
  0x12   :  { %3058 = vmatmul.mubr.msk.bf16.vlgmr.msra.gmra.mrb[0].mxu1 %vm96_vm1, %v87_v9  ;;  %vm171_vm4 = vcmp.ne.s32.totalorder %v163_v33, 0  ;;  %v170_v35 = vrot.slane %v156_v34, %v3629_v29 }
  0x13   :  { %3063 = vmatprep.mubr.msk.bf16.mxu1 %vm3429_vm0, %v3428_v0  ;;  %v173_v37 = vsel %vm171_vm4, 1, %v3432_v30 }
  0x14   :  { %vm172_vm5 = vcmp.ne.s32.totalorder %v170_v35, 0  ;;  %v178_v38 = vrot.slane %v173_v37, %v3635_v36 }
  0x15   :  { %v174_v40 = vsel %vm172_vm5, 1, %v3432_v30 }
  0x16   :  { %vm183_vm6 = vcmp.eq.s32.totalorder %v178_v38, 1  ;;  %v182_v41 = vrot.slane %v174_v40, %v3635_v36 }
  0x17   :  { %vm3641_vm8 = vmand %vm183_vm6, %vm189_vm7 }
  0x18   :  { %vm184_vm9 = vcmp.eq.s32.totalorder %v182_v41, 1 }
  0x19   :  { %vm3648_vm10 = vmand %vm184_vm9, %vm189_vm7 }
  0xe5   :  { %v134_v11 = vpop.f32.mrb[0].mxu1 }
  0xe6   :  { %v135_v12 = vadd.f32 %v2882_v10, %v134_v11  ;;  %v3059_v13 = vpop.f32.mrb[1].mxu1 }
  0xe7   :  { %v137_v14 = vpop.f32.mrb[2].mxu1 }
  0xe8   :  { %v3606_v15 = vpack.c.bf16 %v135_v12, %v135_v12  ;;  %v138_v16 = vadd.f32 %v2882_v10, %v137_v14  ;;  %v3060_v17 = vpop.f32.mrb[3].mxu1 }
  0xea   :  { %197 = vrot.lane.b32.xlu0 %v3606_v15, %s3430_s27  ;;  %v3610_v18 = vpack.c.bf16 %v138_v16, %v138_v16 }
  0xee   :  { %247 = vrot.lane.b32.xlu0 %v3610_v18, %s3430_s27 }
 0x15c   :  { %v198_v19 = vpop.permute.xlu0 %197 }
 0x15d   :  { %v204_v20 = vsel %vm199_vm2, %v198_v19, 0 }
 0x15e   :  { %3062 = vmatpush3.bf16.xpose.msra.mxu1 %v204_v20 }
 0x15f   :  { %3073 = vmatprep.subr.bf16.mxu1 %v3428_v0 }
 0x160   :  { %v248_v21 = vpop.permute.xlu0 %247 }
 0x161   :  { %v253_v22 = vsel %vm199_vm2, %v248_v21, 0 }
 0x162   :  { %3068 = vmatpush3.bf16.xpose.msra.mxu0 %v253_v22 }
 0x163   :  { %3079 = vmatprep.subr.bf16.mxu0 %v3428_v0 }
 0x165   :  { %3064 = vmatmul.mubr.msk.bf16.vlgmr.msra.gmra.mrb[4].mxu1 %vm199_vm2, %v3606_v15 }
 0x166   :  { %3075 = vmatprep.mubr.msk.bf16.mxu1 %vm3429_vm0, %v3428_v0 }
 0x169   :  { %3070 = vmatmul.mubr.msk.bf16.vlgmr.msra.gmra.mrb[0].mxu0 %vm199_vm2, %v3610_v18 }
 0x16a   :  { %3081 = vmatprep.mubr.msk.bf16.mxu0 %vm3429_vm0, %v3428_v0 }
 0x238   :  { %v240_v42 = vpop.f32.mrb[4].mxu1 }
 0x239   :  { %v295_v44 = vmul.f32 0.35355338, %v240_v42  ;;  %v3065_v45 = vpop.f32.mrb[5].mxu1 }
 0x23a   :  { %v243_v46 = vpop.f32.mrb[6].mxu1 }
 0x23b   :  { %v3066_v47 = vpop.f32.mrb[7].mxu1  ;;  %v297_v48 = vsel %vm3641_vm8, %v295_v44, -1e+09 }
 0x23c   :  { %v289_v49 = vpop.f32.mrb[0].mxu0  ;;  %v299_v50 = vsel %vm199_vm2, %v297_v48, -inf }
 0x23d   :  { %v296_v52 = vmul.f32 0.35355338, %v289_v49  ;;  %v3071_v53 = vpop.f32.mrb[1].mxu0  ;;  %300 = vmax.xlane.f32.xlu1 %v299_v50 }
 0x23e   :  { %v292_v54 = vpop.f32.mrb[2].mxu0 }
 0x23f   :  { %v3072_v55 = vpop.f32.mrb[3].mxu0  ;;  %v298_v56 = vsel %vm3648_vm10, %v296_v52, -1e+09 }
 0x240   :  { %v302_v57 = vsel %vm199_vm2, %v298_v56, -inf }
 0x241   :  { %303 = vmax.xlane.f32.xlu1 %v302_v57 }
 0x252   :  { %323 = vrot.lane.b32.xlu1 %v3606_v15, %s3433_s1 }
 0x256   :  { %372 = vrot.lane.b32.xlu1 %v3610_v18, %s3433_s1  ;;  %s4286_s1 = smov 72  }
 0x25a   :  { %425 = vrot.lane.b32.xlu1 %v3606_v15, %s3434_s29 }
 0x2ca   :  { %v301_v58 = vpop.xlane.xlu1 %300 }
 0x2cb   :  { %v305_v59 = vsub.f32 %v297_v48, %v301_v58 }
 0x2cd   :  { %v307_v60 = vmul.f32 1.442695, %v305_v59 }
 0x2ce   :  { %v304_v61 = vpop.xlane.xlu1 %303 }
 0x2cf   :  { %3352 = vpow2.f32 %v307_v60  ;;  %v306_v62 = vsub.f32 %v298_v56, %v304_v61 }
 0x2d1   :  { %v309_v63 = vmul.f32 1.442695, %v306_v62 }
 0x2d2   :  { %v324_v1 = vpop.permute.xlu1 %323 }
 0x2d3   :  { %3354 = vpow2.f32 %v309_v63  ;;  %v330_v2 = vsel %vm328_vm11, %v324_v1, 0 }
 0x2d4   :  { %3074 = vmatpush3.bf16.msra.mxu1 %v330_v2 }
 0x2d5   :  { %3085 = vmatprep.subr.bf16.mxu1 %v3428_v0 }
 0x2d6   :  { %v373_v3 = vpop.permute.xlu1 %372 }
 0x2d7   :  { %v378_v4 = vsel %vm328_vm11, %v373_v3, 0 }
 0x2d8   :  { %3080 = vmatpush3.bf16.msra.mxu0 %v378_v4 }
 0x2d9   :  { %v3353_v5 = vpop.eup %3352  ;;  %3091 = vmatprep.subr.bf16.mxu0 %v3428_v0 }
 0x2da   :  { %v311_v6 = vsel %vm199_vm2, %v3353_v5, 0.0  ;;  %v426_v11 = vpop.permute.xlu1 %425 }
 0x2db   :  { %312 = vadd.xlane.f32.xlu0 %v311_v6  ;;  %v431_v20 = vsel %vm199_vm2, %v426_v11, 0  ;;  %v142_v6 = vld [vmem:[%s4275_s0 + $0x8] sm:$0xff] }
 0x2dc   :  { %v649_v11 = vpack.c.bf16 %v142_v6, %v142_v6 }
 0x2dd   :  { %v3355_v9 = vpop.eup %3354 }
 0x2de   :  { %v314_v10 = vsel %vm199_vm2, %v3355_v9, 0.0 }
 0x2df   :  { %315 = vadd.xlane.f32.xlu1 %v314_v10 }
 0x2f0   :  { %475 = vrot.lane.b32.xlu1 %v3610_v18, %s3434_s29 }
 0x2f1   :  { %423 = vrot.lane.b32.xlu0 %v3606_v15, %s3435_s2 }
 0x2f4   :  { %473 = vrot.lane.b32.xlu1 %v3610_v18, %s3435_s2 }
 0x368   :  { %v313_v12 = vpop.xlane.xlu0 %312 }
 0x369   :  { %3356 = vrcp.f32 %v313_v12 }
 0x36c   :  { %v316_v13 = vpop.xlane.xlu1 %315  ;;  %v424_v25 = vpop.permute.xlu0 %423 }
 0x36d   :  { %3358 = vrcp.f32 %v316_v13  ;;  %v141_v13 = vld [vmem:[%s4275_s0] sm:$0xff] }
 0x370   :  { %v476_v22 = vpop.permute.xlu1 %475 }
 0x371   :  { %v481_v24 = vsel %vm199_vm2, %v476_v22, 0 }
 0x373   :  { %v3357_v14 = vpop.eup %3356 }
 0x374   :  { %v319_v16 = vmul.f32 %v3357_v14, %v3353_v5  ;;  %v474_v26 = vpop.permute.xlu1 %473 }
 0x376   :  { %v321_v17 = vpack.c.bf16 %v319_v16, %v319_v16 }
 0x377   :  { %v3359_v19 = vpop.eup %3358 }
 0x378   :  { %v320_v21 = vmul.f32 %v3359_v19, %v3355_v9  ;;  %3076 = vmatmul.mubr.msk.bf16.vlgmr.msra.gmra.mrb[8].mxu1 %vm199_vm2, %v321_v17  ;;  %v422_v17 = vpack.c.bf16 %v141_v13, %v141_v13  ;;  %v659_v19 = vsel %vm328_vm11, %v649_v11, 0 }
 0x379   :  { %3086 = vmatpush3.bf16.xpose.msra.mxu1 %v431_v20  ;;  %3087 = vmatprep.mubr.msk.bf16.mxu1 %vm3429_vm0, %v3428_v0 }
 0x37a   :  { %v322_v23 = vpack.c.bf16 %v320_v21, %v320_v21  ;;  %3097 = vmatprep.subr.bf16.mxu1 %v3428_v0 }
 0x37c   :  { %3082 = vmatmul.mubr.msk.bf16.vlgmr.msra.gmra.mrb[4].mxu0 %vm199_vm2, %v322_v23  ;;  %v711_v23 = vsel %vm328_vm11, %v422_v17, 0 }
 0x37d   :  { %3092 = vmatpush3.bf16.xpose.msra.mxu0 %v481_v24  ;;  %3093 = vmatprep.mubr.msk.bf16.mxu0 %vm3429_vm0, %v3428_v0 }
 0x37e   :  { %3103 = vmatprep.subr.bf16.mxu0 %v3428_v0 }
 0x380   :  { %3088 = vmatmul.mubr.msk.bf16.vlgmr.msra.gmra.mrb[12].mxu1 %vm199_vm2, %v424_v25 }
 0x381   :  { %3099 = vmatprep.mubr.msk.bf16.mxu1 %vm3429_vm0, %v3428_v0 }
 0x384   :  { %3094 = vmatmul.mubr.msk.bf16.vlgmr.msra.gmra.mrb[8].mxu0 %vm199_vm2, %v474_v26 }
 0x385   :  { %3105 = vmatprep.mubr.msk.bf16.mxu0 %vm3429_vm0, %v3428_v0 }
 0x44b   :  { %v3687_v27 = vpop.f32.mrb[8].mxu1 }
 0x44c   :  { %v3077_v28 = vpop.f32.mrb[9].mxu1 }
 0x44d   :  { %v369_v31 = vpop.f32.mrb[10].mxu1 }
 0x44e   :  { %v3078_v32 = vpop.f32.mrb[11].mxu1 }
 0x44f   :  { %v3689_v33 = vpop.f32.mrb[4].mxu0 }
 0x450   :  { %v2949_v34 = vpack.c.bf16 %v3689_v33, %v3687_v27  ;;  %v3083_v35 = vpop.f32.mrb[5].mxu0 }
 0x451   :  { %v417_v37 = vpop.f32.mrb[6].mxu0 }
 0x452   :  { %v3084_v38 = vpop.f32.mrb[7].mxu0 }
 0x453   :  { %v467_v39 = vpop.f32.mrb[12].mxu1 }
 0x454   :  { %v523_v40 = vmul.f32 0.35355338, %v467_v39  ;;  %v3089_v41 = vpop.f32.mrb[13].mxu1 }
 0x455   :  { %v470_v42 = vpop.f32.mrb[14].mxu1 }
 0x456   :  { %v3090_v44 = vpop.f32.mrb[15].mxu1  ;;  %v525_v45 = vsel %vm3641_vm8, %v523_v40, -1e+09 }
 0x457   :  { %v517_v46 = vpop.f32.mrb[8].mxu0  ;;  %v527_v47 = vsel %vm199_vm2, %v525_v45, -inf }
 0x458   :  { %v524_v48 = vmul.f32 0.35355338, %v517_v46  ;;  %v3095_v49 = vpop.f32.mrb[9].mxu0  ;;  %528 = vmax.xlane.f32.xlu1 %v527_v47 }
 0x459   :  { %v520_v50 = vpop.f32.mrb[10].mxu0 }
 0x45a   :  { %v3096_v52 = vpop.f32.mrb[11].mxu0  ;;  %v526_v53 = vsel %vm3648_vm10, %v524_v48, -1e+09 }
 0x45b   :  { %v530_v54 = vsel %vm199_vm2, %v526_v53, -inf }
 0x45c   :  { %531 = vmax.xlane.f32.xlu0 %v530_v54 }
 0x472   :  { %599 = vrot.lane.b32.xlu0 %v3610_v18, %s3436_s30 }
 0x476   :  { %754 = vrot.lane.b32.xlu0 %v3606_v15, %s3437_s4 }
 0x4e5   :  { %v529_v55 = vpop.xlane.xlu1 %528 }
 0x4e6   :  { %v533_v56 = vsub.f32 %v525_v45, %v529_v55 }
 0x4e8   :  { %v535_v57 = vmul.f32 1.442695, %v533_v56 }
 0x4e9   :  { %v532_v58 = vpop.xlane.xlu0 %531 }
 0x4ea   :  { %3360 = vpow2.f32 %v535_v57  ;;  %v534_v59 = vsub.f32 %v526_v53, %v532_v58 }
 0x4ec   :  { %v537_v60 = vmul.f32 1.442695, %v534_v59 }
 0x4ed   :  { %v600_v61 = vpop.permute.xlu0 %599 }
 0x4ee   :  { %3362 = vpow2.f32 %v537_v60  ;;  %v605_v62 = vsel %vm328_vm11, %v600_v61, 0 }
 0x4ef   :  { %3104 = vmatpush3.bf16.msra.mxu0 %v605_v62 }
 0x4f0   :  { %3115 = vmatprep.subr.bf16.mxu0 %v3428_v0 }
 0x4f1   :  { %v755_v44 = vpop.permute.xlu0 %754 }
 0x4f4   :  { %v3361_v63 = vpop.eup %3360 }
 0x4f5   :  { %v539_v1 = vsel %vm199_vm2, %v3361_v63, 0.0 }
 0x4f6   :  { %540 = vadd.xlane.f32.xlu1 %v539_v1 }
 0x4f8   :  { %v3363_v2 = vpop.eup %3362 }
 0x4f9   :  { %v542_v3 = vsel %vm199_vm2, %v3363_v2, 0.0 }
 0x4fa   :  { %543 = vadd.xlane.f32.xlu1 %v542_v3 }
 0x50b   :  { %551 = vrot.lane.b32.xlu1 %v3606_v15, %s3436_s30 }
 0x50f   :  { %756 = vrot.lane.b32.xlu1 %v3606_v15, %s4256_s25 }
 0x513   :  { %806 = vrot.lane.b32.xlu1 %v3610_v18, %s4256_s25  ;;  %s4279_s25 = sld [smem:[#allocation10_spill]] }
 0x517   :  { %804 = vrot.lane.b32.xlu1 %v3610_v18, %s3437_s4 }
 0x583   :  { %v541_v4 = vpop.xlane.xlu1 %540 }
 0x584   :  { %3364 = vrcp.f32 %v541_v4 }
 0x587   :  { %v544_v5 = vpop.xlane.xlu1 %543 }
 0x588   :  { %3366 = vrcp.f32 %v544_v5 }
 0x58b   :  { %v552_v9 = vpop.permute.xlu1 %551 }
 0x58c   :  { %v557_v10 = vsel %vm328_vm11, %v552_v9, 0 }
 0x58d   :  { %3098 = vmatpush3.bf16.msra.mxu1 %v557_v10 }
 0x58e   :  { %v3365_v12 = vpop.eup %3364  ;;  %3109 = vmatprep.subr.bf16.mxu1 %v3428_v0 }
 0x58f   :  { %v547_v14 = vmul.f32 %v3365_v12, %v3361_v63  ;;  %v757_v24 = vpop.permute.xlu1 %756 }
 0x590   :  { %v762_v39 = vsel %vm199_vm2, %v757_v24, 0 }
 0x591   :  { %v549_v16 = vpack.c.bf16 %v547_v14, %v547_v14 }
 0x592   :  { %v3367_v20 = vpop.eup %3366 }
 0x593   :  { %v548_v21 = vmul.f32 %v3367_v20, %v3363_v2  ;;  %3100 = vmatmul.mubr.msk.bf16.vlgmr.msra.gmra.mrb[16].mxu1 %vm199_vm2, %v549_v16  ;;  %v807_v25 = vpop.permute.xlu1 %806 }
 0x594   :  { %3110 = vmatpush3.bf16.msra.mxu1 %v659_v19  ;;  %3111 = vmatprep.mubr.msk.bf16.mxu1 %vm3429_vm0, %v3428_v0  ;;  %v812_v26 = vsel %vm199_vm2, %v807_v25, 0 }
 0x595   :  { %v550_v22 = vpack.c.bf16 %v548_v21, %v548_v21  ;;  %3121 = vmatprep.subr.bf16.mxu1 %v3428_v0 }
 0x597   :  { %3106 = vmatmul.mubr.msk.bf16.vlgmr.msra.gmra.mrb[12].mxu0 %vm199_vm2, %v550_v22  ;;  %v805_v28 = vpop.permute.xlu1 %804 }
 0x598   :  { %3116 = vmatpush3.bf16.msra.mxu0 %v711_v23  ;;  %3117 = vmatprep.mubr.msk.bf16.mxu0 %vm3429_vm0, %v3428_v0 }
 0x599   :  { %3127 = vmatprep.subr.bf16.mxu0 %v3428_v0 }
 0x59f   :  { %3118 = vmatmul.mubr.msk.bf16.vlgmr.msra.gmra.mrb[16].mxu0 %vm199_vm2, %v2949_v34 }
 0x5a0   :  { %3129 = vmatprep.mubr.msk.bf16.mxu0 %vm3429_vm0, %v3428_v0 }
 0x5a1   :  { %3128 = vmatpush3.bf16.xpose.msra.mxu0 %v812_v26 }
 0x5a2   :  { %3139 = vmatprep.subr.bf16.mxu0 %v3428_v0 }
 0x5a8   :  { %3130 = vmatmul.mubr.msk.bf16.vlgmr.msra.gmra.mrb[20].mxu0 %vm199_vm2, %v805_v28 }
 0x5a9   :  { %3141 = vmatprep.mubr.msk.bf16.mxu0 %vm3429_vm0, %v3428_v0 }
 0x666   :  { %v593_v31 = vpop.f32.mrb[16].mxu1 }
 0x667   :  { %v3101_v32 = vpop.f32.mrb[17].mxu1 }
 0x668   :  { %v596_v35 = vpop.f32.mrb[18].mxu1 }
 0x669   :  { %v3102_v27 = vpop.f32.mrb[19].mxu1 }
 0x66a   :  { %v641_v33 = vpop.f32.mrb[12].mxu0 }
 0x66b   :  { %v2948_v34 = vpack.c.bf16 %v641_v33, %v593_v31  ;;  %v3107_v37 = vpop.f32.mrb[13].mxu0 }
 0x66c   :  { %v644_v38 = vpop.f32.mrb[14].mxu0  ;;  %v143_v37 = vld [vmem:[%s4275_s0 + $0x10] sm:$0xff] }
 0x66d   :  { %v3108_v40 = vpop.f32.mrb[15].mxu0  ;;  %3112 = vmatmul.mubr.msk.bf16.vlgmr.msra.gmra.mrb[20].mxu1 %vm199_vm2, %v2948_v34  ;;  %v980_v38 = vpack.c.bf16 %v143_v37, %v143_v37 }
 0x66e   :  { %3122 = vmatpush3.bf16.xpose.msra.mxu1 %v762_v39  ;;  %3123 = vmatprep.mubr.msk.bf16.mxu1 %vm3429_vm0, %v3428_v0 }
 0x66f   :  { %3133 = vmatprep.subr.bf16.mxu1 %v3428_v0  ;;  %v990_v39 = vsel %vm328_vm11, %v980_v38, 0 }
 0x672   :  { %v747_v41 = vpop.f32.mrb[16].mxu0 }
 0x673   :  { %v3119_v42 = vpop.f32.mrb[17].mxu0 }
 0x674   :  { %v750_v45 = vpop.f32.mrb[18].mxu0 }
 0x675   :  { %v3120_v46 = vpop.f32.mrb[19].mxu0  ;;  %3124 = vmatmul.mubr.msk.bf16.vlgmr.msra.gmra.mrb[24].mxu1 %vm199_vm2, %v755_v44 }
 0x676   :  { %3135 = vmatprep.mubr.msk.bf16.mxu1 %vm3429_vm0, %v3428_v0 }
 0x67b   :  { %v848_v47 = vpop.f32.mrb[20].mxu0 }
 0x67c   :  { %v855_v48 = vmul.f32 0.35355338, %v848_v47  ;;  %v3131_v49 = vpop.f32.mrb[21].mxu0 }
 0x67d   :  { %v851_v50 = vpop.f32.mrb[22].mxu0 }
 0x67e   :  { %v3132_v52 = vpop.f32.mrb[23].mxu0  ;;  %v857_v53 = vsel %vm3648_vm10, %v855_v48, -1e+09 }
 0x67f   :  { %v861_v54 = vsel %vm199_vm2, %v857_v53, -inf }
 0x680   :  { %862 = vmax.xlane.f32.xlu1 %v861_v54 }
 0x691   :  { %882 = vrot.lane.b32.xlu1 %v3606_v15, %s3439_s28 }
 0x695   :  { %1037 = vrot.lane.b32.xlu1 %v3606_v15, %s4252_s12 }
 0x699   :  { %1087 = vrot.lane.b32.xlu1 %v3610_v18, %s4252_s12 }
 0x69d   :  { %1085 = vrot.lane.b32.xlu1 %v3610_v18, %s4254_s5 }
 0x70d   :  { %v863_v55 = vpop.xlane.xlu1 %862 }
 0x70e   :  { %v865_v58 = vsub.f32 %v857_v53, %v863_v55 }
 0x710   :  { %v868_v59 = vmul.f32 1.442695, %v865_v58 }
 0x711   :  { %v883_v56 = vpop.permute.xlu1 %882 }
 0x712   :  { %v888_v57 = vsel %vm328_vm11, %v883_v56, 0  ;;  %3368 = vpow2.f32 %v868_v59 }
 0x713   :  { %3134 = vmatpush3.bf16.msra.mxu1 %v888_v57 }
 0x714   :  { %3145 = vmatprep.subr.bf16.mxu1 %v3428_v0 }
 0x715   :  { %v1038_v32 = vpop.permute.xlu1 %1037 }
 0x716   :  { %v1043_v27 = vsel %vm199_vm2, %v1038_v32, 0 }
 0x71c   :  { %v3369_v12 = vpop.eup %3368 }
 0x71d   :  { %v873_v13 = vsel %vm199_vm2, %v3369_v12, 0.0 }
 0x740   :  { %v695_v60 = vpop.f32.mrb[20].mxu1 }
 0x741   :  { %v3763_v61 = vadd.f32 %v747_v41, %v695_v60  ;;  %v3113_v62 = vpop.f32.mrb[21].mxu1 }
 0x742   :  { %v698_v63 = vpop.f32.mrb[22].mxu1 }
 0x743   :  { %v3765_v1 = vadd.f32 %v750_v45, %v698_v63  ;;  %v3114_v2 = vpop.f32.mrb[23].mxu1  ;;  %v1088_v45 = vpop.permute.xlu1 %1087 }
 0x744   :  { %v1093_v50 = vsel %vm199_vm2, %v1088_v45, 0 }
 0x747   :  { %v1086_v59 = vpop.permute.xlu1 %1085 }
 0x748   :  { %v798_v3 = vpop.f32.mrb[24].mxu1 }
 0x749   :  { %v854_v4 = vmul.f32 0.35355338, %v798_v3  ;;  %v3125_v5 = vpop.f32.mrb[25].mxu1 }
 0x74a   :  { %v801_v6 = vpop.f32.mrb[26].mxu1 }
 0x74b   :  { %v3126_v9 = vpop.f32.mrb[27].mxu1  ;;  %v856_v10 = vsel %vm3641_vm8, %v854_v4, -1e+09 }
 0x74c   :  { %v858_v11 = vsel %vm199_vm2, %v856_v10, -inf }
 0x74d   :  { %859 = vmax.xlane.f32.xlu0 %v858_v11 }
 0x751   :  { %874 = vadd.xlane.f32.xlu0 %v873_v13 }
 0x7da   :  { %v860_v14 = vpop.xlane.xlu0 %859 }
 0x7db   :  { %v864_v16 = vsub.f32 %v856_v10, %v860_v14 }
 0x7dd   :  { %v866_v17 = vmul.f32 1.442695, %v864_v16 }
 0x7de   :  { %v875_v21 = vpop.xlane.xlu0 %874 }
 0x7df   :  { %3370 = vpow2.f32 %v866_v17 }
 0x7e0   :  { %3372 = vrcp.f32 %v875_v21 }
 0x7e9   :  { %v3371_v19 = vpop.eup %3370 }
 0x7ea   :  { %v870_v20 = vsel %vm199_vm2, %v3371_v19, 0.0  ;;  %v3373_v22 = vpop.eup %3372 }
 0x7eb   :  { %871 = vadd.xlane.f32.xlu0 %v870_v20  ;;  %v879_v24 = vmul.f32 %v3373_v22, %v3369_v12 }
 0x7ed   :  { %v881_v28 = vpack.c.bf16 %v879_v24, %v879_v24 }
 0x801   :  { %930 = vrot.lane.b32.xlu0 %v3610_v18, %s3439_s28  ;;  %s4276_s28 = sld [smem:[#allocation7_spill]] }
 0x805   :  { %1035 = vrot.lane.b32.xlu0 %v3606_v15, %s4254_s5  ;;  %s4278_s5 = sld [smem:[#allocation9_spill]] }
 0x878   :  { %v872_v23 = vpop.xlane.xlu0 %871 }
 0x879   :  { %3374 = vrcp.f32 %v872_v23 }
 0x87c   :  { %v931_v25 = vpop.permute.xlu0 %930 }
 0x87d   :  { %v936_v26 = vsel %vm328_vm11, %v931_v25, 0 }
 0x87e   :  { %3140 = vmatpush3.bf16.msra.mxu0 %v936_v26 }
 0x87f   :  { %3151 = vmatprep.subr.bf16.mxu0 %v3428_v0 }
 0x880   :  { %v1036_v34 = vpop.permute.xlu0 %1035 }
 0x881   :  { %3142 = vmatmul.mubr.msk.bf16.vlgmr.msra.gmra.mrb[24].mxu0 %vm199_vm2, %v881_v28 }
 0x882   :  { %3153 = vmatprep.mubr.msk.bf16.mxu0 %vm3429_vm0, %v3428_v0 }
 0x883   :  { %v3375_v31 = vpop.eup %3374 }
 0x884   :  { %v878_v35 = vmul.f32 %v3375_v31, %v3371_v19  ;;  %v144_v31 = vld [vmem:[%s4275_s0 + $0x18] sm:$0xff] }
 0x885   :  { %v1261_v32 = vpack.c.bf16 %v144_v31, %v144_v31 }
 0x886   :  { %v880_v33 = vpack.c.bf16 %v878_v35, %v878_v35 }
 0x887   :  { %3152 = vmatpush3.bf16.xpose.msra.mxu0 %v1043_v27  ;;  %v1271_v35 = vsel %vm328_vm11, %v1261_v32, 0 }
 0x888   :  { %3136 = vmatmul.mubr.msk.bf16.vlgmr.msra.gmra.mrb[28].mxu1 %vm199_vm2, %v880_v33  ;;  %3163 = vmatprep.subr.bf16.mxu0 %v3428_v0 }
 0x889   :  { %3147 = vmatprep.mubr.msk.bf16.mxu1 %vm3429_vm0, %v3428_v0  ;;  %3146 = vmatpush3.bf16.msra.mxu1 %v990_v39 }
 0x88a   :  { %3157 = vmatprep.subr.bf16.mxu1 %v3428_v0 }
 0x88e   :  { %3154 = vmatmul.mubr.msk.bf16.vlgmr.msra.gmra.mrb[28].mxu0 %vm199_vm2, %v1036_v34 }
 0x88f   :  { %3165 = vmatprep.mubr.msk.bf16.mxu0 %vm3429_vm0, %v3428_v0 }
 0x954   :  { %v972_v40 = vpop.f32.mrb[24].mxu0 }
 0x955   :  { %v3143_v41 = vpop.f32.mrb[25].mxu0 }
 0x956   :  { %v975_v42 = vpop.f32.mrb[26].mxu0 }
 0x957   :  { %v3144_v44 = vpop.f32.mrb[27].mxu0 }
 0x95b   :  { %v924_v46 = vpop.f32.mrb[28].mxu1 }
 0x95c   :  { %v2950_v47 = vpack.c.bf16 %v972_v40, %v924_v46  ;;  %v3137_v48 = vpop.f32.mrb[29].mxu1 }
 0x95d   :  { %v927_v49 = vpop.f32.mrb[30].mxu1 }
 0x95e   :  { %v3138_v52 = vpop.f32.mrb[31].mxu1  ;;  %3148 = vmatmul.mubr.msk.bf16.vlgmr.msra.gmra.mrb[32].mxu1 %vm199_vm2, %v2950_v47  ;;  %v2908_v49 = vld [vmem:[%s4276_s28] ss:$0 sm:$0xff] }
 0x95f   :  { %3158 = vmatpush3.bf16.xpose.msra.mxu1 %v1093_v50  ;;  %3159 = vmatprep.mubr.msk.bf16.mxu1 %vm3429_vm0, %v3428_v0 }
 0x960   :  { %3169 = vmatprep.subr.bf16.mxu1 %v3428_v0 }
 0x961   :  { %v1079_v53 = vpop.f32.mrb[28].mxu0 }
 0x962   :  { %v1135_v54 = vmul.f32 0.35355338, %v1079_v53  ;;  %v3155_v55 = vpop.f32.mrb[29].mxu0 }
 0x963   :  { %v1082_v56 = vpop.f32.mrb[30].mxu0 }
 0x964   :  { %v3156_v57 = vpop.f32.mrb[31].mxu0  ;;  %v1137_v58 = vsel %vm3641_vm8, %v1135_v54, -1e+09 }
 0x965   :  { %v1139_v60 = vsel %vm199_vm2, %v1137_v58, -inf }
 0x966   :  { %1140 = vmax.xlane.f32.xlu0 %v1139_v60  ;;  %3160 = vmatmul.mubr.msk.bf16.vlgmr.msra.gmra.mrb[36].mxu1 %vm199_vm2, %v1086_v59 }
 0x967   :  { %3171 = vmatprep.mubr.msk.bf16.mxu1 %vm3429_vm0, %v3428_v0 }
 0x9f3   :  { %v1141_v62 = vpop.xlane.xlu0 %1140 }
 0x9f4   :  { %v1145_v63 = vsub.f32 %v1137_v58, %v1141_v62 }
 0x9f6   :  { %v1147_v2 = vmul.f32 1.442695, %v1145_v63 }
 0x9f8   :  { %3376 = vpow2.f32 %v1147_v2 }
 0xa02   :  { %v3377_v3 = vpop.eup %3376 }
 0xa03   :  { %v1151_v4 = vsel %vm199_vm2, %v3377_v3, 0.0 }
 0xa04   :  { %1152 = vadd.xlane.f32.xlu0 %v1151_v4 }
 0xa31   :  { %v1026_v5 = vpop.f32.mrb[32].mxu1 }
 0xa32   :  { %v3807_v43 = vadd.f32 %v1026_v5, %v3763_v61  ;;  %v3149_v6 = vpop.f32.mrb[33].mxu1 }
 0xa33   :  { %v1029_v9 = vpop.f32.mrb[34].mxu1 }
 0xa34   :  { %v3810_v10 = vadd.f32 %v1029_v9, %v3765_v1  ;;  %v3150_v11 = vpop.f32.mrb[35].mxu1 }
 0xa39   :  { %v1129_v12 = vpop.f32.mrb[36].mxu1 }
 0xa3a   :  { %v1136_v13 = vmul.f32 0.35355338, %v1129_v12  ;;  %v3161_v14 = vpop.f32.mrb[37].mxu1 }
 0xa3b   :  { %v1132_v16 = vpop.f32.mrb[38].mxu1 }
 0xa3c   :  { %v3162_v17 = vpop.f32.mrb[39].mxu1  ;;  %v1138_v19 = vsel %vm3648_vm10, %v1136_v13, -1e+09 }
 0xa3d   :  { %v1142_v20 = vsel %vm199_vm2, %v1138_v19, -inf }
 0xa3e   :  { %1143 = vmax.xlane.f32.xlu1 %v1142_v20  ;;  %v81_v20 = vld [vmem:[%s4278_s5 + $0x8] sm:$0xff] }
 0xa4f   :  { %1163 = vrot.lane.b32.xlu1 %v3606_v15, %s3442_s10 }
 0xa91   :  { %v1153_v61 = vpop.xlane.xlu0 %1152 }
 0xa92   :  { %3378 = vrcp.f32 %v1153_v61 }
 0xa9c   :  { %v3379_v21 = vpop.eup %3378 }
 0xa9d   :  { %v1159_v23 = vmul.f32 %v3379_v21, %v3377_v3  ;;  %v1371_v21 = vld [vmem:[%s4279_s25] sm:$0xff] }
 0xa9f   :  { %v1161_v51 = vpack.c.bf16 %v1159_v23, %v1159_v23  ;;  %v1373_v23 = vld [vmem:[%s4279_s25 + $0x10] sm:$0xff] }
 0xacb   :  { %v1144_v1 = vpop.xlane.xlu1 %1143 }
 0xacc   :  { %v1146_v22 = vsub.f32 %v1138_v19, %v1144_v1  ;;  %v80_v19 = vld [vmem:[%s4278_s5] sm:$0xff]  ;;  %v1372_v1 = vld [vmem:[%s4279_s25 + $0x8] sm:$0xff] }
 0xacd   :  { %v1434_v61 = vpack.c.bf16 %v81_v20, %v80_v19 }
 0xace   :  { %v1149_v24 = vmul.f32 1.442695, %v1146_v22  ;;  %v1377_v22 = vpack.c.bf16 %v1372_v1, %v1371_v21 }
 0xacf   :  { %v1164_v25 = vpop.permute.xlu1 %1163 }
 0xad0   :  { %3380 = vpow2.f32 %v1149_v24  ;;  %v1169_v26 = vsel %vm328_vm11, %v1164_v25, 0  ;;  %v1374_v24 = vld [vmem:[%s4279_s25 + $0x18] sm:$0xff] }
 0xad1   :  { %3164 = vmatpush3.bf16.msra.mxu0 %v1169_v26  ;;  %v1378_v25 = vpack.c.bf16 %v1374_v24, %v1373_v23 }
 0xad2   :  { %3175 = vmatprep.subr.bf16.mxu0 %v3428_v0 }
 0xad4   :  { %3166 = vmatmul.mubr.msk.bf16.vlgmr.msra.gmra.mrb[32].mxu0 %vm199_vm2, %v1161_v51 }
 0xad5   :  { %3177 = vmatprep.mubr.msk.bf16.mxu0 %vm3429_vm0, %v3428_v0  ;;  %3176 = vmatpush3.bf16.msra.mxu0 %v1271_v35 }
 0xad6   :  { %3189 = vmatprep.subr.bf16.mxu0 %v3428_v0 }
 0xada   :  { %v3381_v15 = vpop.eup %3380 }
 0xadb   :  { %v1154_v28 = vsel %vm199_vm2, %v3381_v15, 0.0 }
 0xadc   :  { %1155 = vadd.xlane.f32.xlu0 %v1154_v28 }
 0xaf2   :  { %1211 = vrot.lane.b32.xlu0 %v3610_v18, %s3442_s10  ;;  %s4277_s10 = sld [smem:[#allocation8_spill]] }
 0xaf8   :  { %v1430_v12 = vld [vmem:[%s4277_s10 + $0x8] sm:$0xff]  ;;  %v1431_v14 = vld [vmem:[%s4277_s10 + $0x10] sm:$0xff]  ;;  %v1432_v16 = vld [vmem:[%s4277_s10 + $0x18] sm:$0xff] }
 0xaf9   :  { %v1436_v17 = vpack.c.bf16 %v1432_v16, %v1431_v14 }
 0xb69   :  { %v1156_v27 = vpop.xlane.xlu0 %1155 }
 0xb6a   :  { %3382 = vrcp.f32 %v1156_v27  ;;  %v2909_v27 = vld [vmem:[%s4230_s8] ss:$0 sm:$0xff] }
 0xb6d   :  { %v1212_v33 = vpop.permute.xlu0 %1211 }
 0xb6e   :  { %v1217_v34 = vsel %vm328_vm11, %v1212_v33, 0 }
 0xb6f   :  { %3170 = vmatpush3.bf16.msra.mxu1 %v1217_v34 }
 0xb70   :  { %3181 = vmatprep.subr.bf16.mxu1 %v3428_v0 }
 0xb74   :  { %v3383_v37 = vpop.eup %3382 }
 0xb75   :  { %v1160_v18 = vmul.f32 %v3383_v37, %v3381_v15 }
 0xb77   :  { %v1162_v38 = vpack.c.bf16 %v1160_v18, %v1160_v18 }
 0xb79   :  { %3172 = vmatmul.mubr.msk.bf16.vlgmr.msra.gmra.mrb[40].mxu1 %vm199_vm2, %v1162_v38  ;;  %v2910_v38 = vld [vmem:[%s4231_s9] ss:$0 sm:$0xff] }
 0xb7a   :  { %3185 = vmatprep.mubr.msk.bf16.mxu1 %vm3429_vm0, %v3428_v0  ;;  %3182 = vmatpush3.bf16.msra.mxu1 %v1377_v22 }
 0xb7b   :  { %3183 = vmatprep.subr.bf16.mxu1 %v3428_v0 }
 0xb7e   :  { %3184 = vmatpush3.bf16.msra.mxu1 %v1378_v25 }
 0xb7f   :  { %3197 = vmatprep.subr.bf16.mxu1 %v3428_v0 }
 0xba7   :  { %v1205_v39 = vpop.f32.mrb[32].mxu0 }
 0xba8   :  { %v3167_v40 = vpop.f32.mrb[33].mxu0 }
 0xba9   :  { %v1208_v41 = vpop.f32.mrb[34].mxu0 }
 0xbaa   :  { %v3168_v42 = vpop.f32.mrb[35].mxu0 }
 0xc4c   :  { %v1253_v44 = vpop.f32.mrb[40].mxu1 }
 0xc4d   :  { %v2951_v45 = vpack.c.bf16 %v1253_v44, %v1205_v39  ;;  %v3173_v46 = vpop.f32.mrb[41].mxu1  ;;  %v2913_v44 = vld [vmem:[%s4232_s13] ss:$0 sm:$0xff] }
 0xc4e   :  { %v1256_v47 = vpop.f32.mrb[42].mxu1 }
 0xc4f   :  { %v3174_v48 = vpop.f32.mrb[43].mxu1  ;;  %3178 = vmatmul.mubr.msk.bf16.vlgmr.msra.gmra.mrb[36].mxu0 %vm199_vm2, %v2951_v45 }
 0xc50   :  { %3193 = vmatprep.mubr.msk.bf16.mxu0 %vm3429_vm0, %v3428_v0 }
 0xd22   :  { %v1307_v50 = vpop.f32.mrb[36].mxu0 }
 0xd23   :  { %v1314_v52 = vadd.f32 %v1307_v50, %v3807_v43  ;;  %v3179_v53 = vpop.f32.mrb[37].mxu0 }
 0xd24   :  { %v1310_v54 = vpop.f32.mrb[38].mxu0 }
 0xd25   :  { %v1322_v55 = vadd.f32 %v2908_v49, %v1314_v52  ;;  %v1315_v56 = vadd.f32 %v1310_v54, %v3810_v10  ;;  %v3180_v57 = vpop.f32.mrb[39].mxu0 }
 0xd27   :  { %v1323_v58 = vadd.f32 %v2908_v49, %v1315_v56  ;;  %v1324_v59 = vadd.f32 %v1322_v55, %v3589_v7  ;;  %v2911_v56 = vld [vmem:[%s4233_s11] ss:$0 sm:$0xff] }
 0xd29   :  { %v1328_v60 = vsel %vm96_vm1, %v1324_v59, 0.0  ;;  %v1325_v62 = vadd.f32 %v1323_v58, %v3594_v8  ;;  %v1429_v8 = vld [vmem:[%s4277_s10] sm:$0xff]  ;;  %s4285_s10 = smov 104  }
 0xd2a   :  { %1329 = vadd.xlane.f32.xlu1 %v1328_v60  ;;  %v1435_v13 = vpack.c.bf16 %v1430_v12, %v1429_v8 }
 0xd2b   :  { %v1331_v63 = vsel %vm96_vm1, %v1325_v62, 0.0 }
 0xd2c   :  { %1332 = vadd.xlane.f32.xlu0 %v1331_v63  ;;  %3190 = vmatpush3.bf16.msra.mxu0 %v1435_v13 }
 0xd2d   :  { %3191 = vmatprep.subr.bf16.mxu0 %v3428_v0 }
 0xd30   :  { %3192 = vmatpush3.bf16.msra.mxu0 %v1436_v17 }
 0xd31   :  { %3203 = vmatprep.subr.bf16.mxu0 %v3428_v0 }
 0xd33   :  { %3194 = vmatmul.mubr.msk.bf16.vlgmr.msra.gmra.mrb[40].mxu0 %vm96_vm1, %v1434_v61 }
 0xd34   :  { %3205 = vmatprep.mubr.msk.bf16.mxu0 %vm3429_vm0, %v3428_v0 }
 0xdb7   :  { %v1330_v2 = vpop.xlane.xlu1 %1329 }
 0xdb8   :  { %v1335_v3 = vmul.f32 0.03125, %v1330_v2 }
 0xdb9   :  { %v1333_v4 = vpop.xlane.xlu0 %1332 }
 0xdba   :  { %v1337_v5 = vsub.f32 %v1324_v59, %v1335_v3  ;;  %v1336_v43 = vmul.f32 0.03125, %v1333_v4  ;;  %v1492_v4 = vld [vmem:[%s4234_s3] sm:$0x3] }
 0xdbb   :  { %vm1493_vm12 = vcmp.gt.s32.totalorder %v1492_v4, 0 }
 0xdbc   :  { %v1338_v6 = vsub.f32 %v1325_v62, %v1336_v43  ;;  %v1339_v9 = vmul.f32 %v1337_v5, %v1337_v5 }
 0xdbe   :  { %v1341_v10 = vsel %vm96_vm1, %v1339_v9, 0.0  ;;  %v1340_v11 = vmul.f32 %v1338_v6, %v1338_v6 }
 0xdbf   :  { %1342 = vadd.xlane.f32.xlu1 %v1341_v10 }
 0xdc0   :  { %v1344_v7 = vsel %vm96_vm1, %v1340_v11, 0.0 }
 0xdc1   :  { %1345 = vadd.xlane.f32.xlu0 %v1344_v7 }
 0xe06   :  { %v1480_v45 = vpop.f32.mrb[40].mxu0 }
 0xe07   :  { %v1481_v46 = vadd.f32 %v2913_v44, %v1480_v45  ;;  %v3195_v47 = vpop.f32.mrb[41].mxu0 }
 0xe08   :  { %v1483_v48 = vpop.f32.mrb[42].mxu0 }
 0xe09   :  { %v3902_v49 = vpack.c.bf16 %v1481_v46, %v1481_v46  ;;  %v1484_v50 = vadd.f32 %v2913_v44, %v1483_v48  ;;  %v3196_v52 = vpop.f32.mrb[43].mxu0 }
 0xe0b   :  { %v3904_v53 = vpack.c.bf16 %v1484_v50, %v1484_v50  ;;  %v1539_v54 = vsel %vm199_vm2, %v3902_v49, 0 }
 0xe0d   :  { %v1585_v55 = vsel %vm199_vm2, %v3904_v53, 0 }
 0xe0e   :  { %3204 = vmatpush3.bf16.xpose.msra.mxu0 %v1585_v55 }
 0xe0f   :  { %3215 = vmatprep.subr.bf16.mxu0 %v3428_v0 }
 0xe4c   :  { %v1343_v26 = vpop.xlane.xlu1 %1342 }
 0xe4d   :  { %v1347_v51 = vmul.f32 0.03125, %v1343_v26 }
 0xe4e   :  { %v1346_v15 = vpop.xlane.xlu0 %1345 }
 0xe4f   :  { %v1349_v28 = vadd.f32 1e-05, %v1347_v51  ;;  %v1348_v31 = vmul.f32 0.03125, %v1346_v15 }
 0xe51   :  { %3384 = vrsqrt.f32 %v1349_v28  ;;  %v1350_v32 = vadd.f32 1e-05, %v1348_v31 }
 0xe53   :  { %3386 = vrsqrt.f32 %v1350_v32 }
 0xe5b   :  { %v3385_v35 = vpop.eup %3384 }
 0xe5c   :  { %v1353_v33 = vmul.f32 %v3385_v35, %v1337_v5  ;;  %v1494_v5 = vsel %vm1493_vm12, 1, %v3432_v30 }
 0xe5d   :  { %v3387_v34 = vpop.eup %3386  ;;  %v1501_v43 = vrot.slane %v1494_v5, %v3629_v29 }
 0xe5e   :  { %v1361_v37 = vmul.f32 %v2909_v27, %v1353_v33  ;;  %v1354_v18 = vmul.f32 %v3387_v34, %v1338_v6 }
 0xe5f   :  { %v1502_v6 = vcombine.high %v1501_v43, %v1501_v43  ;;  %v1509_v9 = vrot.slane %v1501_v43, %v3629_v29 }
 0xe60   :  { %v1362_v39 = vmul.f32 %v2909_v27, %v1354_v18  ;;  %v3890_v40 = vadd.f32 %v2910_v38, %v1361_v37 }
 0xe61   :  { %v1516_v10 = vrot.slane %v1502_v6, %v3629_v29  ;;  %vm1517_vm13 = vcmp.ne.s32.totalorder %v1509_v9, 0 }
 0xe62   :  { %v3892_v41 = vadd.f32 %v2910_v38, %v1362_v39  ;;  %v1519_v11 = vsel %vm1517_vm13, 1, %v3432_v30 }
 0xe63   :  { %vm1518_vm14 = vcmp.ne.s32.totalorder %v1516_v10, 0  ;;  %v1524_v8 = vrot.slane %v1519_v11, %v3635_v36 }
 0xe64   :  { %v1376_v42 = vpack.c.bf16 %v3892_v41, %v3890_v40  ;;  %v1520_v7 = vsel %vm1518_vm14, 1, %v3432_v30 }
 0xe65   :  { %v1528_v12 = vrot.slane %v1520_v7, %v3635_v36  ;;  %vm3938_vm15 = vcmp.eq.s32.totalorder %v1524_v8, 1 }
 0xe66   :  { %3186 = vmatmul.mubr.msk.bf16.vlgmr.msra.gmra.mrb[44].mxu1 %vm96_vm1, %v1376_v42 }
 0xe67   :  { %3199 = vmatprep.mubr.msk.bf16.mxu1 %vm3429_vm0, %v3428_v0  ;;  %3198 = vmatpush3.bf16.xpose.msra.mxu1 %v1539_v54  ;;  %vm3942_vm3 = vcmp.eq.s32.totalorder %v1528_v12, 1 }
 0xe68   :  { %3209 = vmatprep.subr.bf16.mxu1 %v3428_v0 }
 0xf39   :  { %v1422_v57 = vpop.f32.mrb[44].mxu1 }
 0xf3a   :  { %v1423_v58 = vadd.f32 %v2911_v56, %v1422_v57  ;;  %v3187_v59 = vpop.f32.mrb[45].mxu1 }
 0xf3b   :  { %v1425_v60 = vpop.f32.mrb[46].mxu1 }
 0xf3c   :  { %v3915_v62 = vpack.c.bf16 %v1423_v58, %v1423_v58  ;;  %v1426_v63 = vadd.f32 %v2911_v56, %v1425_v60  ;;  %v3188_v2 = vpop.f32.mrb[47].mxu1 }
 0xf3e   :  { %v3917_v3 = vpack.c.bf16 %v1426_v63, %v1426_v63  ;;  %3200 = vmatmul.mubr.msk.bf16.vlgmr.msra.gmra.mrb[48].mxu1 %vm199_vm2, %v3915_v62 }
 0xf3f   :  { %3211 = vmatprep.mubr.msk.bf16.mxu1 %vm3429_vm0, %v3428_v0 }
 0xf40   :  { %3206 = vmatmul.mubr.msk.bf16.vlgmr.msra.gmra.mrb[44].mxu0 %vm199_vm2, %v3917_v3 }
 0xf41   :  { %3217 = vmatprep.mubr.msk.bf16.mxu0 %vm3429_vm0, %v3428_v0 }
0x1011   :  { %v1575_v13 = vpop.f32.mrb[48].mxu1 }
0x1012   :  { %v1627_v16 = vmul.f32 0.35355338, %v1575_v13  ;;  %v3201_v17 = vpop.f32.mrb[49].mxu1 }
0x1013   :  { %v1578_v19 = vpop.f32.mrb[50].mxu1  ;;  %v1621_v20 = vpop.f32.mrb[44].mxu0 }
0x1014   :  { %v1628_v61 = vmul.f32 0.35355338, %v1621_v20  ;;  %v3202_v21 = vpop.f32.mrb[51].mxu1  ;;  %v3207_v30 = vpop.f32.mrb[45].mxu0  ;;  %v1629_v1 = vsel %vm3938_vm15, %v1627_v16, -1e+09 }
0x1015   :  { %v1624_v36 = vpop.f32.mrb[46].mxu0  ;;  %v1631_v22 = vsel %vm199_vm2, %v1629_v1, -inf }
0x1016   :  { %v3208_v23 = vpop.f32.mrb[47].mxu0  ;;  %1632 = vmax.xlane.f32.xlu1 %v1631_v22  ;;  %v1630_v24 = vsel %vm3942_vm3, %v1628_v61, -1e+09 }
0x1017   :  { %v1634_v25 = vsel %vm199_vm2, %v1630_v24, -inf }
0x1018   :  { %1635 = vmax.xlane.f32.xlu0 %v1634_v25 }
0x1027   :  { %1656 = vrot.lane.b32.xlu1 %v3902_v49, %s3430_s27 }
0x10a3   :  { %v1633_v26 = vpop.xlane.xlu1 %1632 }
0x10a4   :  { %v1637_v51 = vsub.f32 %v1629_v1, %v1633_v26 }
0x10a5   :  { %v1636_v15 = vpop.xlane.xlu0 %1635 }
0x10a6   :  { %v1639_v28 = vmul.f32 1.442695, %v1637_v51  ;;  %v1638_v31 = vsub.f32 %v1630_v24, %v1636_v15 }
0x10a7   :  { %v1657_v32 = vpop.permute.xlu1 %1656 }
0x10a8   :  { %3388 = vpow2.f32 %v1639_v28  ;;  %v1641_v35 = vmul.f32 1.442695, %v1638_v31  ;;  %v1662_v27 = vsel %vm328_vm11, %v1657_v32, 0 }
0x10a9   :  { %3210 = vmatpush3.bf16.msra.mxu1 %v1662_v27 }
0x10aa   :  { %3390 = vpow2.f32 %v1641_v35  ;;  %3221 = vmatprep.subr.bf16.mxu1 %v3428_v0 }
0x10b2   :  { %v3389_v33 = vpop.eup %3388 }
0x10b3   :  { %v1643_v34 = vsel %vm199_vm2, %v3389_v33, 0.0 }
0x10b4   :  { %v3391_v37 = vpop.eup %3390  ;;  %1644 = vadd.xlane.f32.xlu1 %v1643_v34 }
0x10b5   :  { %v1646_v18 = vsel %vm199_vm2, %v3391_v37, 0.0 }
0x10b6   :  { %1647 = vadd.xlane.f32.xlu0 %v1646_v18 }
0x10c5   :  { %1759 = vrot.lane.b32.xlu1 %v3902_v49, %s3435_s2 }
0x10c9   :  { %1810 = vrot.lane.b32.xlu1 %v3904_v53, %s3435_s2 }
0x10cc   :  { %1705 = vrot.lane.b32.xlu0 %v3904_v53, %s3430_s27 }
0x10cd   :  { %1808 = vrot.lane.b32.xlu1 %v3917_v3, %s3435_s2 }
0x10d0   :  { %1757 = vrot.lane.b32.xlu0 %v3915_v62, %s3435_s2 }
0x1141   :  { %v1645_v38 = vpop.xlane.xlu1 %1644 }
0x1142   :  { %3392 = vrcp.f32 %v1645_v38 }
0x1143   :  { %v1648_v39 = vpop.xlane.xlu0 %1647 }
0x1144   :  { %3394 = vrcp.f32 %v1648_v39 }
0x1145   :  { %v1760_v45 = vpop.permute.xlu1 %1759 }
0x1146   :  { %v1765_v55 = vsel %vm199_vm2, %v1760_v45, 0 }
0x1147   :  { %v1706_v42 = vpop.permute.xlu0 %1705 }
0x1148   :  { %v1711_v44 = vsel %vm328_vm11, %v1706_v42, 0 }
0x1149   :  { %3216 = vmatpush3.bf16.msra.mxu0 %v1711_v44  ;;  %v1811_v54 = vpop.permute.xlu1 %1810  ;;  %v1487_v44 = vld [vmem:[%s4235_s14] sm:$0xff] }
0x114a   :  { %3227 = vmatprep.subr.bf16.mxu0 %v3428_v0  ;;  %v1816_v57 = vsel %vm199_vm2, %v1811_v54, 0 }
0x114b   :  { %v1758_v58 = vpop.permute.xlu0 %1757 }
0x114c   :  { %v3393_v46 = vpop.eup %3392 }
0x114d   :  { %v1651_v47 = vmul.f32 %v3393_v46, %v3389_v33  ;;  %v1809_v59 = vpop.permute.xlu1 %1808 }
0x114e   :  { %v3395_v48 = vpop.eup %3394 }
0x114f   :  { %v1652_v50 = vmul.f32 %v3395_v48, %v3391_v37  ;;  %v1653_v52 = vpack.c.bf16 %v1651_v47, %v1651_v47  ;;  %v1488_v37 = vld [vmem:[%s4235_s14 + $0x8] sm:$0xff]  ;;  %v1755_v47 = vpack.c.bf16 %v1487_v44, %v1487_v44 }
0x1150   :  { %v1984_v39 = vpack.c.bf16 %v1488_v37, %v1488_v37 }
0x1151   :  { %3212 = vmatmul.mubr.msk.bf16.vlgmr.msra.gmra.mrb[52].mxu1 %vm199_vm2, %v1653_v52  ;;  %v1654_v56 = vpack.c.bf16 %v1652_v50, %v1652_v50 }
0x1152   :  { %3222 = vmatpush3.bf16.xpose.msra.mxu1 %v1765_v55  ;;  %3223 = vmatprep.mubr.msk.bf16.mxu1 %vm3429_vm0, %v3428_v0  ;;  %v1994_v48 = vsel %vm328_vm11, %v1984_v39, 0  ;;  %v2046_v55 = vsel %vm328_vm11, %v1755_v47, 0 }
0x1153   :  { %3218 = vmatmul.mubr.msk.bf16.vlgmr.msra.gmra.mrb[48].mxu0 %vm199_vm2, %v1654_v56  ;;  %3233 = vmatprep.subr.bf16.mxu1 %v3428_v0 }
0x1154   :  { %3228 = vmatpush3.bf16.xpose.msra.mxu0 %v1816_v57  ;;  %3229 = vmatprep.mubr.msk.bf16.mxu0 %vm3429_vm0, %v3428_v0 }
0x1155   :  { %3239 = vmatprep.subr.bf16.mxu0 %v3428_v0 }
0x1159   :  { %3224 = vmatmul.mubr.msk.bf16.vlgmr.msra.gmra.mrb[56].mxu1 %vm199_vm2, %v1758_v58 }
0x115a   :  { %3235 = vmatprep.mubr.msk.bf16.mxu1 %vm3429_vm0, %v3428_v0 }
0x115b   :  { %3230 = vmatmul.mubr.msk.bf16.vlgmr.msra.gmra.mrb[52].mxu0 %vm199_vm2, %v1809_v59 }
0x115c   :  { %3241 = vmatprep.mubr.msk.bf16.mxu0 %vm3429_vm0, %v3428_v0 }
0x1224   :  { %v3986_v60 = vpop.f32.mrb[52].mxu1 }
0x1225   :  { %v3213_v63 = vpop.f32.mrb[53].mxu1 }
0x1226   :  { %v1701_v2 = vpop.f32.mrb[54].mxu1  ;;  %v3988_v4 = vpop.f32.mrb[48].mxu0 }
0x1227   :  { %v2953_v5 = vpack.c.bf16 %v3988_v4, %v3986_v60  ;;  %v3214_v43 = vpop.f32.mrb[55].mxu1  ;;  %v3219_v6 = vpop.f32.mrb[49].mxu0 }
0x1228   :  { %v1750_v9 = vpop.f32.mrb[50].mxu0 }
0x1229   :  { %v3220_v10 = vpop.f32.mrb[51].mxu0 }
0x122c   :  { %v1801_v11 = vpop.f32.mrb[56].mxu1 }
0x122d   :  { %v1858_v7 = vmul.f32 0.35355338, %v1801_v11  ;;  %v3225_v8 = vpop.f32.mrb[57].mxu1 }
0x122e   :  { %v1804_v12 = vpop.f32.mrb[58].mxu1  ;;  %v1852_v13 = vpop.f32.mrb[52].mxu0 }
0x122f   :  { %v1859_v16 = vmul.f32 0.35355338, %v1852_v13  ;;  %v3226_v17 = vpop.f32.mrb[59].mxu1  ;;  %v3231_v19 = vpop.f32.mrb[53].mxu0  ;;  %v1860_v20 = vsel %vm3938_vm15, %v1858_v7, -1e+09 }
0x1230   :  { %v1855_v61 = vpop.f32.mrb[54].mxu0  ;;  %v1862_v21 = vsel %vm199_vm2, %v1860_v20, -inf }
0x1231   :  { %v3232_v30 = vpop.f32.mrb[55].mxu0  ;;  %1863 = vmax.xlane.f32.xlu0 %v1862_v21  ;;  %v1861_v1 = vsel %vm3942_vm3, %v1859_v16, -1e+09 }
0x1232   :  { %v1865_v36 = vsel %vm199_vm2, %v1861_v1, -inf }
0x1233   :  { %1866 = vmax.xlane.f32.xlu1 %v1865_v36 }
0x1244   :  { %1886 = vrot.lane.b32.xlu1 %v3902_v49, %s3434_s29 }
0x1248   :  { %2091 = vrot.lane.b32.xlu1 %v3902_v49, %s3437_s4 }
0x124c   :  { %2141 = vrot.lane.b32.xlu1 %v3904_v53, %s3437_s4 }
0x1250   :  { %2139 = vrot.lane.b32.xlu1 %v3917_v3, %s3437_s4 }
0x12be   :  { %v1864_v22 = vpop.xlane.xlu0 %1863 }
0x12bf   :  { %v1868_v23 = vsub.f32 %v1860_v20, %v1864_v22 }
0x12c0   :  { %v1867_v24 = vpop.xlane.xlu1 %1866 }
0x12c1   :  { %v1870_v25 = vmul.f32 1.442695, %v1868_v23  ;;  %v1869_v26 = vsub.f32 %v1861_v1, %v1867_v24 }
0x12c3   :  { %3396 = vpow2.f32 %v1870_v25  ;;  %v1872_v51 = vmul.f32 1.442695, %v1869_v26 }
0x12c4   :  { %v1887_v15 = vpop.permute.xlu1 %1886 }
0x12c5   :  { %3398 = vpow2.f32 %v1872_v51  ;;  %v1892_v28 = vsel %vm328_vm11, %v1887_v15, 0 }
0x12c6   :  { %3234 = vmatpush3.bf16.msra.mxu1 %v1892_v28 }
0x12c7   :  { %3245 = vmatprep.subr.bf16.mxu1 %v3428_v0 }
0x12c8   :  { %v2092_v56 = vpop.permute.xlu1 %2091 }
0x12c9   :  { %v2097_v10 = vsel %vm199_vm2, %v2092_v56, 0 }
0x12cc   :  { %v2142_v57 = vpop.permute.xlu1 %2141 }
0x12cd   :  { %v3397_v31 = vpop.eup %3396  ;;  %v2147_v58 = vsel %vm199_vm2, %v2142_v57, 0 }
0x12ce   :  { %v1874_v32 = vsel %vm199_vm2, %v3397_v31, 0.0 }
0x12cf   :  { %v3399_v35 = vpop.eup %3398  ;;  %1875 = vadd.xlane.f32.xlu0 %v1874_v32 }
0x12d0   :  { %v1877_v27 = vsel %vm199_vm2, %v3399_v35, 0.0  ;;  %v2140_v59 = vpop.permute.xlu1 %2139 }
0x12d3   :  { %1878 = vadd.xlane.f32.xlu0 %v1877_v27 }
0x12e9   :  { %1934 = vrot.lane.b32.xlu0 %v3904_v53, %s3434_s29 }
0x12ed   :  { %2089 = vrot.lane.b32.xlu0 %v3915_v62, %s3437_s4  ;;  %s4284_s4 = smov 80  }
0x135c   :  { %v1876_v33 = vpop.xlane.xlu0 %1875 }
0x135d   :  { %3400 = vrcp.f32 %v1876_v33 }
0x1360   :  { %v1879_v34 = vpop.xlane.xlu0 %1878 }
0x1361   :  { %3402 = vrcp.f32 %v1879_v34 }
0x1364   :  { %v1935_v18 = vpop.permute.xlu0 %1934 }
0x1365   :  { %v1940_v38 = vsel %vm328_vm11, %v1935_v18, 0 }
0x1366   :  { %3240 = vmatpush3.bf16.msra.mxu0 %v1940_v38 }
0x1367   :  { %v3401_v42 = vpop.eup %3400  ;;  %3251 = vmatprep.subr.bf16.mxu0 %v3428_v0 }
0x1368   :  { %v1882_v45 = vmul.f32 %v3401_v42, %v3397_v31  ;;  %v2090_v12 = vpop.permute.xlu0 %2089 }
0x136a   :  { %v1884_v46 = vpack.c.bf16 %v1882_v45, %v1882_v45 }
0x136b   :  { %v3403_v50 = vpop.eup %3402 }
0x136c   :  { %v1883_v52 = vmul.f32 %v3403_v50, %v3399_v35  ;;  %3236 = vmatmul.mubr.msk.bf16.vlgmr.msra.gmra.mrb[60].mxu1 %vm199_vm2, %v1884_v46 }
0x136d   :  { %3246 = vmatpush3.bf16.msra.mxu1 %v1994_v48  ;;  %3247 = vmatprep.mubr.msk.bf16.mxu1 %vm3429_vm0, %v3428_v0 }
0x136e   :  { %v1885_v54 = vpack.c.bf16 %v1883_v52, %v1883_v52  ;;  %3257 = vmatprep.subr.bf16.mxu1 %v3428_v0 }
0x1370   :  { %3242 = vmatmul.mubr.msk.bf16.vlgmr.msra.gmra.mrb[56].mxu0 %vm199_vm2, %v1885_v54 }
0x1371   :  { %3252 = vmatpush3.bf16.msra.mxu0 %v2046_v55  ;;  %3253 = vmatprep.mubr.msk.bf16.mxu0 %vm3429_vm0, %v3428_v0 }
0x1372   :  { %3263 = vmatprep.subr.bf16.mxu0 %v3428_v0 }
0x1378   :  { %3254 = vmatmul.mubr.msk.bf16.vlgmr.msra.gmra.mrb[60].mxu0 %vm199_vm2, %v2953_v5 }
0x1379   :  { %3265 = vmatprep.mubr.msk.bf16.mxu0 %vm3429_vm0, %v3428_v0 }
0x137a   :  { %3264 = vmatpush3.bf16.xpose.msra.mxu0 %v2147_v58 }
0x137b   :  { %3275 = vmatprep.subr.bf16.mxu0 %v3428_v0 }
0x1381   :  { %3266 = vmatmul.mubr.msk.bf16.vlgmr.msra.gmra.mrb[64].mxu0 %vm199_vm2, %v2140_v59 }
0x1382   :  { %3277 = vmatprep.mubr.msk.bf16.mxu0 %vm3429_vm0, %v3428_v0 }
0x143f   :  { %v1928_v63 = vpop.f32.mrb[60].mxu1 }
0x1440   :  { %v3237_v2 = vpop.f32.mrb[61].mxu1 }
0x1441   :  { %v1931_v43 = vpop.f32.mrb[62].mxu1 }
0x1442   :  { %v3238_v60 = vpop.f32.mrb[63].mxu1 }
0x1443   :  { %v1976_v4 = vpop.f32.mrb[56].mxu0  ;;  %v1489_v60 = vld [vmem:[%s4235_s14 + $0x10] sm:$0xff] }
0x1444   :  { %v2952_v5 = vpack.c.bf16 %v1976_v4, %v1928_v63  ;;  %v3243_v6 = vpop.f32.mrb[57].mxu0  ;;  %v2315_v4 = vpack.c.bf16 %v1489_v60, %v1489_v60 }
0x1445   :  { %v1979_v9 = vpop.f32.mrb[58].mxu0 }
0x1446   :  { %v3244_v11 = vpop.f32.mrb[59].mxu0  ;;  %3248 = vmatmul.mubr.msk.bf16.vlgmr.msra.gmra.mrb[64].mxu1 %vm199_vm2, %v2952_v5  ;;  %v2325_v5 = vsel %vm328_vm11, %v2315_v4, 0 }
0x1447   :  { %3258 = vmatpush3.bf16.xpose.msra.mxu1 %v2097_v10  ;;  %3259 = vmatprep.mubr.msk.bf16.mxu1 %vm3429_vm0, %v3428_v0 }
0x1448   :  { %3269 = vmatprep.subr.bf16.mxu1 %v3428_v0 }
0x144b   :  { %v2082_v7 = vpop.f32.mrb[60].mxu0 }
0x144c   :  { %v3255_v8 = vpop.f32.mrb[61].mxu0 }
0x144d   :  { %v2085_v13 = vpop.f32.mrb[62].mxu0 }
0x144e   :  { %v3256_v16 = vpop.f32.mrb[63].mxu0  ;;  %3260 = vmatmul.mubr.msk.bf16.vlgmr.msra.gmra.mrb[68].mxu1 %vm199_vm2, %v2090_v12 }
0x144f   :  { %3271 = vmatprep.mubr.msk.bf16.mxu1 %vm3429_vm0, %v3428_v0 }
0x1454   :  { %v2183_v17 = vpop.f32.mrb[64].mxu0 }
0x1455   :  { %v2190_v19 = vmul.f32 0.35355338, %v2183_v17  ;;  %v3267_v20 = vpop.f32.mrb[65].mxu0 }
0x1456   :  { %v2186_v61 = vpop.f32.mrb[66].mxu0 }
0x1457   :  { %v3268_v21 = vpop.f32.mrb[67].mxu0  ;;  %v2192_v30 = vsel %vm3942_vm3, %v2190_v19, -1e+09 }
0x1458   :  { %v2196_v1 = vsel %vm199_vm2, %v2192_v30, -inf }
0x1459   :  { %2197 = vmax.xlane.f32.xlu1 %v2196_v1 }
0x146a   :  { %2217 = vrot.lane.b32.xlu1 %v3902_v49, %s4284_s4 }
0x146e   :  { %2372 = vrot.lane.b32.xlu1 %v3902_v49, %s4285_s10 }
0x1472   :  { %2422 = vrot.lane.b32.xlu1 %v3904_v53, %s4285_s10 }
0x1476   :  { %2420 = vrot.lane.b32.xlu1 %v3917_v3, %s4285_s10 }
0x14e6   :  { %v2198_v36 = vpop.xlane.xlu1 %2197 }
0x14e7   :  { %v2200_v24 = vsub.f32 %v2192_v30, %v2198_v36 }
0x14e9   :  { %v2203_v25 = vmul.f32 1.442695, %v2200_v24 }
0x14ea   :  { %v2218_v22 = vpop.permute.xlu1 %2217 }
0x14eb   :  { %v2223_v23 = vsel %vm328_vm11, %v2218_v22, 0  ;;  %3404 = vpow2.f32 %v2203_v25 }
0x14ec   :  { %3270 = vmatpush3.bf16.msra.mxu1 %v2223_v23 }
0x14ed   :  { %3281 = vmatprep.subr.bf16.mxu1 %v3428_v0 }
0x14f5   :  { %v3405_v38 = vpop.eup %3404 }
0x14f6   :  { %v2208_v39 = vsel %vm199_vm2, %v3405_v38, 0.0 }
0x1519   :  { %v2030_v26 = vpop.f32.mrb[64].mxu1 }
0x151a   :  { %v4064_v51 = vadd.f32 %v2082_v7, %v2030_v26  ;;  %v3249_v15 = vpop.f32.mrb[65].mxu1 }
0x151b   :  { %v2033_v28 = vpop.f32.mrb[66].mxu1 }
0x151c   :  { %v4066_v31 = vadd.f32 %v2085_v13, %v2033_v28  ;;  %v3250_v32 = vpop.f32.mrb[67].mxu1 }
0x1521   :  { %v2133_v35 = vpop.f32.mrb[68].mxu1 }
0x1522   :  { %v2189_v3 = vmul.f32 0.35355338, %v2133_v35  ;;  %v3261_v27 = vpop.f32.mrb[69].mxu1 }
0x1523   :  { %v2136_v33 = vpop.f32.mrb[70].mxu1 }
0x1524   :  { %v3262_v34 = vpop.f32.mrb[71].mxu1  ;;  %v2191_v37 = vsel %vm3938_vm15, %v2189_v3, -1e+09 }
0x1525   :  { %v2193_v18 = vsel %vm199_vm2, %v2191_v37, -inf }
0x1526   :  { %2194 = vmax.xlane.f32.xlu0 %v2193_v18 }
0x152a   :  { %2209 = vadd.xlane.f32.xlu0 %v2208_v39 }
0x15b3   :  { %v2195_v42 = vpop.xlane.xlu0 %2194 }
0x15b4   :  { %v2199_v44 = vsub.f32 %v2191_v37, %v2195_v42 }
0x15b6   :  { %v2201_v45 = vmul.f32 1.442695, %v2199_v44 }
0x15b7   :  { %v2210_v48 = vpop.xlane.xlu0 %2209 }
0x15b8   :  { %3406 = vpow2.f32 %v2201_v45 }
0x15b9   :  { %3408 = vrcp.f32 %v2210_v48 }
0x15c2   :  { %v3407_v46 = vpop.eup %3406 }
0x15c3   :  { %v2205_v47 = vsel %vm199_vm2, %v3407_v46, 0.0  ;;  %v3409_v50 = vpop.eup %3408 }
0x15c4   :  { %2206 = vadd.xlane.f32.xlu0 %v2205_v47  ;;  %v2214_v54 = vmul.f32 %v3409_v50, %v3405_v38 }
0x15c6   :  { %v2216_v57 = vpack.c.bf16 %v2214_v54, %v2214_v54 }
0x15da   :  { %2265 = vrot.lane.b32.xlu0 %v3904_v53, %s4284_s4 }
0x15de   :  { %2370 = vrot.lane.b32.xlu0 %v3915_v62, %s4285_s10  ;;  %v2373_v62 = vpop.permute.xlu1 %2372 }
0x15df   :  { %v2378_v63 = vsel %vm199_vm2, %v2373_v62, 0 }
0x15e2   :  { %v2423_v7 = vpop.permute.xlu1 %2422 }
0x15e3   :  { %v2428_v17 = vsel %vm199_vm2, %v2423_v7, 0 }
0x15e6   :  { %v2421_v22 = vpop.permute.xlu1 %2420 }
0x1651   :  { %v2207_v52 = vpop.xlane.xlu0 %2206 }
0x1652   :  { %3410 = vrcp.f32 %v2207_v52 }
0x1655   :  { %v2266_v55 = vpop.permute.xlu0 %2265 }
0x1656   :  { %v2271_v56 = vsel %vm328_vm11, %v2266_v55, 0  ;;  %v1490_v55 = vld [vmem:[%s4235_s14 + $0x18] sm:$0xff] }
0x1657   :  { %3276 = vmatpush3.bf16.msra.mxu0 %v2271_v56  ;;  %v2596_v56 = vpack.c.bf16 %v1490_v55, %v1490_v55 }
0x1658   :  { %3287 = vmatprep.subr.bf16.mxu0 %v3428_v0 }
0x1659   :  { %v2371_v43 = vpop.permute.xlu0 %2370 }
0x165a   :  { %3278 = vmatmul.mubr.msk.bf16.vlgmr.msra.gmra.mrb[68].mxu0 %vm199_vm2, %v2216_v57  ;;  %v2606_v57 = vsel %vm328_vm11, %v2596_v56, 0 }
0x165b   :  { %3289 = vmatprep.mubr.msk.bf16.mxu0 %vm3429_vm0, %v3428_v0 }
0x165c   :  { %v3411_v58 = vpop.eup %3410 }
0x165d   :  { %v2213_v59 = vmul.f32 %v3411_v58, %v3407_v46 }
0x165f   :  { %v2215_v2 = vpack.c.bf16 %v2213_v59, %v2213_v59 }
0x1660   :  { %3288 = vmatpush3.bf16.xpose.msra.mxu0 %v2378_v63 }
0x1661   :  { %3272 = vmatmul.mubr.msk.bf16.vlgmr.msra.gmra.mrb[72].mxu1 %vm199_vm2, %v2215_v2  ;;  %3299 = vmatprep.subr.bf16.mxu0 %v3428_v0 }
0x1662   :  { %3283 = vmatprep.mubr.msk.bf16.mxu1 %vm3429_vm0, %v3428_v0  ;;  %3282 = vmatpush3.bf16.msra.mxu1 %v2325_v5 }
0x1663   :  { %3293 = vmatprep.subr.bf16.mxu1 %v3428_v0 }
0x1667   :  { %3290 = vmatmul.mubr.msk.bf16.vlgmr.msra.gmra.mrb[72].mxu0 %vm199_vm2, %v2371_v43 }
0x1668   :  { %3301 = vmatprep.mubr.msk.bf16.mxu0 %vm3429_vm0, %v3428_v0 }
0x172d   :  { %v2307_v6 = vpop.f32.mrb[68].mxu0 }
0x172e   :  { %v3279_v9 = vpop.f32.mrb[69].mxu0 }
0x172f   :  { %v2310_v10 = vpop.f32.mrb[70].mxu0 }
0x1730   :  { %v3280_v11 = vpop.f32.mrb[71].mxu0 }
0x1734   :  { %v2259_v8 = vpop.f32.mrb[72].mxu1 }
0x1735   :  { %v2954_v12 = vpack.c.bf16 %v2307_v6, %v2259_v8  ;;  %v3273_v13 = vpop.f32.mrb[73].mxu1  ;;  %v2939_v8 = vld [vmem:[%s4236_s15] ss:$0 sm:$0xff] }
0x1736   :  { %v2262_v16 = vpop.f32.mrb[74].mxu1 }
0x1737   :  { %v3274_v19 = vpop.f32.mrb[75].mxu1  ;;  %3284 = vmatmul.mubr.msk.bf16.vlgmr.msra.gmra.mrb[76].mxu1 %vm199_vm2, %v2954_v12 }
0x1738   :  { %3294 = vmatpush3.bf16.xpose.msra.mxu1 %v2428_v17  ;;  %3295 = vmatprep.mubr.msk.bf16.mxu1 %vm3429_vm0, %v3428_v0 }
0x1739   :  { %3305 = vmatprep.subr.bf16.mxu1 %v3428_v0 }
0x173a   :  { %v2414_v20 = vpop.f32.mrb[72].mxu0 }
0x173b   :  { %v2470_v61 = vmul.f32 0.35355338, %v2414_v20  ;;  %v3291_v21 = vpop.f32.mrb[73].mxu0 }
0x173c   :  { %v2417_v30 = vpop.f32.mrb[74].mxu0 }
0x173d   :  { %v3292_v1 = vpop.f32.mrb[75].mxu0  ;;  %v2472_v36 = vsel %vm3938_vm15, %v2470_v61, -1e+09 }
0x173e   :  { %v2474_v23 = vsel %vm199_vm2, %v2472_v36, -inf }
0x173f   :  { %2475 = vmax.xlane.f32.xlu0 %v2474_v23  ;;  %3296 = vmatmul.mubr.msk.bf16.vlgmr.msra.gmra.mrb[80].mxu1 %vm199_vm2, %v2421_v22 }
0x1740   :  { %3307 = vmatprep.mubr.msk.bf16.mxu1 %vm3429_vm0, %v3428_v0 }
0x17cc   :  { %v2476_v24 = vpop.xlane.xlu0 %2475 }
0x17cd   :  { %v2480_v25 = vsub.f32 %v2472_v36, %v2476_v24 }
0x17cf   :  { %v2482_v26 = vmul.f32 1.442695, %v2480_v25 }
0x17d1   :  { %3412 = vpow2.f32 %v2482_v26 }
0x17db   :  { %v3413_v15 = vpop.eup %3412 }
0x17dc   :  { %v2486_v28 = vsel %vm199_vm2, %v3413_v15, 0.0 }
0x17dd   :  { %2487 = vadd.xlane.f32.xlu0 %v2486_v28 }
0x180a   :  { %v2361_v32 = vpop.f32.mrb[76].mxu1 }
0x180b   :  { %v4108_v14 = vadd.f32 %v2361_v32, %v4064_v51  ;;  %v3285_v35 = vpop.f32.mrb[77].mxu1 }
0x180c   :  { %v2364_v3 = vpop.f32.mrb[78].mxu1 }
0x180d   :  { %v4111_v27 = vadd.f32 %v2364_v3, %v4066_v31  ;;  %v3286_v33 = vpop.f32.mrb[79].mxu1  ;;  %v2706_v3 = vld [vmem:[%s4237_s18 + $0x8] sm:$0xff] }
0x180e   :  { %v2707_v33 = vld [vmem:[%s4237_s18 + $0x10] sm:$0xff] }
0x1812   :  { %v2464_v34 = vpop.f32.mrb[80].mxu1 }
0x1813   :  { %v2471_v37 = vmul.f32 0.35355338, %v2464_v34  ;;  %v3297_v18 = vpop.f32.mrb[81].mxu1  ;;  %v2708_v34 = vld [vmem:[%s4237_s18 + $0x18] sm:$0xff] }
0x1814   :  { %v2467_v38 = vpop.f32.mrb[82].mxu1  ;;  %v2765_v18 = vld [vmem:[%s4238_s20] sm:$0xff] }
0x1815   :  { %v3298_v39 = vpop.f32.mrb[83].mxu1  ;;  %v2473_v42 = vsel %vm3942_vm3, %v2471_v37, -1e+09  ;;  %v2712_v37 = vpack.c.bf16 %v2708_v34, %v2707_v33  ;;  %v2766_v38 = vld [vmem:[%s4238_s20 + $0x8] sm:$0xff] }
0x1816   :  { %v2477_v44 = vsel %vm199_vm2, %v2473_v42, -inf  ;;  %v2767_v39 = vld [vmem:[%s4238_s20 + $0x10] sm:$0xff] }
0x1817   :  { %2478 = vmax.xlane.f32.xlu1 %v2477_v44  ;;  %v2768_v44 = vld [vmem:[%s4238_s20 + $0x18] sm:$0xff] }
0x1828   :  { %2498 = vrot.lane.b32.xlu1 %v3902_v49, %s4286_s1 }
0x186a   :  { %v2488_v51 = vpop.xlane.xlu0 %2487 }
0x186b   :  { %3414 = vrcp.f32 %v2488_v51  ;;  %v2776_v51 = vpack.c.bf16 %v2768_v44, %v2767_v39 }
0x1875   :  { %v3415_v45 = vpop.eup %3414 }
0x1876   :  { %v2494_v47 = vmul.f32 %v3415_v45, %v3413_v15 }
0x1878   :  { %v2496_v29 = vpack.c.bf16 %v2494_v47, %v2494_v47 }
0x18a4   :  { %v2479_v31 = vpop.xlane.xlu1 %2478 }
0x18a5   :  { %v2481_v46 = vsub.f32 %v2473_v42, %v2479_v31  ;;  %v2775_v42 = vpack.c.bf16 %v2766_v38, %v2765_v18 }
0x18a7   :  { %v2484_v48 = vmul.f32 1.442695, %v2481_v46 }
0x18a8   :  { %v2499_v50 = vpop.permute.xlu1 %2498 }
0x18a9   :  { %3416 = vpow2.f32 %v2484_v48  ;;  %v2504_v52 = vsel %vm328_vm11, %v2499_v50, 0 }
0x18aa   :  { %3300 = vmatpush3.bf16.msra.mxu0 %v2504_v52 }
0x18ab   :  { %3311 = vmatprep.subr.bf16.mxu0 %v3428_v0 }
0x18ad   :  { %3302 = vmatmul.mubr.msk.bf16.vlgmr.msra.gmra.mrb[76].mxu0 %vm199_vm2, %v2496_v29  ;;  %v2940_v29 = vld [vmem:[%s4239_s16] ss:$0 sm:$0xff] }
0x18ae   :  { %3313 = vmatprep.mubr.msk.bf16.mxu0 %vm3429_vm0, %v3428_v0  ;;  %3312 = vmatpush3.bf16.msra.mxu0 %v2606_v57  ;;  %v2941_v57 = vld [vmem:[%s4240_s17] ss:$0 sm:$0xff] }
0x18af   :  { %3325 = vmatprep.subr.bf16.mxu0 %v3428_v0 }
0x18b3   :  { %v3417_v49 = vpop.eup %3416 }
0x18b4   :  { %v2489_v54 = vsel %vm199_vm2, %v3417_v49, 0.0 }
0x18b5   :  { %2490 = vadd.xlane.f32.xlu0 %v2489_v54 }
0x18cb   :  { %2546 = vrot.lane.b32.xlu0 %v3904_v53, %s4286_s1 }
0x1942   :  { %v2491_v58 = vpop.xlane.xlu0 %2490 }
0x1943   :  { %3418 = vrcp.f32 %v2491_v58 }
0x1946   :  { %v2547_v62 = vpop.permute.xlu0 %2546 }
0x1947   :  { %v2552_v59 = vsel %vm328_vm11, %v2547_v62, 0 }
0x1948   :  { %3306 = vmatpush3.bf16.msra.mxu1 %v2552_v59 }
0x1949   :  { %3317 = vmatprep.subr.bf16.mxu1 %v3428_v0 }
0x194d   :  { %v3419_v63 = vpop.eup %3418 }
0x194e   :  { %v2495_v53 = vmul.f32 %v3419_v63, %v3417_v49 }
0x1950   :  { %v2497_v2 = vpack.c.bf16 %v2495_v53, %v2495_v53  ;;  %v2769_v53 = vld [vmem:[%s4238_s20 + $0x20] sm:$0xff] }
0x1952   :  { %3308 = vmatmul.mubr.msk.bf16.vlgmr.msra.gmra.mrb[84].mxu1 %vm199_vm2, %v2497_v2  ;;  %v2770_v2 = vld [vmem:[%s4238_s20 + $0x28] sm:$0xff] }
0x1953   :  { %3321 = vmatprep.mubr.msk.bf16.mxu1 %vm3429_vm0, %v3428_v0 }
0x1980   :  { %v2540_v43 = vpop.f32.mrb[76].mxu0 }
0x1981   :  { %v3303_v60 = vpop.f32.mrb[77].mxu0 }
0x1982   :  { %v2543_v4 = vpop.f32.mrb[78].mxu0  ;;  %v2771_v60 = vld [vmem:[%s4238_s20 + $0x30] sm:$0xff] }
0x1983   :  { %v3304_v5 = vpop.f32.mrb[79].mxu0  ;;  %v2772_v4 = vld [vmem:[%s4238_s20 + $0x38] sm:$0xff] }
0x1984   :  { %v2778_v5 = vpack.c.bf16 %v2772_v4, %v2771_v60 }
0x1a25   :  { %v2588_v6 = vpop.f32.mrb[84].mxu1 }
0x1a26   :  { %v2955_v9 = vpack.c.bf16 %v2588_v6, %v2540_v43  ;;  %v3309_v10 = vpop.f32.mrb[85].mxu1  ;;  %v2777_v43 = vpack.c.bf16 %v2770_v2, %v2769_v53  ;;  %v2942_v6 = vld [vmem:[%s4241_s19] ss:$0 sm:$0xff] }
0x1a27   :  { %v2591_v11 = vpop.f32.mrb[86].mxu1 }
0x1a28   :  { %v3310_v7 = vpop.f32.mrb[87].mxu1  ;;  %3314 = vmatmul.mubr.msk.bf16.vlgmr.msra.gmra.mrb[80].mxu0 %vm199_vm2, %v2955_v9 }
0x1a29   :  { %3333 = vmatprep.mubr.msk.bf16.mxu0 %vm3429_vm0, %v3428_v0  ;;  %3326 = vmatpush3.bf16.msra.mxu0 %v2775_v42  ;;  %vm2785_vm0 = vcmask 523264   ;;  %v2946_v42 = vld [vmem:[%s4243_s22] ss:$0 sm:$0xff] }
0x1a2a   :  { %3327 = vmatprep.subr.bf16.mxu0 %v3428_v0 }
0x1a2d   :  { %3328 = vmatpush3.bf16.msra.mxu0 %v2776_v51 }
0x1a2e   :  { %3329 = vmatprep.subr.bf16.mxu0 %v3428_v0 }
0x1a31   :  { %3330 = vmatpush3.bf16.msra.mxu0 %v2777_v43 }
0x1a32   :  { %3331 = vmatprep.subr.bf16.mxu0 %v3428_v0 }
0x1a35   :  { %3332 = vmatpush3.bf16.msra.mxu0 %v2778_v5 }
0x1afb   :  { %v2642_v12 = vpop.f32.mrb[80].mxu0 }
0x1afc   :  { %v2649_v13 = vadd.f32 %v2642_v12, %v4108_v14  ;;  %v3315_v16 = vpop.f32.mrb[81].mxu0 }
0x1afd   :  { %v2645_v17 = vpop.f32.mrb[82].mxu0 }
0x1afe   :  { %v2657_v19 = vadd.f32 %v2939_v8, %v2649_v13  ;;  %v2650_v20 = vadd.f32 %v2645_v17, %v4111_v27  ;;  %v3316_v61 = vpop.f32.mrb[83].mxu0  ;;  %v2944_v17 = vld [vmem:[%s4242_s21] ss:$0 sm:$0xff] }
0x1b00   :  { %v2658_v21 = vadd.f32 %v2939_v8, %v2650_v20  ;;  %v2659_v30 = vadd.f32 %v2657_v19, %v3890_v40 }
0x1b02   :  { %v2663_v1 = vsel %vm96_vm1, %v2659_v30, 0.0  ;;  %v2660_v36 = vadd.f32 %v2658_v21, %v3892_v41  ;;  %v2705_v41 = vld [vmem:[%s4237_s18] sm:$0xff] }
0x1b03   :  { %2664 = vadd.xlane.f32.xlu1 %v2663_v1  ;;  %v2711_v27 = vpack.c.bf16 %v2706_v3, %v2705_v41 }
0x1b04   :  { %v2666_v22 = vsel %vm96_vm1, %v2660_v36, 0.0 }
0x1b05   :  { %2667 = vadd.xlane.f32.xlu0 %v2666_v22  ;;  %3318 = vmatpush3.bf16.msra.mxu1 %v2711_v27 }
0x1b06   :  { %3319 = vmatprep.subr.bf16.mxu1 %v3428_v0 }
0x1b09   :  { %3320 = vmatpush3.bf16.msra.mxu1 %v2712_v37 }
0x1b90   :  { %v2665_v23 = vpop.xlane.xlu1 %2664 }
0x1b91   :  { %v2669_v24 = vmul.f32 0.03125, %v2665_v23 }
0x1b92   :  { %v2668_v25 = vpop.xlane.xlu0 %2667 }
0x1b93   :  { %v2671_v26 = vsub.f32 %v2659_v30, %v2669_v24  ;;  %v2670_v15 = vmul.f32 0.03125, %v2668_v25 }
0x1b95   :  { %v2672_v28 = vsub.f32 %v2660_v36, %v2670_v15  ;;  %v2673_v32 = vmul.f32 %v2671_v26, %v2671_v26 }
0x1b97   :  { %v2675_v14 = vsel %vm96_vm1, %v2673_v32, 0.0  ;;  %v2674_v35 = vmul.f32 %v2672_v28, %v2672_v28 }
0x1b98   :  { %2676 = vadd.xlane.f32.xlu1 %v2675_v14 }
0x1b99   :  { %v2678_v40 = vsel %vm96_vm1, %v2674_v35, 0.0 }
0x1b9a   :  { %2679 = vadd.xlane.f32.xlu0 %v2678_v40 }
0x1c25   :  { %v2677_v45 = vpop.xlane.xlu1 %2676 }
0x1c26   :  { %v2681_v31 = vmul.f32 0.03125, %v2677_v45  ;;  %v2947_v45 = vld [vmem:[%s4244_s23] ss:$0 sm:$0xff] }
0x1c27   :  { %v2680_v46 = vpop.xlane.xlu0 %2679 }
0x1c28   :  { %v2683_v47 = vadd.f32 1e-05, %v2681_v31  ;;  %v2682_v48 = vmul.f32 0.03125, %v2680_v46 }
0x1c2a   :  { %3420 = vrsqrt.f32 %v2683_v47  ;;  %v2684_v50 = vadd.f32 1e-05, %v2682_v48 }
0x1c2c   :  { %3422 = vrsqrt.f32 %v2684_v50 }
0x1c34   :  { %v3421_v52 = vpop.eup %3420 }
0x1c35   :  { %v2687_v49 = vmul.f32 %v3421_v52, %v2671_v26 }
0x1c36   :  { %v3423_v54 = vpop.eup %3422 }
0x1c37   :  { %v2695_v55 = vmul.f32 %v2940_v29, %v2687_v49  ;;  %v2688_v56 = vmul.f32 %v3423_v54, %v2672_v28 }
0x1c39   :  { %v2696_v58 = vmul.f32 %v2940_v29, %v2688_v56  ;;  %v2703_v62 = vadd.f32 %v2941_v57, %v2695_v55 }
0x1c3b   :  { %v2704_v59 = vadd.f32 %v2941_v57, %v2696_v58 }
0x1c3d   :  { %v2710_v63 = vpack.c.bf16 %v2704_v59, %v2703_v62 }
0x1c3f   :  { %3322 = vmatmul.mubr.msk.bf16.vlgmr.msra.gmra.mrb[88].mxu1 %vm96_vm1, %v2710_v63 }
0x1d12   :  { %v2756_v9 = vpop.f32.mrb[88].mxu1 }
0x1d13   :  { %v2757_v10 = vadd.f32 %v2942_v6, %v2756_v9  ;;  %v3323_v11 = vpop.f32.mrb[89].mxu1 }
0x1d14   :  { %v2759_v7 = vpop.f32.mrb[90].mxu1 }
0x1d15   :  { %v2760_v8 = vadd.f32 %v2942_v6, %v2759_v7  ;;  %v3324_v0 = vpop.f32.mrb[91].mxu1  ;;  %v2763_v12 = vmax.f32 %v2757_v10, 0.0 }
0x1d17   :  { %v2764_v13 = vmax.f32 %v2760_v8, 0.0 }
0x1d19   :  { %v2774_v16 = vpack.c.bf16 %v2764_v13, %v2763_v12 }
0x1d1b   :  { %3334 = vmatmul.mubr.msk.bf16.vlgmr.msra.gmra.mrb[84].mxu0 %vm2785_vm0, %v2774_v16 }
0x1dee   :  { %v2823_v19 = vpop.f32.mrb[84].mxu0 }
0x1def   :  { %v2824_v20 = vadd.f32 %v2944_v17, %v2823_v19  ;;  %v3335_v61 = vpop.f32.mrb[85].mxu0 }
0x1df0   :  { %v2826_v21 = vpop.f32.mrb[86].mxu0 }
0x1df1   :  { %v2827_v30 = vadd.f32 %v2944_v17, %v2826_v21  ;;  %v3336_v1 = vpop.f32.mrb[87].mxu0  ;;  %v2830_v36 = vadd.f32 %v2824_v20, %v2703_v62 }
0x1df3   :  { %v2834_v22 = vsel %vm96_vm1, %v2830_v36, 0.0  ;;  %v2831_v23 = vadd.f32 %v2827_v30, %v2704_v59 }
0x1df4   :  { %2835 = vadd.xlane.f32.xlu1 %v2834_v22 }
0x1df5   :  { %v2837_v24 = vsel %vm96_vm1, %v2831_v23, 0.0 }
0x1df6   :  { %2838 = vadd.xlane.f32.xlu0 %v2837_v24 }
0x1e81   :  { %v2836_v25 = vpop.xlane.xlu1 %2835 }
0x1e82   :  { %v2840_v26 = vmul.f32 0.03125, %v2836_v25 }
0x1e83   :  { %v2839_v15 = vpop.xlane.xlu0 %2838 }
0x1e84   :  { %v2842_v28 = vsub.f32 %v2830_v36, %v2840_v26  ;;  %v2841_v32 = vmul.f32 0.03125, %v2839_v15 }
0x1e86   :  { %v2843_v14 = vsub.f32 %v2831_v23, %v2841_v32  ;;  %v2844_v35 = vmul.f32 %v2842_v28, %v2842_v28 }
0x1e88   :  { %v2846_v40 = vsel %vm96_vm1, %v2844_v35, 0.0  ;;  %v2845_v41 = vmul.f32 %v2843_v14, %v2843_v14 }
0x1e89   :  { %2847 = vadd.xlane.f32.xlu1 %v2846_v40 }
0x1e8a   :  { %v2849_v3 = vsel %vm96_vm1, %v2845_v41, 0.0 }
0x1e8b   :  { %2850 = vadd.xlane.f32.xlu0 %v2849_v3 }
0x1f16   :  { %v2848_v27 = vpop.xlane.xlu1 %2847 }
0x1f17   :  { %v2852_v33 = vmul.f32 0.03125, %v2848_v27 }
0x1f18   :  { %v2851_v34 = vpop.xlane.xlu0 %2850 }
0x1f19   :  { %v2854_v37 = vadd.f32 1e-05, %v2852_v33  ;;  %v2853_v18 = vmul.f32 0.03125, %v2851_v34 }
0x1f1b   :  { %3424 = vrsqrt.f32 %v2854_v37  ;;  %v2855_v38 = vadd.f32 1e-05, %v2853_v18 }
0x1f1d   :  { %3426 = vrsqrt.f32 %v2855_v38 }
0x1f25   :  { %v3425_v39 = vpop.eup %3424 }
0x1f26   :  { %v2858_v44 = vmul.f32 %v3425_v39, %v2842_v28 }
0x1f27   :  { %v3427_v51 = vpop.eup %3426 }
0x1f28   :  { %v2866_v31 = vmul.f32 %v2946_v42, %v2858_v44  ;;  %v2859_v46 = vmul.f32 %v3427_v51, %v2843_v14 }
0x1f2a   :  { %v2874_v47 = vadd.f32 %v2947_v45, %v2866_v31  ;;  %v2867_v48 = vmul.f32 %v2946_v42, %v2859_v46 }
0x1f2c   :  { %2876 = vst.msk [vmem:[%s4245_s24] sm:$0xff] %vm96_vm1, %v2874_v47  ;;  %v2875_v50 = vadd.f32 %v2947_v45, %v2867_v48 }
0x1f2e   :  { %2877 = vst.msk [vmem:[%s4245_s24 + $0x8] sm:$0xff] %vm96_vm1, %v2875_v50 }

</bundles_post_ra>
